<compile_context>
chip_gen: v7x
topology: tpu7x:2x2x1
jax: 0.10.0
libtpu: 0.0.40
codegen_flags: <defaults>
</compile_context>

<pallas_src>
import numpy as np
import jax
import jax.numpy as jnp
from jax.experimental import pallas as pl
from jax.experimental.pallas import tpu as pltpu


# ----------------------------------------------------------------------------
# Host-side precompute
# ----------------------------------------------------------------------------
def _bilinear_matrix(in_size, out_size):
    """Resize matrix A (out, in): bilinear, align_corners=True (PyTorch semantics)."""
    A = np.zeros((out_size, in_size), dtype=np.float32)
    if out_size == 1:
        A[0, 0] = 1.0  # PyTorch align_corners=True with out==1 picks src coord 0
        return A
    scale = (in_size - 1) / (out_size - 1)
    for i in range(out_size):
        src = i * scale
        i0 = min(int(np.floor(src)), in_size - 1)
        i1 = min(i0 + 1, in_size - 1)
        f = src - i0
        A[i, i0] += 1.0 - f
        A[i, i1] += f
    return A


def _pad_rows(A, pad):
    """Insert `pad` zero rows on both sides (folds conv zero-padding into the resize)."""
    if pad == 0:
        return A.astype(np.float32)
    out = np.zeros((A.shape[0] + 2 * pad, A.shape[1]), dtype=np.float32)
    out[pad:pad + A.shape[0], :] = A
    return out


def _compose_operator(conv_w, H_in, W_in, H_out, W_out, K, stride, padding):
    """Fuse bilinear resize + zero pad + KxK/stride conv weights into one operator
    T of shape (C_in*H_in*W_in, C_out*Hc*Wc), plus the conv output spatial size."""
    conv_w = np.asarray(conv_w, np.float32)          # (C_out, C_in, K, K)
    Hp, Wp = H_out + 2 * padding, W_out + 2 * padding
    Hc = (Hp - K) // stride + 1
    Wc = (Wp - K) // stride + 1
    Q = H_in * W_in

    Ah = _pad_rows(_bilinear_matrix(H_in, H_out), padding)   # (Hp, H_in)
    Aw = _pad_rows(_bilinear_matrix(W_in, W_out), padding)   # (Wp, W_in)
    Mpad = np.kron(Ah, Aw).reshape(Hp, Wp, Q)                # resize+pad operator

    taps = np.empty((K, K, Hc, Wc, Q), np.float32)
    for kh in range(K):
        for kw in range(K):
            taps[kh, kw] = Mpad[kh:kh + (Hc - 1) * stride + 1:stride,
                                kw:kw + (Wc - 1) * stride + 1:stride, :]

    # T[ci, q, co, h, w] = sum_{kh,kw} W[co,ci,kh,kw] * taps[kh,kw,h,w,q]
    T = np.einsum('oikl,klhwq->iqohw', conv_w, taps, optimize=True)
    C_in, C_out = conv_w.shape[1], conv_w.shape[0]
    return T.reshape(C_in * Q, C_out * Hc * Wc), Hc, Wc


# ----------------------------------------------------------------------------
# Pallas kernel
# ----------------------------------------------------------------------------
def _make_kernel(B_tile, C_chunk, HWc, Cg, eps, mm_dtype, approx_gelu):
    G_chunk = C_chunk // Cg
    inv_cnt = np.float32(1.0 / (HWc * Cg))
    inv_sqrt2 = np.float32(1.0 / np.sqrt(2.0))
    eps_f = np.float32(eps)
    f32 = jnp.float32

    def group_sum(s):  # s: (B_tile, C_chunk, 1) per-channel sums -> per-group sums
        if Cg == 1:
            return s
        sg = jnp.sum(s.reshape(B_tile, G_chunk, Cg, 1), axis=2, keepdims=True)
        return jnp.broadcast_to(sg, (B_tile, G_chunk, Cg, 1)).reshape(B_tile, C_chunk, 1)

    def group_norm(v, gamma, beta):   # v: (B_tile, C_chunk, HWc) f32
        mu = group_sum(jnp.sum(v, axis=-1, keepdims=True)) * inv_cnt
        d = v - mu
        var = group_sum(jnp.sum(d * d, axis=-1, keepdims=True)) * inv_cnt
        return d * jax.lax.rsqrt(var + eps_f) * gamma + beta

    def gelu(v):
        if approx_gelu:                      # tanh GELU -> EUP (optional, off by default)
            return jax.nn.gelu(v, approximate=True)
        return 0.5 * v * (1.0 + jax.lax.erf(v * inv_sqrt2))   # exact nn.GELU default

    def kernel(x_ref, t_ref, pp_ref, out_ref, y3_ref):
        x = x_ref[...].astype(mm_dtype)                           # (B_tile, C_in*Q)
        # resize + pad + im2col + conv, fused into ONE lane-dense MXU matmul
        y2 = jnp.dot(x, t_ref[...], preferred_element_type=f32)   # (B_tile, C_chunk*HWc)

        # channels-first 3D working view (B_tile, C_chunk, HWc); built with static,
        # 128-aligned lane slices + sublane stores (always lowers; no shape_cast).
        for c in range(C_chunk):
            y3_ref[:, c, :] = y2[:, c * HWc:(c + 1) * HWc]
        y = y3_ref[...]

        pp = pp_ref[...]                                          # (C_chunk, 8) f32
        bias, g1, b1, g2, b2 = (pp[:, i:i + 1] for i in range(5))

        y = y + bias
        y = gelu(group_norm(y, g1, b1))
        y = gelu(group_norm(y, g2, b2))
        out_ref[...] = y.astype(out_ref.dtype)                    # lane-dense NCHW store

    return kernel


# ----------------------------------------------------------------------------
# Wrapper
# ----------------------------------------------------------------------------
def interpolate_conv_block_pallas(x, params, size, kernel_size, stride, padding,
                                  num_groups=32, eps=1e-5, use_bf16_matmul=True,
                                  approx_gelu=False):
    B, C_in, H_in, W_in = x.shape
    H_out, W_out = size
    C_out = params["conv_w"].shape[0]
    K = kernel_size
    assert C_out % num_groups == 0
    Cg = C_out // num_groups

    # host-composed resize+pad+conv operator (GroupNorm / GELU stay in the kernel)
    T_np, Hc, Wc = _compose_operator(params["conv_w"], H_in, W_in, H_out, W_out,
                                     K, stride, padding)
    HWc = Hc * Wc
    CinQ = C_in * H_in * W_in

    mm_dtype = jnp.bfloat16 if use_bf16_matmul else jnp.float32
    t_dev = jnp.asarray(T_np, dtype=mm_dtype)

    # pack bias + (gamma, beta) x2 into a single (C_out, 8) array -> one tiny DMA
    pp = np.zeros((C_out, 8), np.float32)
    pp[:, 0] = np.asarray(params["conv_b"], np.float32)
    pp[:, 1] = np.asarray(params["gn1_g"], np.float32)
    pp[:, 2] = np.asarray(params["gn1_b"], np.float32)
    pp[:, 3] = np.asarray(params["gn2_g"], np.float32)
    pp[:, 4] = np.asarray(params["gn2_b"], np.float32)
    pp_dev = jnp.asarray(pp)

    # batch tiling (block dim must be the full dim or a multiple of 8)
    if B <= 8 or B % 8 == 0:
        B_tile = min(B, 8)
    else:
        B_tile = B
    nb = B // B_tile

    # channel-chunk axis: second parallel grid axis (keeps both v7x TCs busy even when
    # all images fit in one batch block); chunks hold whole groups and obey tiling rules.
    nc = 1
    if (C_out % 2 == 0 and (C_out // 2) % Cg == 0 and (C_out // 2) % 8 == 0
            and ((C_out // 2) * HWc) % 128 == 0):
        nc = 2
    C_chunk = C_out // nc

    x2 = x.reshape(B, CinQ)   # NCHW flatten == the (ci, q) row ordering of T (free)

    kernel = _make_kernel(B_tile, C_chunk, HWc, Cg, eps, mm_dtype, approx_gelu)

    def spec(shape, index_map, invariant):
        # grid-invariant operands: single-buffer (no pointless double-buffer DMA/VMEM)
        if invariant:
            return pl.BlockSpec(shape, index_map, pipeline_mode=pl.Buffered(1))
        return pl.BlockSpec(shape, index_map)

    in_specs = [
        spec((B_tile, CinQ), lambda c, b: (b, 0), invariant=(nb == 1)),
        spec((CinQ, C_chunk * HWc), lambda c, b: (0, c), invariant=(nc == 1)),
        spec((C_chunk, 8), lambda c, b: (c, 0), invariant=(nc == 1)),
    ]
    out_spec = pl.BlockSpec((B_tile, C_chunk, HWc), lambda c, b: (b, c, 0))

    out = pl.pallas_call(
        kernel,
        out_shape=jax.ShapeDtypeStruct((B, C_out, HWc), x.dtype),
        grid_spec=pltpu.PrefetchScalarGridSpec(
            num_scalar_prefetch=0,
            grid=(nc, nb),                 # batch fastest: operator block fetched once/chunk
            in_specs=in_specs,
            out_specs=out_spec,
            scratch_shapes=[pltpu.VMEM((B_tile, C_chunk, HWc), jnp.float32)],
        ),
        compiler_params=pltpu.CompilerParams(
            dimension_semantics=("parallel", "parallel"),
            vmem_limit_bytes=32 * 1024 * 1024),
    )(x2, t_dev, pp_dev)

    return out.reshape(B, C_out, Hc, Wc)   # already NCHW


# ----------------------------------------------------------------------------
# Pure-JAX reference (mirrors the PyTorch module)
# ----------------------------------------------------------------------------
def interpolate_conv_block_reference(x, params, size, kernel_size, stride, padding,
                                     num_groups=32, eps=1e-5):
    H_out, W_out = size
    _, _, H_in, W_in = x.shape
    hi = jax.lax.Precision.HIGHEST
    Ah = jnp.asarray(_bilinear_matrix(H_in, H_out))
    Aw = jnp.asarray(_bilinear_matrix(W_in, W_out))
    xi = jnp.einsum('oh,bchw->bcow', Ah, x, precision=hi)
    xi = jnp.einsum('vw,bcow->bcov', Aw, xi, precision=hi)

    y = jax.lax.conv_general_dilated(
        xi, params["conv_w"], (stride, stride),
        ((padding, padding), (padding, padding)),
        dimension_numbers=('NCHW', 'OIHW', 'NCHW'), precision=hi)
    y = y + params["conv_b"][None, :, None, None]

    def gn(v, g, b):
        Bn, C, H, W = v.shape
        vg = v.reshape(Bn, num_groups, C // num_groups, H, W)
        mu = vg.mean(axis=(2, 3, 4), keepdims=True)
        var = ((vg - mu) ** 2).mean(axis=(2, 3, 4), keepdims=True)
        vn = ((vg - mu) / jnp.sqrt(var + eps)).reshape(Bn, C, H, W)
        return vn * g[None, :, None, None] + b[None, :, None, None]

    def gelu(v):
        return 0.5 * v * (1.0 + jax.lax.erf(v / jnp.sqrt(2.0)))

    y = gelu(gn(y, params["gn1_g"], params["gn1_b"]))
    y = gelu(gn(y, params["gn2_g"], params["gn2_b"]))
    return y


# ----------------------------------------------------------------------------
# Deterministic init + smoke test
# ----------------------------------------------------------------------------
if __name__ == "__main__":
    # GroupNorm(32, C_out) forces C_out % 32 == 0
    B, C_in, H_in, W_in = 2, 4, 8, 8
    C_out, K, stride, padding = 32, 3, 1, 1
    size = (16, 16)

    key = jax.random.PRNGKey(0)
    kx, kw, kb, kg1, kb1, kg2, kb2 = jax.random.split(key, 7)
    x = jax.random.normal(kx, (B, C_in, H_in, W_in), jnp.float32)
    params = {
        "conv_w": 0.2 * jax.random.normal(kw, (C_out, C_in, K, K), jnp.float32),
        "conv_b": 0.1 * jax.random.normal(kb, (C_out,), jnp.float32),
        "gn1_g": 1.0 + 0.1 * jax.random.normal(kg1, (C_out,), jnp.float32),
        "gn1_b": 0.1 * jax.random.normal(kb1, (C_out,), jnp.float32),
        "gn2_g": 1.0 + 0.1 * jax.random.normal(kg2, (C_out,), jnp.float32),
        "gn2_b": 0.1 * jax.random.normal(kb2, (C_out,), jnp.float32),
    }

    ref = jax.block_until_ready(
        interpolate_conv_block_reference(x, params, size, K, stride, padding))

    # f32 MXU path: checks the fused-operator semantics tightly
    out_f32 = jax.block_until_ready(
        interpolate_conv_block_pallas(x, params, size, K, stride, padding,
                                      use_bf16_matmul=False))
    np.testing.assert_allclose(np.asarray(out_f32), np.asarray(ref),
                               rtol=1e-2, atol=1e-2)

    # default path: bf16 MXU operands (f32 accumulation, f32 GroupNorm/GELU)
    out_bf16 = jax.block_until_ready(
        interpolate_conv_block_pallas(x, params, size, K, stride, padding))
    np.testing.assert_allclose(np.asarray(out_bf16), np.asarray(ref),
                               rtol=4e-2, atol=4e-2)

    print("KERNEL_OK")
</pallas_src>

<mosaic_0001>
module attributes {stable_mosaic.version = 11 : i64} {
  func.func @kernel(%arg0: i32, %arg1: i32, %arg2: memref<2x256xf32, #tpu.memory_space<vmem>>, %arg3: memref<256x4096xf32, #tpu.memory_space<vmem>>, %arg4: memref<16x8xf32, #tpu.memory_space<vmem>>, %arg5: memref<2x16x256xf32, #tpu.memory_space<vmem>>, %arg6: memref<2x16x256xf32, #tpu.memory_space<vmem>>) attributes {dimension_semantics = [#tpu.dimension_semantics<parallel>, #tpu.dimension_semantics<parallel>], iteration_bounds = array<i64: 2, 1>, scalar_prefetch = 0 : i64, scratch_operands = 1 : i64, tpu.core_type = #tpu.core_type<tc>, window_params = [{pipeline_mode = #tpu.pipeline_mode<synchronous>, transform_indices = @transform_0, window_bounds = array<i64: 2, 256>}, {transform_indices = @transform_1, window_bounds = array<i64: 256, 4096>}, {transform_indices = @transform_2, window_bounds = array<i64: 16, 8>}, {transform_indices = @transform_3, window_bounds = array<i64: 2, 16, 256>}]} {
    %c0 = arith.constant 0 : index
    %c0_0 = arith.constant 0 : index
    %0 = vector.load %arg2[%c0, %c0_0] : memref<2x256xf32, #tpu.memory_space<vmem>>, vector<2x256xf32>
    %c0_1 = arith.constant 0 : index
    %c0_2 = arith.constant 0 : index
    %1 = vector.load %arg3[%c0_1, %c0_2] : memref<256x4096xf32, #tpu.memory_space<vmem>>, vector<256x4096xf32>
    %cst = arith.constant dense<0.000000e+00> : vector<2x4096xf32>
    %2 = tpu.matmul %0, %1, %cst {dimension_numbers = #tpu.dot_dimension_numbers<[1], [0], [0], [1], [0, 0, 1, 1], [], []>} : vector<2x256xf32>, vector<256x4096xf32>, vector<2x4096xf32> -> vector<2x4096xf32>
    %3 = vector.extract_strided_slice %2 {offsets = [0, 0], sizes = [2, 256], strides = [1, 1]} : vector<2x4096xf32> to vector<2x256xf32>
    %c0_3 = arith.constant 0 : index
    %c0_4 = arith.constant 0 : index
    %c0_5 = arith.constant 0 : index
    %4 = vector.load %arg6[%c0_3, %c0_4, %c0_5] : memref<2x16x256xf32, #tpu.memory_space<vmem>>, vector<2x1x256xf32>
    %5 = vector.shape_cast %4 : vector<2x1x256xf32> to vector<2x256xf32>
    %6 = vector.shape_cast %3 : vector<2x256xf32> to vector<2x1x256xf32>
    tpu.vector_store %arg6[%c0_3, %c0_4, %c0_5], %6 {strides = array<i32>} : memref<2x16x256xf32, #tpu.memory_space<vmem>>, vector<2x1x256xf32>,
    %7 = vector.extract_strided_slice %2 {offsets = [0, 256], sizes = [2, 256], strides = [1, 1]} : vector<2x4096xf32> to vector<2x256xf32>
    %c0_6 = arith.constant 0 : index
    %c1 = arith.constant 1 : index
    %c0_7 = arith.constant 0 : index
    %8 = vector.load %arg6[%c0_6, %c1, %c0_7] : memref<2x16x256xf32, #tpu.memory_space<vmem>>, vector<2x1x256xf32>
    %9 = vector.shape_cast %8 : vector<2x1x256xf32> to vector<2x256xf32>
    %10 = vector.shape_cast %7 : vector<2x256xf32> to vector<2x1x256xf32>
    tpu.vector_store %arg6[%c0_6, %c1, %c0_7], %10 {strides = array<i32>} : memref<2x16x256xf32, #tpu.memory_space<vmem>>, vector<2x1x256xf32>,
    %11 = vector.extract_strided_slice %2 {offsets = [0, 512], sizes = [2, 256], strides = [1, 1]} : vector<2x4096xf32> to vector<2x256xf32>
    %c0_8 = arith.constant 0 : index
    %c2 = arith.constant 2 : index
    %c0_9 = arith.constant 0 : index
    %12 = vector.load %arg6[%c0_8, %c2, %c0_9] : memref<2x16x256xf32, #tpu.memory_space<vmem>>, vector<2x1x256xf32>
    %13 = vector.shape_cast %12 : vector<2x1x256xf32> to vector<2x256xf32>
    %14 = vector.shape_cast %11 : vector<2x256xf32> to vector<2x1x256xf32>
    tpu.vector_store %arg6[%c0_8, %c2, %c0_9], %14 {strides = array<i32>} : memref<2x16x256xf32, #tpu.memory_space<vmem>>, vector<2x1x256xf32>,
    %15 = vector.extract_strided_slice %2 {offsets = [0, 768], sizes = [2, 256], strides = [1, 1]} : vector<2x4096xf32> to vector<2x256xf32>
    %c0_10 = arith.constant 0 : index
    %c3 = arith.constant 3 : index
    %c0_11 = arith.constant 0 : index
    %16 = vector.load %arg6[%c0_10, %c3, %c0_11] : memref<2x16x256xf32, #tpu.memory_space<vmem>>, vector<2x1x256xf32>
    %17 = vector.shape_cast %16 : vector<2x1x256xf32> to vector<2x256xf32>
    %18 = vector.shape_cast %15 : vector<2x256xf32> to vector<2x1x256xf32>
    tpu.vector_store %arg6[%c0_10, %c3, %c0_11], %18 {strides = array<i32>} : memref<2x16x256xf32, #tpu.memory_space<vmem>>, vector<2x1x256xf32>,
    %19 = vector.extract_strided_slice %2 {offsets = [0, 1024], sizes = [2, 256], strides = [1, 1]} : vector<2x4096xf32> to vector<2x256xf32>
    %c0_12 = arith.constant 0 : index
    %c4 = arith.constant 4 : index
    %c0_13 = arith.constant 0 : index
    %20 = vector.load %arg6[%c0_12, %c4, %c0_13] : memref<2x16x256xf32, #tpu.memory_space<vmem>>, vector<2x1x256xf32>
    %21 = vector.shape_cast %20 : vector<2x1x256xf32> to vector<2x256xf32>
    %22 = vector.shape_cast %19 : vector<2x256xf32> to vector<2x1x256xf32>
    tpu.vector_store %arg6[%c0_12, %c4, %c0_13], %22 {strides = array<i32>} : memref<2x16x256xf32, #tpu.memory_space<vmem>>, vector<2x1x256xf32>,
    %23 = vector.extract_strided_slice %2 {offsets = [0, 1280], sizes = [2, 256], strides = [1, 1]} : vector<2x4096xf32> to vector<2x256xf32>
    %c0_14 = arith.constant 0 : index
    %c5 = arith.constant 5 : index
    %c0_15 = arith.constant 0 : index
    %24 = vector.load %arg6[%c0_14, %c5, %c0_15] : memref<2x16x256xf32, #tpu.memory_space<vmem>>, vector<2x1x256xf32>
    %25 = vector.shape_cast %24 : vector<2x1x256xf32> to vector<2x256xf32>
    %26 = vector.shape_cast %23 : vector<2x256xf32> to vector<2x1x256xf32>
    tpu.vector_store %arg6[%c0_14, %c5, %c0_15], %26 {strides = array<i32>} : memref<2x16x256xf32, #tpu.memory_space<vmem>>, vector<2x1x256xf32>,
    %27 = vector.extract_strided_slice %2 {offsets = [0, 1536], sizes = [2, 256], strides = [1, 1]} : vector<2x4096xf32> to vector<2x256xf32>
    %c0_16 = arith.constant 0 : index
    %c6 = arith.constant 6 : index
    %c0_17 = arith.constant 0 : index
    %28 = vector.load %arg6[%c0_16, %c6, %c0_17] : memref<2x16x256xf32, #tpu.memory_space<vmem>>, vector<2x1x256xf32>
    %29 = vector.shape_cast %28 : vector<2x1x256xf32> to vector<2x256xf32>
    %30 = vector.shape_cast %27 : vector<2x256xf32> to vector<2x1x256xf32>
    tpu.vector_store %arg6[%c0_16, %c6, %c0_17], %30 {strides = array<i32>} : memref<2x16x256xf32, #tpu.memory_space<vmem>>, vector<2x1x256xf32>,
    %31 = vector.extract_strided_slice %2 {offsets = [0, 1792], sizes = [2, 256], strides = [1, 1]} : vector<2x4096xf32> to vector<2x256xf32>
    %c0_18 = arith.constant 0 : index
    %c7 = arith.constant 7 : index
    %c0_19 = arith.constant 0 : index
    %32 = vector.load %arg6[%c0_18, %c7, %c0_19] : memref<2x16x256xf32, #tpu.memory_space<vmem>>, vector<2x1x256xf32>
    %33 = vector.shape_cast %32 : vector<2x1x256xf32> to vector<2x256xf32>
    %34 = vector.shape_cast %31 : vector<2x256xf32> to vector<2x1x256xf32>
    tpu.vector_store %arg6[%c0_18, %c7, %c0_19], %34 {strides = array<i32>} : memref<2x16x256xf32, #tpu.memory_space<vmem>>, vector<2x1x256xf32>,
    %35 = vector.extract_strided_slice %2 {offsets = [0, 2048], sizes = [2, 256], strides = [1, 1]} : vector<2x4096xf32> to vector<2x256xf32>
    %c0_20 = arith.constant 0 : index
    %c8 = arith.constant 8 : index
    %c0_21 = arith.constant 0 : index
    %36 = vector.load %arg6[%c0_20, %c8, %c0_21] : memref<2x16x256xf32, #tpu.memory_space<vmem>>, vector<2x1x256xf32>
    %37 = vector.shape_cast %36 : vector<2x1x256xf32> to vector<2x256xf32>
    %38 = vector.shape_cast %35 : vector<2x256xf32> to vector<2x1x256xf32>
    tpu.vector_store %arg6[%c0_20, %c8, %c0_21], %38 {strides = array<i32>} : memref<2x16x256xf32, #tpu.memory_space<vmem>>, vector<2x1x256xf32>,
    %39 = vector.extract_strided_slice %2 {offsets = [0, 2304], sizes = [2, 256], strides = [1, 1]} : vector<2x4096xf32> to vector<2x256xf32>
    %c0_22 = arith.constant 0 : index
    %c9 = arith.constant 9 : index
    %c0_23 = arith.constant 0 : index
    %40 = vector.load %arg6[%c0_22, %c9, %c0_23] : memref<2x16x256xf32, #tpu.memory_space<vmem>>, vector<2x1x256xf32>
    %41 = vector.shape_cast %40 : vector<2x1x256xf32> to vector<2x256xf32>
    %42 = vector.shape_cast %39 : vector<2x256xf32> to vector<2x1x256xf32>
    tpu.vector_store %arg6[%c0_22, %c9, %c0_23], %42 {strides = array<i32>} : memref<2x16x256xf32, #tpu.memory_space<vmem>>, vector<2x1x256xf32>,
    %43 = vector.extract_strided_slice %2 {offsets = [0, 2560], sizes = [2, 256], strides = [1, 1]} : vector<2x4096xf32> to vector<2x256xf32>
    %c0_24 = arith.constant 0 : index
    %c10 = arith.constant 10 : index
    %c0_25 = arith.constant 0 : index
    %44 = vector.load %arg6[%c0_24, %c10, %c0_25] : memref<2x16x256xf32, #tpu.memory_space<vmem>>, vector<2x1x256xf32>
    %45 = vector.shape_cast %44 : vector<2x1x256xf32> to vector<2x256xf32>
    %46 = vector.shape_cast %43 : vector<2x256xf32> to vector<2x1x256xf32>
    tpu.vector_store %arg6[%c0_24, %c10, %c0_25], %46 {strides = array<i32>} : memref<2x16x256xf32, #tpu.memory_space<vmem>>, vector<2x1x256xf32>,
    %47 = vector.extract_strided_slice %2 {offsets = [0, 2816], sizes = [2, 256], strides = [1, 1]} : vector<2x4096xf32> to vector<2x256xf32>
    %c0_26 = arith.constant 0 : index
    %c11 = arith.constant 11 : index
    %c0_27 = arith.constant 0 : index
    %48 = vector.load %arg6[%c0_26, %c11, %c0_27] : memref<2x16x256xf32, #tpu.memory_space<vmem>>, vector<2x1x256xf32>
    %49 = vector.shape_cast %48 : vector<2x1x256xf32> to vector<2x256xf32>
    %50 = vector.shape_cast %47 : vector<2x256xf32> to vector<2x1x256xf32>
    tpu.vector_store %arg6[%c0_26, %c11, %c0_27], %50 {strides = array<i32>} : memref<2x16x256xf32, #tpu.memory_space<vmem>>, vector<2x1x256xf32>,
    %51 = vector.extract_strided_slice %2 {offsets = [0, 3072], sizes = [2, 256], strides = [1, 1]} : vector<2x4096xf32> to vector<2x256xf32>
    %c0_28 = arith.constant 0 : index
    %c12 = arith.constant 12 : index
    %c0_29 = arith.constant 0 : index
    %52 = vector.load %arg6[%c0_28, %c12, %c0_29] : memref<2x16x256xf32, #tpu.memory_space<vmem>>, vector<2x1x256xf32>
    %53 = vector.shape_cast %52 : vector<2x1x256xf32> to vector<2x256xf32>
    %54 = vector.shape_cast %51 : vector<2x256xf32> to vector<2x1x256xf32>
    tpu.vector_store %arg6[%c0_28, %c12, %c0_29], %54 {strides = array<i32>} : memref<2x16x256xf32, #tpu.memory_space<vmem>>, vector<2x1x256xf32>,
    %55 = vector.extract_strided_slice %2 {offsets = [0, 3328], sizes = [2, 256], strides = [1, 1]} : vector<2x4096xf32> to vector<2x256xf32>
    %c0_30 = arith.constant 0 : index
    %c13 = arith.constant 13 : index
    %c0_31 = arith.constant 0 : index
    %56 = vector.load %arg6[%c0_30, %c13, %c0_31] : memref<2x16x256xf32, #tpu.memory_space<vmem>>, vector<2x1x256xf32>
    %57 = vector.shape_cast %56 : vector<2x1x256xf32> to vector<2x256xf32>
    %58 = vector.shape_cast %55 : vector<2x256xf32> to vector<2x1x256xf32>
    tpu.vector_store %arg6[%c0_30, %c13, %c0_31], %58 {strides = array<i32>} : memref<2x16x256xf32, #tpu.memory_space<vmem>>, vector<2x1x256xf32>,
    %59 = vector.extract_strided_slice %2 {offsets = [0, 3584], sizes = [2, 256], strides = [1, 1]} : vector<2x4096xf32> to vector<2x256xf32>
    %c0_32 = arith.constant 0 : index
    %c14 = arith.constant 14 : index
    %c0_33 = arith.constant 0 : index
    %60 = vector.load %arg6[%c0_32, %c14, %c0_33] : memref<2x16x256xf32, #tpu.memory_space<vmem>>, vector<2x1x256xf32>
    %61 = vector.shape_cast %60 : vector<2x1x256xf32> to vector<2x256xf32>
    %62 = vector.shape_cast %59 : vector<2x256xf32> to vector<2x1x256xf32>
    tpu.vector_store %arg6[%c0_32, %c14, %c0_33], %62 {strides = array<i32>} : memref<2x16x256xf32, #tpu.memory_space<vmem>>, vector<2x1x256xf32>,
    %63 = vector.extract_strided_slice %2 {offsets = [0, 3840], sizes = [2, 256], strides = [1, 1]} : vector<2x4096xf32> to vector<2x256xf32>
    %c0_34 = arith.constant 0 : index
    %c15 = arith.constant 15 : index
    %c0_35 = arith.constant 0 : index
    %64 = vector.load %arg6[%c0_34, %c15, %c0_35] : memref<2x16x256xf32, #tpu.memory_space<vmem>>, vector<2x1x256xf32>
    %65 = vector.shape_cast %64 : vector<2x1x256xf32> to vector<2x256xf32>
    %66 = vector.shape_cast %63 : vector<2x256xf32> to vector<2x1x256xf32>
    tpu.vector_store %arg6[%c0_34, %c15, %c0_35], %66 {strides = array<i32>} : memref<2x16x256xf32, #tpu.memory_space<vmem>>, vector<2x1x256xf32>,
    %c0_36 = arith.constant 0 : index
    %c0_37 = arith.constant 0 : index
    %c0_38 = arith.constant 0 : index
    %67 = vector.load %arg6[%c0_36, %c0_37, %c0_38] : memref<2x16x256xf32, #tpu.memory_space<vmem>>, vector<2x16x256xf32>
    %c0_39 = arith.constant 0 : index
    %c0_40 = arith.constant 0 : index
    %68 = vector.load %arg4[%c0_39, %c0_40] : memref<16x8xf32, #tpu.memory_space<vmem>>, vector<16x8xf32>
    %69 = vector.extract_strided_slice %68 {offsets = [0, 0], sizes = [16, 1], strides = [1, 1]} : vector<16x8xf32> to vector<16x1xf32>
    %70 = vector.extract_strided_slice %68 {offsets = [0, 1], sizes = [16, 1], strides = [1, 1]} : vector<16x8xf32> to vector<16x1xf32>
    %71 = vector.extract_strided_slice %68 {offsets = [0, 2], sizes = [16, 1], strides = [1, 1]} : vector<16x8xf32> to vector<16x1xf32>
    %72 = vector.extract_strided_slice %68 {offsets = [0, 3], sizes = [16, 1], strides = [1, 1]} : vector<16x8xf32> to vector<16x1xf32>
    %73 = vector.extract_strided_slice %68 {offsets = [0, 4], sizes = [16, 1], strides = [1, 1]} : vector<16x8xf32> to vector<16x1xf32>
    %74 = vector.shape_cast %69 : vector<16x1xf32> to vector<1x16x1xf32>
    %75 = vector.broadcast %74 : vector<1x16x1xf32> to vector<2x16x256xf32>
    %76 = arith.addf %67, %75 : vector<2x16x256xf32>
    %cst_41 = arith.constant dense<0.000000e+00> : vector<2x16xf32>
    %77 = vector.multi_reduction <add>, %76, %cst_41 [2] : vector<2x16x256xf32> to vector<2x16xf32>
    %78 = vector.shape_cast %77 : vector<2x16xf32> to vector<2x16x1xf32>
    %cst_42 = arith.constant 3.906250e-03 : f32
    %79 = vector.broadcast %cst_42 : f32 to vector<2x16x1xf32>
    %80 = arith.mulf %78, %79 : vector<2x16x1xf32>
    %81 = vector.broadcast %80 : vector<2x16x1xf32> to vector<2x16x256xf32>
    %82 = arith.subf %76, %81 : vector<2x16x256xf32>
    %83 = arith.mulf %82, %82 : vector<2x16x256xf32>
    %cst_43 = arith.constant dense<0.000000e+00> : vector<2x16xf32>
    %84 = vector.multi_reduction <add>, %83, %cst_43 [2] : vector<2x16x256xf32> to vector<2x16xf32>
    %85 = vector.shape_cast %84 : vector<2x16xf32> to vector<2x16x1xf32>
    %cst_44 = arith.constant 3.906250e-03 : f32
    %86 = vector.broadcast %cst_44 : f32 to vector<2x16x1xf32>
    %87 = arith.mulf %85, %86 : vector<2x16x1xf32>
    %cst_45 = arith.constant 9.99999974E-6 : f32
    %88 = vector.broadcast %cst_45 : f32 to vector<2x16x1xf32>
    %89 = arith.addf %87, %88 : vector<2x16x1xf32>
    %90 = math.rsqrt %89 : vector<2x16x1xf32>
    %91 = vector.broadcast %90 : vector<2x16x1xf32> to vector<2x16x256xf32>
    %92 = arith.mulf %82, %91 : vector<2x16x256xf32>
    %93 = vector.shape_cast %70 : vector<16x1xf32> to vector<1x16x1xf32>
    %94 = vector.broadcast %93 : vector<1x16x1xf32> to vector<2x16x256xf32>
    %95 = arith.mulf %92, %94 : vector<2x16x256xf32>
    %96 = vector.shape_cast %71 : vector<16x1xf32> to vector<1x16x1xf32>
    %97 = vector.broadcast %96 : vector<1x16x1xf32> to vector<2x16x256xf32>
    %98 = arith.addf %95, %97 : vector<2x16x256xf32>
    %cst_46 = arith.constant 5.000000e-01 : f32
    %99 = vector.broadcast %cst_46 : f32 to vector<2x16x256xf32>
    %100 = arith.mulf %99, %98 : vector<2x16x256xf32>
    %cst_47 = arith.constant 0.707106769 : f32
    %101 = vector.broadcast %cst_47 : f32 to vector<2x16x256xf32>
    %102 = arith.mulf %98, %101 : vector<2x16x256xf32>
    %103 = math.erf %102 : vector<2x16x256xf32>
    %cst_48 = arith.constant 1.000000e+00 : f32
    %104 = vector.broadcast %cst_48 : f32 to vector<2x16x256xf32>
    %105 = arith.addf %104, %103 : vector<2x16x256xf32>
    %106 = arith.mulf %100, %105 : vector<2x16x256xf32>
    %cst_49 = arith.constant dense<0.000000e+00> : vector<2x16xf32>
    %107 = vector.multi_reduction <add>, %106, %cst_49 [2] : vector<2x16x256xf32> to vector<2x16xf32>
    %108 = vector.shape_cast %107 : vector<2x16xf32> to vector<2x16x1xf32>
    %cst_50 = arith.constant 3.906250e-03 : f32
    %109 = vector.broadcast %cst_50 : f32 to vector<2x16x1xf32>
    %110 = arith.mulf %108, %109 : vector<2x16x1xf32>
    %111 = vector.broadcast %110 : vector<2x16x1xf32> to vector<2x16x256xf32>
    %112 = arith.subf %106, %111 : vector<2x16x256xf32>
    %113 = arith.mulf %112, %112 : vector<2x16x256xf32>
    %cst_51 = arith.constant dense<0.000000e+00> : vector<2x16xf32>
    %114 = vector.multi_reduction <add>, %113, %cst_51 [2] : vector<2x16x256xf32> to vector<2x16xf32>
    %115 = vector.shape_cast %114 : vector<2x16xf32> to vector<2x16x1xf32>
    %cst_52 = arith.constant 3.906250e-03 : f32
    %116 = vector.broadcast %cst_52 : f32 to vector<2x16x1xf32>
    %117 = arith.mulf %115, %116 : vector<2x16x1xf32>
    %cst_53 = arith.constant 9.99999974E-6 : f32
    %118 = vector.broadcast %cst_53 : f32 to vector<2x16x1xf32>
    %119 = arith.addf %117, %118 : vector<2x16x1xf32>
    %120 = math.rsqrt %119 : vector<2x16x1xf32>
    %121 = vector.broadcast %120 : vector<2x16x1xf32> to vector<2x16x256xf32>
    %122 = arith.mulf %112, %121 : vector<2x16x256xf32>
    %123 = vector.shape_cast %72 : vector<16x1xf32> to vector<1x16x1xf32>
    %124 = vector.broadcast %123 : vector<1x16x1xf32> to vector<2x16x256xf32>
    %125 = arith.mulf %122, %124 : vector<2x16x256xf32>
    %126 = vector.shape_cast %73 : vector<16x1xf32> to vector<1x16x1xf32>
    %127 = vector.broadcast %126 : vector<1x16x1xf32> to vector<2x16x256xf32>
    %128 = arith.addf %125, %127 : vector<2x16x256xf32>
    %cst_54 = arith.constant 5.000000e-01 : f32
    %129 = vector.broadcast %cst_54 : f32 to vector<2x16x256xf32>
    %130 = arith.mulf %129, %128 : vector<2x16x256xf32>
    %cst_55 = arith.constant 0.707106769 : f32
    %131 = vector.broadcast %cst_55 : f32 to vector<2x16x256xf32>
    %132 = arith.mulf %128, %131 : vector<2x16x256xf32>
    %133 = math.erf %132 : vector<2x16x256xf32>
    %cst_56 = arith.constant 1.000000e+00 : f32
    %134 = vector.broadcast %cst_56 : f32 to vector<2x16x256xf32>
    %135 = arith.addf %134, %133 : vector<2x16x256xf32>
    %136 = arith.mulf %130, %135 : vector<2x16x256xf32>
    %c0_57 = arith.constant 0 : index
    %c0_58 = arith.constant 0 : index
    %c0_59 = arith.constant 0 : index
    %137 = vector.load %arg5[%c0_57, %c0_58, %c0_59] : memref<2x16x256xf32, #tpu.memory_space<vmem>>, vector<2x16x256xf32>
    tpu.vector_store %arg5[%c0_57, %c0_58, %c0_59], %136 {strides = array<i32>} : memref<2x16x256xf32, #tpu.memory_space<vmem>>, vector<2x16x256xf32>,
    return
  }
  func.func @transform_0(%arg0: i32, %arg1: i32) -> (i32, i32) {
    %c0_i32 = arith.constant 0 : i32
    %c0_i32_0 = arith.constant 0 : i32
    return %arg1, %c0_i32 : i32, i32
  }
  func.func @transform_1(%arg0: i32, %arg1: i32) -> (i32, i32) {
    %c0_i32 = arith.constant 0 : i32
    %c0_i32_0 = arith.constant 0 : i32
    return %c0_i32, %arg0 : i32, i32
  }
  func.func @transform_2(%arg0: i32, %arg1: i32) -> (i32, i32) {
    %c0_i32 = arith.constant 0 : i32
    %c0_i32_0 = arith.constant 0 : i32
    return %arg0, %c0_i32 : i32, i32
  }
  func.func @transform_3(%arg0: i32, %arg1: i32) -> (i32, i32, i32) {
    %c0_i32 = arith.constant 0 : i32
    %c0_i32_0 = arith.constant 0 : i32
    return %arg1, %arg0, %c0_i32 : i32, i32, i32
  }
}

</mosaic_0001>

<bundles_post_ra>
// kernel: tpu_custom_call.1
= control target key start
LH: loop header
LB: loop body
LE: loop exit
PB: predicated region body
PF: predicated region fallthrough
CT: control target
= control target key end

     0   :  { %8 = vsyncpa [#allocation4], 0  ;;  %s6288_s0 = inlined_call_operand.hbm [shape: f32[2,256], index: 0, kind: input, shape index: {}]   ;;  %s6289_s1 = inlined_call_operand.hbm [shape: f32[256,8192], index: 1, kind: input, shape index: {}]   ;;  %s6290_s2 = inlined_call_operand.vmem [shape: f32[32,8], index: 2, kind: input, shape index: {}]   ;;  %s6291_s3 = inlined_call_operand.hbm [shape: f32[2,32,256], index: 3, kind: output, shape index: {}]  }
   0x1   :  { %9 = vsyncpa [#allocation7], 0 }
   0x2   :  { %11 = vsyncpa [#allocation7 + $0x1], 0 }
   0x3   :  { %12 = vsyncpa [#allocation5], 0 }
   0x4   :  { %14 = vsyncpa [#allocation5 + $0x1], 0  ;;  %s4777_s12 = smov 0   ;;  %s4779_s13 = smov 0  }
   0x5   :  { %s4781_s14 = smov 0   ;;  %s4783_s15 = smov 0  }
   0x6   :  { %s4785_s16 = smov 0   ;;  %s4787_s17 = smov 0  }
   0x7 LB: > { %s3417_s18 = sadd.s32 4294967295, %s4737_s17   ;;  %s3418_s19 = sadd.s32 4294967294, %s4737_s17   ;;  %s4737_s17 = sphi %s4787_s17, %s20_s17   ;;  %s4733_s16 = sphi %s4785_s16, %s6322_s16   ;;  %s4729_s15 = sphi %s4783_s15, %s6321_s15   ;;  %s4725_s14 = sphi %s4781_s14, %s6320_s14   ;;  %s4721_s13 = sphi %s4779_s13, %s6319_s13   ;;  %s4717_s12 = sphi %s4777_s12, %s6318_s12  }
   0x8   : > { %s65_s20 = sadd.s32 1, %s4725_s14  ;;  %p72_p0 = scmp.ne.s32.totalorder %s4725_s14, %s4721_s13 }
   0x9   : > { %p73_p1 = scmp.eq.s32.totalorder %s4737_s17, 0  ;;  %p78_p2 = scmp.ne.s32.totalorder %s4721_s13, %s4717_s12 }
   0xa   : > { %p4815_p3 = scmp.eq.s32.totalorder %s3417_s18, 0  ;;  %p130_p4 = scmp.eq.s32.totalorder %s3417_s18, 1 }
   0xb   : > { %p4819_p5 = por %p73_p1, %p72_p0  ;;  %p136_p6 = scmp.eq.s32.totalorder %s3418_s19, 1 }
   0xc   : > { %s6298_s21 = scalar_select %p4815_p3, 1, 0 }
   0xd   : > { %p4825_p7 = por %p4815_p3, %p78_p2  ;;  %p4829_p8 = por %p130_p4, %p72_p0 }
   0xe   : > { %p4833_p9 = por %p136_p6, %p78_p2  ;;  %p3419_p10 = scmp.ge.s32.totalorder %s4737_s17, 1 }
   0xf   : > { %s6300_s23 = scalar_select %p4825_p7, 1, 0 }
  0x10   : > { %s6301_s24 = scalar_select %p4829_p8, 1, 0 }
  0x11   : > { %s6302_s25 = scalar_select %p4833_p9, 1, 0 }
  0x12   : > { %p143_p11 = scmp.lt.s32.totalorder %s4737_s17, 3  ;;  %s4739_s27 = smov [#allocation3]  }
  0x13   : > { %s159_s28 = sshll.u32 %s4739_s27, 4  ;;  %p4492_p1 = scmp.lt.s32.totalorder %s4737_s17, 2  ;;  %s160_s28 = int_to_ptr.vmem [resolvable:$true] %s159_s28 }
  0x14   : > { %p4840_p13 = pnand %p3419_p10, %p143_p11  ;;  %s32_s4 = sadd.s32 1, %s4733_s16 }
  0x15   : > { %p4849_p4 = pnand %p4492_p1, %p4819_p5  ;;  %p4860_p6 = scmp.ge.s32.totalorder %s32_s4, 2 }
  0x16   : > { %s6303_s26 = scalar_select %p4840_p13, 1, 0 }
  0x17   : > { %p4479_p0 = pneg %p4840_p13  ;;  %s170_s6 = sand.u32 1, %s4725_s14  }
  0x18   : > { %s6304_s29 = scalar_select %p4849_p4, 1, 0 }
  0x19   : > { %p4855_p2 = pnand %p4479_p0, %p4815_p3  ;;  %s4621_s9 = scalar_lea.hbm %s6288_s0, 64 }
  0x1a   : > { %s6306_s5 = scalar_select %p4860_p6, 1, 0 }
  0x1b   : > { %p4622_p5 = scmp.ne.s32.totalorder %s6288_s0, %s4621_s9  ;;  %p4623_p10 = pneg %p4855_p2 }
  0x1c   : > { %p4628_p0 = scmp.lt.u32.totalorder %s4621_s9, %s6288_s0 }
  0x1d   : > { %p4624_p11 = pnand %p4623_p10, %p4622_p5 }
  0x1f   : > { %p4625_p1 = pneg %p4624_p11 }
  0x21   : > { %p4630_p12 = pnand %p4628_p0, %p4625_p1 }
  0x23   : > { %4633 = shalt.err (!%p4630_p12)
}
  0x24   : > { %s4634_s22 = scalar_lea.vmem %s160_s28, 64  ;;  %p4642_p3 = scmp.lt.s32.totalorder %s160_s28, %s160_s28 }
  0x25   : > { %p4635_p9 = scmp.ne.s32.totalorder %s160_s28, %s4634_s22  ;;  %p4643_p13 = scmp.lt.s32.totalorder %s4634_s22, %s4634_s22 }
  0x27   : > { %p4637_p8 = pnand %p4635_p9, %p4623_p10  ;;  %p4644_p4 = por %p4643_p13, %p4642_p3 }
  0x29   : > { %p4638_p7 = pneg %p4637_p8 }
  0x2b   : > { %p4645_p6 = pnand %p4644_p4, %p4638_p7 }
  0x2d   : > { %4648 = shalt.err (!%p4645_p6)
}
  0x2e   : > { %4482 = dma.hbm_to_vmem [thread:$0]  (!%p4855_p2), %s6288_s0, 64, %s160_s28, [#allocation4]  }
  0x2f   : > { %p6307_p9 = scmp.ne.s32.totalorder %s6306_s5, 0  ;;  %s3422_s8 = sshll.u32 %s170_s6, 13 }
  0x30   : > { %s3438_s10 = sshll.u32 %s4733_s16, 12  ;;  %s174_s19 = scalar_lea.vmem [#allocation6], %s3422_s8 }
  0x31   : > { %s6324_s4 = smov (%p6307_p9, %s32_s4), 0  ;;  %s4891_s18 = scalar_lea.hbm %s6289_s1, %s3438_s10 }
  0x32   : > { %s62_s9 = ssub.s32 %s4733_s16, %s6324_s4  ;;  %s181_s22 = sshll.u32 %s174_s19, 4  ;;  %s4898_s22 = int_to_ptr.vmem [resolvable:$true] %s181_s22 }
  0x33   : > { %p63_p3 = scmp.eq.s32.totalorder %s62_s9, 0  ;;  %s4900_s5 = scalar_lea.sflag [#allocation7], %s170_s6 }
  0x34   : > { %s4649_s27 = scalar_lea.hbm %s4891_s18, 131072  ;;  %p6308_p8 = scmp.ne.s32.totalorder %s6304_s29, 0 }
  0x35   : > { %s4896_s28 = scalar_select %p63_p3, %s4725_s14, %s65_s20  }
  0x36   : > { %p4650_p7 = scmp.ne.s32.totalorder %s4891_s18, %s4649_s27  ;;  %p4651_p12 = pneg %p6308_p8 }
  0x37   : > { %s4654_s8 = scalar_lea.hbm %s6289_s1, 262144  ;;  %p4655_p2 = scmp.lt.u32.totalorder %s4891_s18, %s6289_s1 }
  0x38   : > { %p4652_p13 = pnand %p4651_p12, %p4650_p7  ;;  %p4656_p6 = scmp.lt.u32.totalorder %s4654_s8, %s4649_s27 }
  0x39   : > { %p4658_p10 = scmp.lt.u32.totalorder %s4649_s27, %s4891_s18 }
  0x3a   : > { %p4653_p4 = pneg %p4652_p13  ;;  %p4657_p5 = por %p4656_p6, %p4655_p2 }
  0x3c   : > { %p4659_p11 = por %p4658_p10, %p4657_p5 }
  0x3e   : > { %p4660_p1 = pnand %p4659_p11, %p4653_p4 }
  0x40   : > { %4663 = shalt.err (!%p4660_p1)
}
  0x41   : > { %s4664_s20 = scalar_lea.vmem %s4898_s22, 131072  ;;  %s4740_s6 = smov [#allocation6]  }
  0x42   : > { %p4665_p0 = scmp.ne.s32.totalorder %s4898_s22, %s4664_s20  ;;  %s4669_s11 = sshll.u32 %s4740_s6, 4  ;;  %s4670_s11 = int_to_ptr.vmem [resolvable:$false] %s4669_s11 }
  0x43   : > { %s4671_s19 = scalar_lea.vmem %s4670_s11, 262144  ;;  %p4672_p7 = scmp.lt.s32.totalorder %s4898_s22, %s4670_s11 }
  0x44   : > { %p4667_p9 = pnand %p4665_p0, %p4651_p12  ;;  %p4673_p13 = scmp.lt.s32.totalorder %s4671_s19, %s4664_s20 }
  0x46   : > { %p4668_p3 = pneg %p4667_p9  ;;  %p4674_p2 = por %p4673_p13, %p4672_p7 }
  0x48   : > { %p4675_p6 = pnand %p4674_p2, %p4668_p3 }
  0x4a   : > { %4678 = shalt.err (!%p4675_p6)
}
  0x4b   : > { %s4741_s27 = smov 8192   ;;  %s4742_s7 = smov 4096  }
  0x4c   : > { %s4743_s9 = smov 256   ;;  %p6309_p12 = scmp.ne.s32.totalorder %s6303_s26, 0 }
  0x4d   : > { %4486 = dma.hbm_to_vmem [thread:$0]  (!%p6308_p8), %s4891_s18, 131072, %s4898_s22, %s4900_s5, %s4741_s27, %s4742_s7, %s4743_s9  }
  0x4e   : > { %202 = sbr.rel (%p6309_p12) target bundleno = 1518 (0x5ee), region = 32  ;;  %p6310_p4 = scmp.ne.s32.totalorder (!%p6309_p12), %s6298_s21, 0 }
  0x55   : > { %4704 = dma.done.wait (%p6310_p4), [#allocation4], 64  }
  0x56   : > { %4706 = vsyncadd (%p6310_p4), [#allocation4], 4294967232  ;;  %s4935_s8 = sand.u32 1, %s4721_s13   ;;  %p6311_p8 = scmp.ne.s32.totalorder %s6300_s23, 0 }
  0x57   : > { %s3427_s10 = sshll.u32 %s4935_s8, 13  ;;  %s209_s30 = scalar_lea.sflag [#allocation7], %s4935_s8 }
  0x58   : > { %s4939_s20 = scalar_lea.vmem [#allocation6], %s3427_s10 }
  0x59   : > { %4708 = dma.done.wait (%p6311_p8), %s209_s30, 131072  }
  0x5a   : > { %4710 = vsyncadd (%p6311_p8), %s209_s30, 4294836224  ;;  %v251_v0 = vld [vmem:[%s4939_s20 + $0x8] sm:$0xff]  ;;  %v253_v2 = vld [vmem:[%s4939_s20 + $0x18] sm:$0xff]  ;;  %s3429_s21 = sshll.u32 %s4729_s15, 1  ;;  %s3428_s5 = sshll.u32 %s4935_s8, 6 }
  0x5b   : > { %v283_v1 = vld [vmem:[%s4939_s20 + $0x108] sm:$0xff]  ;;  %v285_v4 = vld [vmem:[%s4939_s20 + $0x118] sm:$0xff]  ;;  %v250_v5 = vld [vmem:[%s4939_s20] sm:$0xff]  ;;  %p5428_p5 = scmp.lt.s32.totalorder %s3429_s21, 3  ;;  %s6231_s6 = scalar_lea.vmem [#allocation8], %s3428_s5 }
  0x5c   : > { %v3441_v3 = vpack.c.bf16 %v283_v1, %v251_v0  ;;  %v282_v6 = vld [vmem:[%s4939_s20 + $0x100] sm:$0xff]  ;;  %v3505_v7 = vpack.c.bf16 %v285_v4, %v253_v2  ;;  %v252_v9 = vld [vmem:[%s4939_s20 + $0x10] sm:$0xff]  ;;  %v315_v11 = vld [vmem:[%s4939_s20 + $0x208] sm:$0xff]  ;;  %s3261_s11 = scalar_lea.sflag [#allocation5], %s4935_s8 }
  0x5d   : > { %v3443_v8 = vpack.c.bf16 %v282_v6, %v250_v5  ;;  %v284_v10 = vld [vmem:[%s4939_s20 + $0x110] sm:$0xff]  ;;  %v347_v13 = vld [vmem:[%s4939_s20 + $0x308] sm:$0xff]  ;;  %v317_v14 = vld [vmem:[%s4939_s20 + $0x218] sm:$0xff]  ;;  %s6326_s21 = smov (!%p5428_p5, %s3429_s21), 3 }
  0x5e   : > { %3442 = vmatprep.subr.bf16.mxu0 %v3441_v3  ;;  %v3507_v12 = vpack.c.bf16 %v284_v10, %v252_v9  ;;  %v349_v15 = vld [vmem:[%s4939_s20 + $0x318] sm:$0xff]  ;;  %3506 = vmatprep.subr.bf16.mxu1 %v3505_v7  ;;  %v3445_v16 = vpack.c.bf16 %v347_v13, %v315_v11  ;;  %v314_v18 = vld [vmem:[%s4939_s20 + $0x200] sm:$0xff]  ;;  %v316_v20 = vld [vmem:[%s4939_s20 + $0x210] sm:$0xff]  ;;  %s3430_s26 = sshll.u32 %s6326_s21, 3 }
  0x5f   : > { %3444 = vmatpush1.bf16.msra.mxu0 %v3443_v8  ;;  %v3509_v17 = vpack.c.bf16 %v349_v15, %v317_v14  ;;  %v346_v19 = vld [vmem:[%s4939_s20 + $0x300] sm:$0xff]  ;;  %v348_v22 = vld [vmem:[%s4939_s20 + $0x310] sm:$0xff]  ;;  %v379_v23 = vld [vmem:[%s4939_s20 + $0x408] sm:$0xff]  ;;  %s5462_s22 = scalar_lea.vmem %s6290_s2, %s3430_s26 }
  0x60   : > { %3508 = vmatpush1.bf16.msra.mxu1 %v3507_v12  ;;  %v3447_v21 = vpack.c.bf16 %v346_v19, %v314_v18  ;;  %v411_v24 = vld [vmem:[%s4939_s20 + $0x508] sm:$0xff]  ;;  %3446 = vmatprep.subr.bf16.mxu0 %v3445_v16  ;;  %v3511_v25 = vpack.c.bf16 %v348_v22, %v316_v20  ;;  %v381_v27 = vld [vmem:[%s4939_s20 + $0x418] sm:$0xff]  ;;  %v378_v29 = vld [vmem:[%s4939_s20 + $0x400] sm:$0xff] }
  0x61   : > { %3510 = vmatprep.subr.bf16.mxu1 %v3509_v17  ;;  %v3449_v26 = vpack.c.bf16 %v411_v24, %v379_v23  ;;  %v413_v28 = vld [vmem:[%s4939_s20 + $0x518] sm:$0xff]  ;;  %v410_v31 = vld [vmem:[%s4939_s20 + $0x500] sm:$0xff]  ;;  %v380_v32 = vld [vmem:[%s4939_s20 + $0x410] sm:$0xff] }
  0x62   : > { %v3513_v30 = vpack.c.bf16 %v413_v28, %v381_v27  ;;  %v412_v33 = vld [vmem:[%s4939_s20 + $0x510] sm:$0xff]  ;;  %v3451_v34 = vpack.c.bf16 %v410_v31, %v378_v29  ;;  %v443_v35 = vld [vmem:[%s4939_s20 + $0x608] sm:$0xff]  ;;  %v445_v37 = vld [vmem:[%s4939_s20 + $0x618] sm:$0xff] }
  0x63   : > { %3448 = vmatpush1.bf16.msra.mxu0 %v3447_v21  ;;  %v475_v36 = vld [vmem:[%s4939_s20 + $0x708] sm:$0xff]  ;;  %v3515_v38 = vpack.c.bf16 %v412_v33, %v380_v32  ;;  %v477_v40 = vld [vmem:[%s4939_s20 + $0x718] sm:$0xff]  ;;  %v442_v41 = vld [vmem:[%s4939_s20 + $0x600] sm:$0xff] }
  0x64   : > { %3512 = vmatpush1.bf16.msra.mxu1 %v3511_v25  ;;  %3450 = vmatprep.subr.bf16.mxu0 %v3449_v26  ;;  %v3453_v39 = vpack.c.bf16 %v475_v36, %v443_v35  ;;  %v474_v42 = vld [vmem:[%s4939_s20 + $0x700] sm:$0xff]  ;;  %v3517_v43 = vpack.c.bf16 %v477_v40, %v445_v37  ;;  %v444_v44 = vld [vmem:[%s4939_s20 + $0x610] sm:$0xff]  ;;  %v507_v46 = vld [vmem:[%s4939_s20 + $0x808] sm:$0xff] }
  0x65   : > { %3514 = vmatprep.subr.bf16.mxu1 %v3513_v30  ;;  %v476_v45 = vld [vmem:[%s4939_s20 + $0x710] sm:$0xff]  ;;  %v539_v47 = vld [vmem:[%s4939_s20 + $0x908] sm:$0xff]  ;;  %v509_v48 = vld [vmem:[%s4939_s20 + $0x818] sm:$0xff]  ;;  %v3455_v50 = vpack.c.bf16 %v474_v42, %v442_v41 }
  0x66   : > { %v541_v49 = vld [vmem:[%s4939_s20 + $0x918] sm:$0xff]  ;;  %v3519_v51 = vpack.c.bf16 %v476_v45, %v444_v44  ;;  %v3457_v52 = vpack.c.bf16 %v539_v47, %v507_v46  ;;  %v506_v53 = vld [vmem:[%s4939_s20 + $0x800] sm:$0xff]  ;;  %v508_v55 = vld [vmem:[%s4939_s20 + $0x810] sm:$0xff] }
  0x67   : > { %3452 = vmatpush1.bf16.msra.mxu0 %v3451_v34  ;;  %v538_v54 = vld [vmem:[%s4939_s20 + $0x900] sm:$0xff]  ;;  %v3521_v56 = vpack.c.bf16 %v541_v49, %v509_v48  ;;  %v540_v57 = vld [vmem:[%s4939_s20 + $0x910] sm:$0xff]  ;;  %v571_v58 = vld [vmem:[%s4939_s20 + $0xa08] sm:$0xff] }
  0x68   : > { %3516 = vmatpush1.bf16.msra.mxu1 %v3515_v38  ;;  %3454 = vmatprep.subr.bf16.mxu0 %v3453_v39  ;;  %v603_v59 = vld [vmem:[%s4939_s20 + $0xb08] sm:$0xff]  ;;  %v573_v60 = vld [vmem:[%s4939_s20 + $0xa18] sm:$0xff]  ;;  %v3459_v62 = vpack.c.bf16 %v538_v54, %v506_v53  ;;  %v3523_v63 = vpack.c.bf16 %v540_v57, %v508_v55  ;;  %v570_v1 = vld [vmem:[%s4939_s20 + $0xa00] sm:$0xff] }
  0x69   : > { %3518 = vmatprep.subr.bf16.mxu1 %v3517_v43  ;;  %v605_v61 = vld [vmem:[%s4939_s20 + $0xb18] sm:$0xff]  ;;  %v3461_v0 = vpack.c.bf16 %v603_v59, %v571_v58  ;;  %v602_v2 = vld [vmem:[%s4939_s20 + $0xb00] sm:$0xff]  ;;  %v572_v3 = vld [vmem:[%s4939_s20 + $0xa10] sm:$0xff] }
  0x6a   : > { %v3525_v4 = vpack.c.bf16 %v605_v61, %v573_v60  ;;  %v604_v5 = vld [vmem:[%s4939_s20 + $0xb10] sm:$0xff]  ;;  %v635_v6 = vld [vmem:[%s4939_s20 + $0xc08] sm:$0xff]  ;;  %v637_v8 = vld [vmem:[%s4939_s20 + $0xc18] sm:$0xff]  ;;  %v3463_v10 = vpack.c.bf16 %v602_v2, %v570_v1 }
  0x6b   : > { %3456 = vmatpush1.bf16.msra.mxu0 %v3455_v50  ;;  %v667_v7 = vld [vmem:[%s4939_s20 + $0xd08] sm:$0xff]  ;;  %v669_v9 = vld [vmem:[%s4939_s20 + $0xd18] sm:$0xff]  ;;  %v3527_v11 = vpack.c.bf16 %v604_v5, %v572_v3  ;;  %v634_v13 = vld [vmem:[%s4939_s20 + $0xc00] sm:$0xff] }
  0x6c   : > { %3520 = vmatpush1.bf16.msra.mxu1 %v3519_v51  ;;  %3458 = vmatprep.subr.bf16.mxu0 %v3457_v52  ;;  %v3465_v12 = vpack.c.bf16 %v667_v7, %v635_v6  ;;  %v666_v14 = vld [vmem:[%s4939_s20 + $0xd00] sm:$0xff]  ;;  %v636_v15 = vld [vmem:[%s4939_s20 + $0xc10] sm:$0xff]  ;;  %v3529_v16 = vpack.c.bf16 %v669_v9, %v637_v8  ;;  %v699_v18 = vld [vmem:[%s4939_s20 + $0xe08] sm:$0xff] }
  0x6d   : > { %3522 = vmatprep.subr.bf16.mxu1 %v3521_v56  ;;  %v668_v17 = vld [vmem:[%s4939_s20 + $0xd10] sm:$0xff]  ;;  %v731_v19 = vld [vmem:[%s4939_s20 + $0xf08] sm:$0xff]  ;;  %v701_v20 = vld [vmem:[%s4939_s20 + $0xe18] sm:$0xff]  ;;  %v3467_v22 = vpack.c.bf16 %v666_v14, %v634_v13 }
  0x6e   : > { %v733_v21 = vld [vmem:[%s4939_s20 + $0xf18] sm:$0xff]  ;;  %v3531_v23 = vpack.c.bf16 %v668_v17, %v636_v15  ;;  %v3469_v24 = vpack.c.bf16 %v731_v19, %v699_v18  ;;  %v698_v25 = vld [vmem:[%s4939_s20 + $0xe00] sm:$0xff]  ;;  %v700_v27 = vld [vmem:[%s4939_s20 + $0xe10] sm:$0xff] }
  0x6f   : > { %3460 = vmatpush1.bf16.msra.mxu0 %v3459_v62  ;;  %v730_v26 = vld [vmem:[%s4939_s20 + $0xf00] sm:$0xff]  ;;  %v3533_v28 = vpack.c.bf16 %v733_v21, %v701_v20  ;;  %v732_v29 = vld [vmem:[%s4939_s20 + $0xf10] sm:$0xff]  ;;  %v763_v30 = vld [vmem:[%s4939_s20 + $0x1008] sm:$0xff] }
  0x70   : > { %3524 = vmatpush1.bf16.msra.mxu1 %v3523_v63  ;;  %3462 = vmatprep.subr.bf16.mxu0 %v3461_v0  ;;  %v795_v31 = vld [vmem:[%s4939_s20 + $0x1108] sm:$0xff]  ;;  %v765_v32 = vld [vmem:[%s4939_s20 + $0x1018] sm:$0xff]  ;;  %v3471_v34 = vpack.c.bf16 %v730_v26, %v698_v25  ;;  %v3535_v35 = vpack.c.bf16 %v732_v29, %v700_v27  ;;  %v762_v37 = vld [vmem:[%s4939_s20 + $0x1000] sm:$0xff] }
  0x71   : > { %3526 = vmatprep.subr.bf16.mxu1 %v3525_v4  ;;  %v797_v33 = vld [vmem:[%s4939_s20 + $0x1118] sm:$0xff]  ;;  %v3473_v36 = vpack.c.bf16 %v795_v31, %v763_v30  ;;  %v794_v38 = vld [vmem:[%s4939_s20 + $0x1100] sm:$0xff]  ;;  %v764_v39 = vld [vmem:[%s4939_s20 + $0x1010] sm:$0xff] }
  0x72   : > { %v3537_v40 = vpack.c.bf16 %v797_v33, %v765_v32  ;;  %v796_v41 = vld [vmem:[%s4939_s20 + $0x1110] sm:$0xff]  ;;  %v827_v42 = vld [vmem:[%s4939_s20 + $0x1208] sm:$0xff]  ;;  %v829_v44 = vld [vmem:[%s4939_s20 + $0x1218] sm:$0xff]  ;;  %v3475_v46 = vpack.c.bf16 %v794_v38, %v762_v37 }
  0x73   : > { %3464 = vmatpush1.bf16.msra.mxu0 %v3463_v10  ;;  %v859_v43 = vld [vmem:[%s4939_s20 + $0x1308] sm:$0xff]  ;;  %v861_v45 = vld [vmem:[%s4939_s20 + $0x1318] sm:$0xff]  ;;  %v3539_v47 = vpack.c.bf16 %v796_v41, %v764_v39  ;;  %v826_v49 = vld [vmem:[%s4939_s20 + $0x1200] sm:$0xff] }
  0x74   : > { %3528 = vmatpush1.bf16.msra.mxu1 %v3527_v11  ;;  %3466 = vmatprep.subr.bf16.mxu0 %v3465_v12  ;;  %v3477_v48 = vpack.c.bf16 %v859_v43, %v827_v42  ;;  %v858_v50 = vld [vmem:[%s4939_s20 + $0x1300] sm:$0xff]  ;;  %v828_v51 = vld [vmem:[%s4939_s20 + $0x1210] sm:$0xff]  ;;  %v3541_v52 = vpack.c.bf16 %v861_v45, %v829_v44  ;;  %v891_v54 = vld [vmem:[%s4939_s20 + $0x1408] sm:$0xff] }
  0x75   : > { %3530 = vmatprep.subr.bf16.mxu1 %v3529_v16  ;;  %v860_v53 = vld [vmem:[%s4939_s20 + $0x1310] sm:$0xff]  ;;  %v923_v55 = vld [vmem:[%s4939_s20 + $0x1508] sm:$0xff]  ;;  %v893_v56 = vld [vmem:[%s4939_s20 + $0x1418] sm:$0xff]  ;;  %v3479_v58 = vpack.c.bf16 %v858_v50, %v826_v49 }
  0x76   : > { %v925_v57 = vld [vmem:[%s4939_s20 + $0x1518] sm:$0xff]  ;;  %v3543_v59 = vpack.c.bf16 %v860_v53, %v828_v51  ;;  %v3481_v60 = vpack.c.bf16 %v923_v55, %v891_v54  ;;  %v890_v61 = vld [vmem:[%s4939_s20 + $0x1400] sm:$0xff]  ;;  %v892_v63 = vld [vmem:[%s4939_s20 + $0x1410] sm:$0xff] }
  0x77   : > { %3468 = vmatpush1.bf16.msra.mxu0 %v3467_v22  ;;  %v922_v62 = vld [vmem:[%s4939_s20 + $0x1500] sm:$0xff]  ;;  %v3545_v0 = vpack.c.bf16 %v925_v57, %v893_v56  ;;  %v924_v1 = vld [vmem:[%s4939_s20 + $0x1510] sm:$0xff]  ;;  %v955_v2 = vld [vmem:[%s4939_s20 + $0x1608] sm:$0xff] }
  0x78   : > { %3532 = vmatpush1.bf16.msra.mxu1 %v3531_v23  ;;  %3470 = vmatprep.subr.bf16.mxu0 %v3469_v24  ;;  %v987_v3 = vld [vmem:[%s4939_s20 + $0x1708] sm:$0xff]  ;;  %v957_v4 = vld [vmem:[%s4939_s20 + $0x1618] sm:$0xff]  ;;  %v3483_v6 = vpack.c.bf16 %v922_v62, %v890_v61  ;;  %v954_v7 = vld [vmem:[%s4939_s20 + $0x1600] sm:$0xff]  ;;  %v3547_v8 = vpack.c.bf16 %v924_v1, %v892_v63 }
  0x79   : > { %3534 = vmatprep.subr.bf16.mxu1 %v3533_v28  ;;  %v989_v5 = vld [vmem:[%s4939_s20 + $0x1718] sm:$0xff]  ;;  %v3485_v9 = vpack.c.bf16 %v987_v3, %v955_v2  ;;  %v986_v10 = vld [vmem:[%s4939_s20 + $0x1700] sm:$0xff]  ;;  %v956_v11 = vld [vmem:[%s4939_s20 + $0x1610] sm:$0xff] }
  0x7a   : > { %v988_v12 = vld [vmem:[%s4939_s20 + $0x1710] sm:$0xff]  ;;  %v3549_v13 = vpack.c.bf16 %v989_v5, %v957_v4  ;;  %v1019_v14 = vld [vmem:[%s4939_s20 + $0x1808] sm:$0xff]  ;;  %v5043_v16 = vld.sshfl [vmem:[#allocation3] sm:$0x33 pattern:$0x76325410]  ;;  %v3487_v20 = vpack.c.bf16 %v986_v10, %v954_v7 }
  0x7b   : > { %3472 = vmatpush1.bf16.msra.mxu0 %v3471_v34  ;;  %v1051_v15 = vld [vmem:[%s4939_s20 + $0x1908] sm:$0xff]  ;;  %v1021_v17 = vld [vmem:[%s4939_s20 + $0x1818] sm:$0xff]  ;;  %v5049_v19 = vcombine.high %v5043_v16, %v5043_v16  ;;  %v3551_v21 = vpack.c.bf16 %v988_v12, %v956_v11  ;;  %v1018_v23 = vld [vmem:[%s4939_s20 + $0x1800] sm:$0xff] }
  0x7c   : > { %3536 = vmatpush1.bf16.msra.mxu1 %v3535_v35  ;;  %3474 = vmatprep.subr.bf16.mxu0 %v3473_v36  ;;  %v1053_v18 = vld [vmem:[%s4939_s20 + $0x1918] sm:$0xff]  ;;  %v3489_v22 = vpack.c.bf16 %v1051_v15, %v1019_v14  ;;  %v1050_v24 = vld [vmem:[%s4939_s20 + $0x1900] sm:$0xff]  ;;  %v1020_v25 = vld [vmem:[%s4939_s20 + $0x1810] sm:$0xff] }
  0x7d   : > { %3538 = vmatprep.subr.bf16.mxu1 %v3537_v40  ;;  %v3553_v26 = vpack.c.bf16 %v1053_v18, %v1021_v17  ;;  %v1052_v27 = vld [vmem:[%s4939_s20 + $0x1910] sm:$0xff]  ;;  %v1083_v28 = vld [vmem:[%s4939_s20 + $0x1a08] sm:$0xff]  ;;  %1349 = vmatprep.mubr.f32.mxu0 %v5049_v19  ;;  %v1085_v30 = vld [vmem:[%s4939_s20 + $0x1a18] sm:$0xff]  ;;  %v3491_v32 = vpack.c.bf16 %v1050_v24, %v1018_v23 }
  0x7e   : > { %v1115_v29 = vld [vmem:[%s4939_s20 + $0x1b08] sm:$0xff]  ;;  %v1117_v31 = vld [vmem:[%s4939_s20 + $0x1b18] sm:$0xff]  ;;  %1420 = vmatprep.mubr.f32.mxu1 %v5049_v19  ;;  %v3555_v33 = vpack.c.bf16 %v1052_v27, %v1020_v25  ;;  %v1082_v35 = vld [vmem:[%s4939_s20 + $0x1a00] sm:$0xff] }
  0x7f   : > { %3476 = vmatpush1.bf16.msra.mxu0 %v3475_v46  ;;  %v3493_v34 = vpack.c.bf16 %v1115_v29, %v1083_v28  ;;  %v1114_v36 = vld [vmem:[%s4939_s20 + $0x1b00] sm:$0xff]  ;;  %v1084_v37 = vld [vmem:[%s4939_s20 + $0x1a10] sm:$0xff]  ;;  %v3557_v38 = vpack.c.bf16 %v1117_v31, %v1085_v30  ;;  %v1147_v40 = vld [vmem:[%s4939_s20 + $0x1c08] sm:$0xff] }
  0x80   : > { %3540 = vmatpush1.bf16.msra.mxu1 %v3539_v47  ;;  %3478 = vmatprep.subr.bf16.mxu0 %v3477_v48  ;;  %v1116_v39 = vld [vmem:[%s4939_s20 + $0x1b10] sm:$0xff]  ;;  %v1179_v41 = vld [vmem:[%s4939_s20 + $0x1d08] sm:$0xff]  ;;  %v1149_v42 = vld [vmem:[%s4939_s20 + $0x1c18] sm:$0xff]  ;;  %v3495_v44 = vpack.c.bf16 %v1114_v36, %v1082_v35 }
  0x81   : > { %3542 = vmatprep.subr.bf16.mxu1 %v3541_v52  ;;  %v1181_v43 = vld [vmem:[%s4939_s20 + $0x1d18] sm:$0xff]  ;;  %v3559_v45 = vpack.c.bf16 %v1116_v39, %v1084_v37  ;;  %v3497_v46 = vpack.c.bf16 %v1179_v41, %v1147_v40  ;;  %v1146_v47 = vld [vmem:[%s4939_s20 + $0x1c00] sm:$0xff]  ;;  %v1148_v49 = vld [vmem:[%s4939_s20 + $0x1c10] sm:$0xff] }
  0x82   : > { %v1178_v48 = vld [vmem:[%s4939_s20 + $0x1d00] sm:$0xff]  ;;  %v3561_v50 = vpack.c.bf16 %v1181_v43, %v1149_v42  ;;  %v1180_v51 = vld [vmem:[%s4939_s20 + $0x1d10] sm:$0xff]  ;;  %v1211_v52 = vld [vmem:[%s4939_s20 + $0x1e08] sm:$0xff] }
  0x83   : > { %3480 = vmatpush1.bf16.msra.mxu0 %v3479_v58  ;;  %v1243_v53 = vld [vmem:[%s4939_s20 + $0x1f08] sm:$0xff]  ;;  %v1213_v54 = vld [vmem:[%s4939_s20 + $0x1e18] sm:$0xff]  ;;  %v3499_v56 = vpack.c.bf16 %v1178_v48, %v1146_v47  ;;  %v3563_v57 = vpack.c.bf16 %v1180_v51, %v1148_v49  ;;  %v1212_v61 = vld [vmem:[%s4939_s20 + $0x1e10] sm:$0xff] }
  0x84   : > { %3544 = vmatpush1.bf16.msra.mxu1 %v3543_v59  ;;  %3482 = vmatprep.subr.bf16.mxu0 %v3481_v60  ;;  %v1245_v55 = vld [vmem:[%s4939_s20 + $0x1f18] sm:$0xff]  ;;  %v3501_v58 = vpack.c.bf16 %v1243_v53, %v1211_v52  ;;  %v1210_v59 = vld [vmem:[%s4939_s20 + $0x1e00] sm:$0xff]  ;;  %v1244_v63 = vld [vmem:[%s4939_s20 + $0x1f10] sm:$0xff] }
  0x85   : > { %3546 = vmatprep.subr.bf16.mxu1 %v3545_v0  ;;  %v1242_v60 = vld [vmem:[%s4939_s20 + $0x1f00] sm:$0xff]  ;;  %v3565_v62 = vpack.c.bf16 %v1245_v55, %v1213_v54  ;;  %v255_v0 = vld [vmem:[%s4939_s20 + $0x28] sm:$0xff]  ;;  %v257_v2 = vld [vmem:[%s4939_s20 + $0x38] sm:$0xff]  ;;  %v3567_v5 = vpack.c.bf16 %v1244_v63, %v1212_v61 }
  0x86   : > { %v287_v1 = vld [vmem:[%s4939_s20 + $0x128] sm:$0xff]  ;;  %v289_v3 = vld [vmem:[%s4939_s20 + $0x138] sm:$0xff]  ;;  %v3503_v4 = vpack.c.bf16 %v1242_v60, %v1210_v59  ;;  %v254_v7 = vld [vmem:[%s4939_s20 + $0x20] sm:$0xff] }
  0x87   : > { %3484 = vmatpush1.bf16.msra.mxu0 %v3483_v6  ;;  %v3569_v6 = vpack.c.bf16 %v287_v1, %v255_v0  ;;  %v3633_v10 = vpack.c.bf16 %v289_v3, %v257_v2  ;;  %v288_v11 = vld [vmem:[%s4939_s20 + $0x130] sm:$0xff]  ;;  %v319_v12 = vld [vmem:[%s4939_s20 + $0x228] sm:$0xff]  ;;  %v321_v14 = vld [vmem:[%s4939_s20 + $0x238] sm:$0xff] }
  0x88   : > { %3548 = vmatpush1.bf16.msra.mxu1 %v3547_v8  ;;  %3486 = vmatprep.subr.bf16.mxu0 %v3485_v9  ;;  %v286_v8 = vld [vmem:[%s4939_s20 + $0x120] sm:$0xff]  ;;  %v256_v9 = vld [vmem:[%s4939_s20 + $0x30] sm:$0xff]  ;;  %v353_v15 = vld [vmem:[%s4939_s20 + $0x338] sm:$0xff] }
  0x89   : > { %3550 = vmatprep.subr.bf16.mxu1 %v3549_v13  ;;  %v351_v13 = vld [vmem:[%s4939_s20 + $0x328] sm:$0xff]  ;;  %v3571_v17 = vpack.c.bf16 %v286_v8, %v254_v7  ;;  %v3635_v18 = vpack.c.bf16 %v288_v11, %v256_v9  ;;  %v320_v23 = vld [vmem:[%s4939_s20 + $0x230] sm:$0xff]  ;;  %v3637_v24 = vpack.c.bf16 %v353_v15, %v321_v14  ;;  %v385_v28 = vld [vmem:[%s4939_s20 + $0x438] sm:$0xff] }
  0x8a   : > { %v352_v25 = vld [vmem:[%s4939_s20 + $0x330] sm:$0xff]  ;;  %v415_v27 = vld [vmem:[%s4939_s20 + $0x528] sm:$0xff]  ;;  %v417_v29 = vld [vmem:[%s4939_s20 + $0x538] sm:$0xff] }
  0x8b   : > { %3488 = vmatpush1.bf16.msra.mxu0 %v3487_v20  ;;  %v3573_v20 = vpack.c.bf16 %v351_v13, %v319_v12  ;;  %v3639_v31 = vpack.c.bf16 %v352_v25, %v320_v23  ;;  %v384_v35 = vld [vmem:[%s4939_s20 + $0x430] sm:$0xff]  ;;  %v3641_v36 = vpack.c.bf16 %v417_v29, %v385_v28  ;;  %v479_v39 = vld [vmem:[%s4939_s20 + $0x728] sm:$0xff]  ;;  %v449_v40 = vld [vmem:[%s4939_s20 + $0x638] sm:$0xff] }
  0x8c   : > { %3552 = vmatpush1.bf16.msra.mxu1 %v3551_v21  ;;  %3490 = vmatprep.subr.bf16.mxu0 %v3489_v22  ;;  %v318_v21 = vld [vmem:[%s4939_s20 + $0x220] sm:$0xff]  ;;  %v416_v37 = vld [vmem:[%s4939_s20 + $0x530] sm:$0xff]  ;;  %v481_v41 = vld [vmem:[%s4939_s20 + $0x738] sm:$0xff] }
  0x8d   : > { %3554 = vmatprep.subr.bf16.mxu1 %v3553_v26  ;;  %v350_v22 = vld [vmem:[%s4939_s20 + $0x320] sm:$0xff]  ;;  %v383_v26 = vld [vmem:[%s4939_s20 + $0x428] sm:$0xff]  ;;  %v3643_v43 = vpack.c.bf16 %v416_v37, %v384_v35  ;;  %v448_v47 = vld [vmem:[%s4939_s20 + $0x630] sm:$0xff]  ;;  %v3645_v48 = vpack.c.bf16 %v481_v41, %v449_v40 }
  0x8e   : > { %v3575_v30 = vpack.c.bf16 %v350_v22, %v318_v21  ;;  %v480_v49 = vld [vmem:[%s4939_s20 + $0x730] sm:$0xff]  ;;  %v543_v51 = vld [vmem:[%s4939_s20 + $0x928] sm:$0xff]  ;;  %v513_v52 = vld [vmem:[%s4939_s20 + $0x838] sm:$0xff] }
  0x8f   : > { %3492 = vmatpush1.bf16.msra.mxu0 %v3491_v32  ;;  %v3577_v32 = vpack.c.bf16 %v415_v27, %v383_v26  ;;  %v545_v53 = vld [vmem:[%s4939_s20 + $0x938] sm:$0xff]  ;;  %v3647_v55 = vpack.c.bf16 %v480_v49, %v448_v47  ;;  %v512_v59 = vld [vmem:[%s4939_s20 + $0x830] sm:$0xff]  ;;  %v607_v63 = vld [vmem:[%s4939_s20 + $0xb28] sm:$0xff] }
  0x90   : > { %3556 = vmatpush1.bf16.msra.mxu1 %v3555_v33  ;;  %3494 = vmatprep.subr.bf16.mxu0 %v3493_v34  ;;  %v382_v33 = vld [vmem:[%s4939_s20 + $0x420] sm:$0xff]  ;;  %v3649_v60 = vpack.c.bf16 %v545_v53, %v513_v52  ;;  %v544_v61 = vld [vmem:[%s4939_s20 + $0x930] sm:$0xff]  ;;  %v577_v0 = vld [vmem:[%s4939_s20 + $0xa38] sm:$0xff] }
  0x91   : > { %3558 = vmatprep.subr.bf16.mxu1 %v3557_v38  ;;  %v414_v34 = vld [vmem:[%s4939_s20 + $0x520] sm:$0xff]  ;;  %v447_v38 = vld [vmem:[%s4939_s20 + $0x628] sm:$0xff]  ;;  %v609_v1 = vld [vmem:[%s4939_s20 + $0xb38] sm:$0xff]  ;;  %v3651_v3 = vpack.c.bf16 %v544_v61, %v512_v59 }
  0x92   : > { %v3579_v42 = vpack.c.bf16 %v414_v34, %v382_v33  ;;  %v576_v7 = vld [vmem:[%s4939_s20 + $0xa30] sm:$0xff]  ;;  %v3653_v8 = vpack.c.bf16 %v609_v1, %v577_v0  ;;  %v671_v11 = vld [vmem:[%s4939_s20 + $0xd28] sm:$0xff]  ;;  %v641_v12 = vld [vmem:[%s4939_s20 + $0xc38] sm:$0xff] }
  0x93   : > { %3496 = vmatpush1.bf16.msra.mxu0 %v3495_v44  ;;  %v3581_v44 = vpack.c.bf16 %v479_v39, %v447_v38  ;;  %v608_v9 = vld [vmem:[%s4939_s20 + $0xb30] sm:$0xff]  ;;  %v673_v13 = vld [vmem:[%s4939_s20 + $0xd38] sm:$0xff]  ;;  %v735_v25 = vld [vmem:[%s4939_s20 + $0xf28] sm:$0xff] }
  0x94   : > { %3560 = vmatpush1.bf16.msra.mxu1 %v3559_v45  ;;  %3498 = vmatprep.subr.bf16.mxu0 %v3497_v46  ;;  %v446_v45 = vld [vmem:[%s4939_s20 + $0x620] sm:$0xff]  ;;  %v3655_v15 = vpack.c.bf16 %v608_v9, %v576_v7  ;;  %v640_v21 = vld [vmem:[%s4939_s20 + $0xc30] sm:$0xff]  ;;  %v3657_v22 = vpack.c.bf16 %v673_v13, %v641_v12  ;;  %v705_v26 = vld [vmem:[%s4939_s20 + $0xe38] sm:$0xff] }
  0x95   : > { %3562 = vmatprep.subr.bf16.mxu1 %v3561_v50  ;;  %v478_v46 = vld [vmem:[%s4939_s20 + $0x720] sm:$0xff]  ;;  %v511_v50 = vld [vmem:[%s4939_s20 + $0x828] sm:$0xff]  ;;  %v672_v23 = vld [vmem:[%s4939_s20 + $0xd30] sm:$0xff] }
  0x96   : > { %v3583_v54 = vpack.c.bf16 %v478_v46, %v446_v45  ;;  %v737_v27 = vld [vmem:[%s4939_s20 + $0xf38] sm:$0xff]  ;;  %v3659_v29 = vpack.c.bf16 %v672_v23, %v640_v21  ;;  %v704_v33 = vld [vmem:[%s4939_s20 + $0xe30] sm:$0xff]  ;;  %v799_v37 = vld [vmem:[%s4939_s20 + $0x1128] sm:$0xff] }
  0x97   : > { %3500 = vmatpush1.bf16.msra.mxu0 %v3499_v56  ;;  %v3585_v56 = vpack.c.bf16 %v543_v51, %v511_v50  ;;  %v3661_v34 = vpack.c.bf16 %v737_v27, %v705_v26  ;;  %v736_v35 = vld [vmem:[%s4939_s20 + $0xf30] sm:$0xff]  ;;  %v769_v38 = vld [vmem:[%s4939_s20 + $0x1038] sm:$0xff]  ;;  %v863_v49 = vld [vmem:[%s4939_s20 + $0x1328] sm:$0xff] }
  0x98   : > { %3564 = vmatpush1.bf16.msra.mxu1 %v3563_v57  ;;  %3502 = vmatprep.subr.bf16.mxu0 %v3501_v58  ;;  %v510_v57 = vld [vmem:[%s4939_s20 + $0x820] sm:$0xff]  ;;  %v801_v39 = vld [vmem:[%s4939_s20 + $0x1138] sm:$0xff]  ;;  %v3663_v41 = vpack.c.bf16 %v736_v35, %v704_v33  ;;  %v768_v45 = vld [vmem:[%s4939_s20 + $0x1030] sm:$0xff] }
  0x99   : > { %3566 = vmatprep.subr.bf16.mxu1 %v3565_v62  ;;  %v542_v58 = vld [vmem:[%s4939_s20 + $0x920] sm:$0xff]  ;;  %v575_v62 = vld [vmem:[%s4939_s20 + $0xa28] sm:$0xff]  ;;  %v3665_v46 = vpack.c.bf16 %v801_v39, %v769_v38  ;;  %v800_v47 = vld [vmem:[%s4939_s20 + $0x1130] sm:$0xff] }
  0x9a   : > { %v3587_v2 = vpack.c.bf16 %v542_v58, %v510_v57  ;;  %v833_v50 = vld [vmem:[%s4939_s20 + $0x1238] sm:$0xff]  ;;  %v3667_v53 = vpack.c.bf16 %v800_v47, %v768_v45  ;;  %v832_v57 = vld [vmem:[%s4939_s20 + $0x1230] sm:$0xff]  ;;  %v927_v61 = vld [vmem:[%s4939_s20 + $0x1528] sm:$0xff] }
  0x9b   : > { %3504 = vmatpush1.bf16.msra.mxu0 %v3503_v4  ;;  %v3589_v4 = vpack.c.bf16 %v607_v63, %v575_v62  ;;  %v865_v51 = vld [vmem:[%s4939_s20 + $0x1338] sm:$0xff]  ;;  %v864_v59 = vld [vmem:[%s4939_s20 + $0x1330] sm:$0xff]  ;;  %v991_v9 = vld [vmem:[%s4939_s20 + $0x1728] sm:$0xff] }
  0x9c   : > { %3568 = vmatpush1.bf16.msra.mxu1 %v3567_v5  ;;  %3570 = vmatprep.subr.bf16.mxu0 %v3569_v6  ;;  %v574_v5 = vld [vmem:[%s4939_s20 + $0xa20] sm:$0xff]  ;;  %v3669_v58 = vpack.c.bf16 %v865_v51, %v833_v50  ;;  %v897_v62 = vld [vmem:[%s4939_s20 + $0x1438] sm:$0xff]  ;;  %v3671_v1 = vpack.c.bf16 %v864_v59, %v832_v57  ;;  %v928_v7 = vld [vmem:[%s4939_s20 + $0x1530] sm:$0xff] }
  0x9d   : > { %3634 = vmatprep.subr.bf16.mxu1 %v3633_v10  ;;  %v606_v6 = vld [vmem:[%s4939_s20 + $0xb20] sm:$0xff]  ;;  %v639_v10 = vld [vmem:[%s4939_s20 + $0xc28] sm:$0xff]  ;;  %v929_v63 = vld [vmem:[%s4939_s20 + $0x1538] sm:$0xff] }
  0x9e   : > { %1350 = vmatmul.mubr.f32.vlgmr.msra.gmra.mrb[0].mxu0 %v5043_v16  ;;  %v3591_v14 = vpack.c.bf16 %v606_v6, %v574_v5  ;;  %v896_v5 = vld [vmem:[%s4939_s20 + $0x1430] sm:$0xff]  ;;  %v3673_v6 = vpack.c.bf16 %v929_v63, %v897_v62  ;;  %v1055_v23 = vld [vmem:[%s4939_s20 + $0x1928] sm:$0xff] }
  0x9f   : > { %1421 = vmatmul.mubr.f32.vlgmr.msra.gmra.mrb[0].mxu1 %v5043_v16  ;;  %3572 = vmatpush1.bf16.msra.mxu0 %v3571_v17  ;;  %v3593_v17 = vpack.c.bf16 %v671_v11, %v639_v10  ;;  %v961_v10 = vld [vmem:[%s4939_s20 + $0x1638] sm:$0xff]  ;;  %v3675_v13 = vpack.c.bf16 %v928_v7, %v896_v5  ;;  %v992_v21 = vld [vmem:[%s4939_s20 + $0x1730] sm:$0xff]  ;;  %v1119_v35 = vld [vmem:[%s4939_s20 + $0x1b28] sm:$0xff] }
  0xa0   : > { %3636 = vmatpush1.bf16.msra.mxu1 %v3635_v18  ;;  %3574 = vmatprep.subr.bf16.mxu0 %v3573_v20  ;;  %v638_v18 = vld [vmem:[%s4939_s20 + $0xc20] sm:$0xff]  ;;  %v993_v11 = vld [vmem:[%s4939_s20 + $0x1738] sm:$0xff]  ;;  %v1056_v33 = vld [vmem:[%s4939_s20 + $0x1930] sm:$0xff] }
  0xa1   : > { %3638 = vmatprep.subr.bf16.mxu1 %v3637_v24  ;;  %1491 = vmatprep.mubr.f32.mxu0 %v5049_v19  ;;  %v670_v20 = vld [vmem:[%s4939_s20 + $0xd20] sm:$0xff]  ;;  %v703_v24 = vld [vmem:[%s4939_s20 + $0xe28] sm:$0xff]  ;;  %v1120_v45 = vld [vmem:[%s4939_s20 + $0x1b30] sm:$0xff] }
  0xa2   : > { %1562 = vmatprep.mubr.f32.mxu1 %v5049_v19  ;;  %v3595_v28 = vpack.c.bf16 %v670_v20, %v638_v18  ;;  %v960_v18 = vld [vmem:[%s4939_s20 + $0x1630] sm:$0xff]  ;;  %v3677_v20 = vpack.c.bf16 %v993_v11, %v961_v10  ;;  %v1183_v47 = vld [vmem:[%s4939_s20 + $0x1d28] sm:$0xff] }
  0xa3   : > { %3576 = vmatpush1.bf16.msra.mxu0 %v3575_v30  ;;  %v3597_v30 = vpack.c.bf16 %v735_v25, %v703_v24  ;;  %v1025_v24 = vld [vmem:[%s4939_s20 + $0x1838] sm:$0xff]  ;;  %v3679_v27 = vpack.c.bf16 %v992_v21, %v960_v18  ;;  %v1184_v57 = vld [vmem:[%s4939_s20 + $0x1d30] sm:$0xff]  ;;  %v1247_v59 = vld [vmem:[%s4939_s20 + $0x1f28] sm:$0xff] }
  0xa4   : > { %3640 = vmatpush1.bf16.msra.mxu1 %v3639_v31  ;;  %3578 = vmatprep.subr.bf16.mxu0 %v3577_v32  ;;  %v702_v31 = vld [vmem:[%s4939_s20 + $0xe20] sm:$0xff]  ;;  %v1057_v25 = vld [vmem:[%s4939_s20 + $0x1938] sm:$0xff]  ;;  %v1248_v5 = vld [vmem:[%s4939_s20 + $0x1f30] sm:$0xff] }
  0xa5   : > { %3642 = vmatprep.subr.bf16.mxu1 %v3641_v36  ;;  %v734_v32 = vld [vmem:[%s4939_s20 + $0xf20] sm:$0xff]  ;;  %v767_v36 = vld [vmem:[%s4939_s20 + $0x1028] sm:$0xff]  ;;  %v292_v18 = vld [vmem:[%s4939_s20 + $0x150] sm:$0xff] }
  0xa6   : > { %v3599_v40 = vpack.c.bf16 %v734_v32, %v702_v31  ;;  %v1024_v31 = vld [vmem:[%s4939_s20 + $0x1830] sm:$0xff]  ;;  %v3681_v32 = vpack.c.bf16 %v1057_v25, %v1025_v24  ;;  %v291_v7 = vld [vmem:[%s4939_s20 + $0x148] sm:$0xff] }
  0xa7   : > { %3580 = vmatpush1.bf16.msra.mxu0 %v3579_v42  ;;  %v3601_v42 = vpack.c.bf16 %v799_v37, %v767_v36  ;;  %v1089_v36 = vld [vmem:[%s4939_s20 + $0x1a38] sm:$0xff]  ;;  %v3683_v39 = vpack.c.bf16 %v1056_v33, %v1024_v31  ;;  %v355_v21 = vld [vmem:[%s4939_s20 + $0x348] sm:$0xff]  ;;  %v356_v31 = vld [vmem:[%s4939_s20 + $0x350] sm:$0xff] }
  0xa8   : > { %3644 = vmatpush1.bf16.msra.mxu1 %v3643_v43  ;;  %3582 = vmatprep.subr.bf16.mxu0 %v3581_v44  ;;  %v766_v43 = vld [vmem:[%s4939_s20 + $0x1020] sm:$0xff]  ;;  %v1121_v37 = vld [vmem:[%s4939_s20 + $0x1b38] sm:$0xff]  ;;  %v419_v33 = vld [vmem:[%s4939_s20 + $0x548] sm:$0xff] }
  0xa9   : > { %3646 = vmatprep.subr.bf16.mxu1 %v3645_v48  ;;  %v798_v44 = vld [vmem:[%s4939_s20 + $0x1120] sm:$0xff]  ;;  %v831_v48 = vld [vmem:[%s4939_s20 + $0x1228] sm:$0xff] }
  0xaa   : > { %v3603_v52 = vpack.c.bf16 %v798_v44, %v766_v43  ;;  %v1088_v43 = vld [vmem:[%s4939_s20 + $0x1a30] sm:$0xff]  ;;  %v3685_v44 = vpack.c.bf16 %v1121_v37, %v1089_v36 }
  0xab   : > { %3584 = vmatpush1.bf16.msra.mxu0 %v3583_v54  ;;  %v3605_v54 = vpack.c.bf16 %v863_v49, %v831_v48  ;;  %v1153_v48 = vld [vmem:[%s4939_s20 + $0x1c38] sm:$0xff]  ;;  %v3687_v51 = vpack.c.bf16 %v1120_v45, %v1088_v43  ;;  %v420_v43 = vld [vmem:[%s4939_s20 + $0x550] sm:$0xff]  ;;  %v483_v45 = vld [vmem:[%s4939_s20 + $0x748] sm:$0xff] }
  0xac   : > { %3648 = vmatpush1.bf16.msra.mxu1 %v3647_v55  ;;  %3586 = vmatprep.subr.bf16.mxu0 %v3585_v56  ;;  %v830_v55 = vld [vmem:[%s4939_s20 + $0x1220] sm:$0xff]  ;;  %v1185_v49 = vld [vmem:[%s4939_s20 + $0x1d38] sm:$0xff] }
  0xad   : > { %3650 = vmatprep.subr.bf16.mxu1 %v3649_v60  ;;  %v862_v56 = vld [vmem:[%s4939_s20 + $0x1320] sm:$0xff]  ;;  %v895_v60 = vld [vmem:[%s4939_s20 + $0x1428] sm:$0xff] }
  0xae   : > { %v3607_v0 = vpack.c.bf16 %v862_v56, %v830_v55  ;;  %v1152_v55 = vld [vmem:[%s4939_s20 + $0x1c30] sm:$0xff]  ;;  %v3689_v56 = vpack.c.bf16 %v1185_v49, %v1153_v48 }
  0xaf   : > { %3588 = vmatpush1.bf16.msra.mxu0 %v3587_v2  ;;  %v3609_v2 = vpack.c.bf16 %v927_v61, %v895_v60  ;;  %v1217_v60 = vld [vmem:[%s4939_s20 + $0x1e38] sm:$0xff]  ;;  %v3691_v63 = vpack.c.bf16 %v1184_v57, %v1152_v55  ;;  %v515_v55 = vld [vmem:[%s4939_s20 + $0x848] sm:$0xff] }
  0xb0   : > { %3652 = vmatpush1.bf16.msra.mxu1 %v3651_v3  ;;  %3590 = vmatprep.subr.bf16.mxu0 %v3589_v4  ;;  %v894_v3 = vld [vmem:[%s4939_s20 + $0x1420] sm:$0xff]  ;;  %v1249_v61 = vld [vmem:[%s4939_s20 + $0x1f38] sm:$0xff] }
  0xb1   : > { %3654 = vmatprep.subr.bf16.mxu1 %v3653_v8  ;;  %v926_v4 = vld [vmem:[%s4939_s20 + $0x1520] sm:$0xff]  ;;  %v959_v8 = vld [vmem:[%s4939_s20 + $0x1628] sm:$0xff]  ;;  %v517_v57 = vld [vmem:[%s4939_s20 + $0x858] sm:$0xff] }
  0xb2   : > { %v3611_v12 = vpack.c.bf16 %v926_v4, %v894_v3  ;;  %v1216_v3 = vld [vmem:[%s4939_s20 + $0x1e30] sm:$0xff]  ;;  %v3693_v4 = vpack.c.bf16 %v1249_v61, %v1217_v60 }
  0xb3   : > { %3592 = vmatpush1.bf16.msra.mxu0 %v3591_v14  ;;  %v3613_v14 = vpack.c.bf16 %v991_v9, %v959_v8  ;;  %v261_v8 = vld [vmem:[%s4939_s20 + $0x58] sm:$0xff]  ;;  %v3695_v11 = vpack.c.bf16 %v1248_v5, %v1216_v3  ;;  %v579_v3 = vld [vmem:[%s4939_s20 + $0xa48] sm:$0xff] }
  0xb4   : > { %3656 = vmatpush1.bf16.msra.mxu1 %v3655_v15  ;;  %3594 = vmatprep.subr.bf16.mxu0 %v3593_v17  ;;  %v958_v15 = vld [vmem:[%s4939_s20 + $0x1620] sm:$0xff]  ;;  %v293_v9 = vld [vmem:[%s4939_s20 + $0x158] sm:$0xff] }
  0xb5   : > { %3658 = vmatprep.subr.bf16.mxu1 %v3657_v22  ;;  %v990_v17 = vld [vmem:[%s4939_s20 + $0x1720] sm:$0xff]  ;;  %v1023_v22 = vld [vmem:[%s4939_s20 + $0x1828] sm:$0xff]  ;;  %v581_v5 = vld [vmem:[%s4939_s20 + $0xa58] sm:$0xff] }
  0xb6   : > { %v3615_v26 = vpack.c.bf16 %v990_v17, %v958_v15  ;;  %v260_v15 = vld [vmem:[%s4939_s20 + $0x50] sm:$0xff]  ;;  %v3761_v17 = vpack.c.bf16 %v293_v9, %v261_v8 }
  0xb7   : > { %3596 = vmatpush1.bf16.msra.mxu0 %v3595_v28  ;;  %v3617_v28 = vpack.c.bf16 %v1055_v23, %v1023_v22  ;;  %v325_v22 = vld [vmem:[%s4939_s20 + $0x258] sm:$0xff]  ;;  %v3763_v25 = vpack.c.bf16 %v292_v18, %v260_v15  ;;  %v643_v15 = vld [vmem:[%s4939_s20 + $0xc48] sm:$0xff] }
  0xb8   : > { %3660 = vmatpush1.bf16.msra.mxu1 %v3659_v29  ;;  %3598 = vmatprep.subr.bf16.mxu0 %v3597_v30  ;;  %v1022_v29 = vld [vmem:[%s4939_s20 + $0x1820] sm:$0xff]  ;;  %v357_v23 = vld [vmem:[%s4939_s20 + $0x358] sm:$0xff] }
  0xb9   : > { %3662 = vmatprep.subr.bf16.mxu1 %v3661_v34  ;;  %v1054_v30 = vld [vmem:[%s4939_s20 + $0x1920] sm:$0xff]  ;;  %v1087_v34 = vld [vmem:[%s4939_s20 + $0x1a28] sm:$0xff]  ;;  %v645_v18 = vld [vmem:[%s4939_s20 + $0xc58] sm:$0xff] }
  0xba   : > { %v3619_v38 = vpack.c.bf16 %v1054_v30, %v1022_v29  ;;  %v324_v29 = vld [vmem:[%s4939_s20 + $0x250] sm:$0xff]  ;;  %v3765_v30 = vpack.c.bf16 %v357_v23, %v325_v22 }
  0xbb   : > { %3600 = vmatpush1.bf16.msra.mxu0 %v3599_v40  ;;  %v3621_v40 = vpack.c.bf16 %v1119_v35, %v1087_v34  ;;  %v389_v34 = vld [vmem:[%s4939_s20 + $0x458] sm:$0xff]  ;;  %v3767_v37 = vpack.c.bf16 %v356_v31, %v324_v29  ;;  %v707_v29 = vld [vmem:[%s4939_s20 + $0xe48] sm:$0xff] }
  0xbc   : > { %3664 = vmatpush1.bf16.msra.mxu1 %v3663_v41  ;;  %3602 = vmatprep.subr.bf16.mxu0 %v3601_v42  ;;  %v1086_v41 = vld [vmem:[%s4939_s20 + $0x1a20] sm:$0xff]  ;;  %v421_v35 = vld [vmem:[%s4939_s20 + $0x558] sm:$0xff] }
  0xbd   : > { %3666 = vmatprep.subr.bf16.mxu1 %v3665_v46  ;;  %v1118_v42 = vld [vmem:[%s4939_s20 + $0x1b20] sm:$0xff]  ;;  %v1151_v46 = vld [vmem:[%s4939_s20 + $0x1c28] sm:$0xff]  ;;  %v709_v31 = vld [vmem:[%s4939_s20 + $0xe58] sm:$0xff] }
  0xbe   : > { %v3623_v50 = vpack.c.bf16 %v1118_v42, %v1086_v41  ;;  %v388_v41 = vld [vmem:[%s4939_s20 + $0x450] sm:$0xff]  ;;  %v3769_v42 = vpack.c.bf16 %v421_v35, %v389_v34 }
  0xbf   : > { %3604 = vmatpush1.bf16.msra.mxu0 %v3603_v52  ;;  %v3625_v52 = vpack.c.bf16 %v1183_v47, %v1151_v46  ;;  %v485_v46 = vld [vmem:[%s4939_s20 + $0x758] sm:$0xff]  ;;  %v3771_v48 = vpack.c.bf16 %v420_v43, %v388_v41  ;;  %v771_v41 = vld [vmem:[%s4939_s20 + $0x1048] sm:$0xff] }
  0xc0   : > { %3668 = vmatpush1.bf16.msra.mxu1 %v3667_v53  ;;  %3606 = vmatprep.subr.bf16.mxu0 %v3605_v54  ;;  %v1150_v53 = vld [vmem:[%s4939_s20 + $0x1c20] sm:$0xff]  ;;  %v773_v43 = vld [vmem:[%s4939_s20 + $0x1058] sm:$0xff] }
  0xc1   : > { %3670 = vmatprep.subr.bf16.mxu1 %v3669_v58  ;;  %v1182_v54 = vld [vmem:[%s4939_s20 + $0x1d20] sm:$0xff]  ;;  %v1215_v58 = vld [vmem:[%s4939_s20 + $0x1e28] sm:$0xff] }
  0xc2   : > { %v3627_v62 = vpack.c.bf16 %v1182_v54, %v1150_v53  ;;  %v484_v54 = vld [vmem:[%s4939_s20 + $0x750] sm:$0xff] }
  0xc3   : > { %3608 = vmatpush1.bf16.msra.mxu0 %v3607_v0  ;;  %v3629_v0 = vpack.c.bf16 %v1247_v59, %v1215_v58  ;;  %v549_v58 = vld [vmem:[%s4939_s20 + $0x958] sm:$0xff] }
  0xc4   : > { %3672 = vmatpush1.bf16.msra.mxu1 %v3671_v1  ;;  %3610 = vmatprep.subr.bf16.mxu0 %v3609_v2  ;;  %v1214_v1 = vld [vmem:[%s4939_s20 + $0x1e20] sm:$0xff] }
  0xc5   : > { %3674 = vmatprep.subr.bf16.mxu1 %v3673_v6  ;;  %v1246_v2 = vld [vmem:[%s4939_s20 + $0x1f20] sm:$0xff]  ;;  %v259_v6 = vld [vmem:[%s4939_s20 + $0x48] sm:$0xff] }
  0xc6   : > { %v3631_v10 = vpack.c.bf16 %v1246_v2, %v1214_v1  ;;  %v3777_v1 = vpack.c.bf16 %v549_v58, %v517_v57  ;;  %v548_v2 = vld [vmem:[%s4939_s20 + $0x950] sm:$0xff] }
  0xc7   : > { %3612 = vmatpush1.bf16.msra.mxu0 %v3611_v12  ;;  %v3697_v12 = vpack.c.bf16 %v291_v7, %v259_v6  ;;  %v613_v6 = vld [vmem:[%s4939_s20 + $0xb58] sm:$0xff] }
  0xc8   : > { %3676 = vmatpush1.bf16.msra.mxu1 %v3675_v13  ;;  %3614 = vmatprep.subr.bf16.mxu0 %v3613_v14  ;;  %v258_v13 = vld [vmem:[%s4939_s20 + $0x40] sm:$0xff] }
  0xc9   : > { %3678 = vmatprep.subr.bf16.mxu1 %v3677_v20  ;;  %v290_v14 = vld [vmem:[%s4939_s20 + $0x140] sm:$0xff]  ;;  %v323_v20 = vld [vmem:[%s4939_s20 + $0x248] sm:$0xff] }
  0xca   : > { %v3699_v24 = vpack.c.bf16 %v290_v14, %v258_v13  ;;  %v3781_v13 = vpack.c.bf16 %v613_v6, %v581_v5  ;;  %v612_v14 = vld [vmem:[%s4939_s20 + $0xb50] sm:$0xff] }
  0xcb   : > { %3616 = vmatpush1.bf16.msra.mxu0 %v3615_v26  ;;  %v3701_v26 = vpack.c.bf16 %v355_v21, %v323_v20  ;;  %v677_v20 = vld [vmem:[%s4939_s20 + $0xd58] sm:$0xff] }
  0xcc   : > { %3680 = vmatpush1.bf16.msra.mxu1 %v3679_v27  ;;  %3618 = vmatprep.subr.bf16.mxu0 %v3617_v28  ;;  %v322_v27 = vld [vmem:[%s4939_s20 + $0x240] sm:$0xff] }
  0xcd   : > { %3682 = vmatprep.subr.bf16.mxu1 %v3681_v32  ;;  %v354_v28 = vld [vmem:[%s4939_s20 + $0x340] sm:$0xff]  ;;  %v387_v32 = vld [vmem:[%s4939_s20 + $0x448] sm:$0xff] }
  0xce   : > { %v3703_v36 = vpack.c.bf16 %v354_v28, %v322_v27  ;;  %v3785_v27 = vpack.c.bf16 %v677_v20, %v645_v18  ;;  %v676_v28 = vld [vmem:[%s4939_s20 + $0xd50] sm:$0xff] }
  0xcf   : > { %3620 = vmatpush1.bf16.msra.mxu0 %v3619_v38  ;;  %v3705_v38 = vpack.c.bf16 %v419_v33, %v387_v32  ;;  %v741_v32 = vld [vmem:[%s4939_s20 + $0xf58] sm:$0xff] }
  0xd0   : > { %3684 = vmatpush1.bf16.msra.mxu1 %v3683_v39  ;;  %3622 = vmatprep.subr.bf16.mxu0 %v3621_v40  ;;  %v386_v39 = vld [vmem:[%s4939_s20 + $0x440] sm:$0xff] }
  0xd1   : > { %3686 = vmatprep.subr.bf16.mxu1 %v3685_v44  ;;  %v418_v40 = vld [vmem:[%s4939_s20 + $0x540] sm:$0xff]  ;;  %v451_v44 = vld [vmem:[%s4939_s20 + $0x648] sm:$0xff] }
  0xd2   : > { %v3707_v47 = vpack.c.bf16 %v418_v40, %v386_v39  ;;  %v3709_v49 = vpack.c.bf16 %v483_v45, %v451_v44  ;;  %v3789_v39 = vpack.c.bf16 %v741_v32, %v709_v31  ;;  %v740_v40 = vld [vmem:[%s4939_s20 + $0xf50] sm:$0xff]  ;;  %v805_v44 = vld [vmem:[%s4939_s20 + $0x1158] sm:$0xff] }
  0xd3   : > { %3624 = vmatpush1.bf16.msra.mxu0 %v3623_v50  ;;  %v450_v50 = vld [vmem:[%s4939_s20 + $0x640] sm:$0xff] }
  0xd4   : > { %3688 = vmatpush1.bf16.msra.mxu1 %v3687_v51  ;;  %3626 = vmatprep.subr.bf16.mxu0 %v3625_v52  ;;  %v482_v51 = vld [vmem:[%s4939_s20 + $0x740] sm:$0xff]  ;;  %v452_v52 = vld [vmem:[%s4939_s20 + $0x650] sm:$0xff] }
  0xd5   : > { %3690 = vmatprep.subr.bf16.mxu1 %v3689_v56  ;;  %v547_v56 = vld [vmem:[%s4939_s20 + $0x948] sm:$0xff]  ;;  %v3711_v59 = vpack.c.bf16 %v482_v51, %v450_v50  ;;  %v3775_v60 = vpack.c.bf16 %v484_v54, %v452_v52  ;;  %v3793_v50 = vpack.c.bf16 %v805_v44, %v773_v43  ;;  %v804_v51 = vld [vmem:[%s4939_s20 + $0x1150] sm:$0xff]  ;;  %v837_v54 = vld [vmem:[%s4939_s20 + $0x1258] sm:$0xff] }
  0xd6   : > { %v3713_v61 = vpack.c.bf16 %v547_v56, %v515_v55  ;;  %v835_v52 = vld [vmem:[%s4939_s20 + $0x1248] sm:$0xff]  ;;  %v869_v55 = vld [vmem:[%s4939_s20 + $0x1358] sm:$0xff] }
  0xd7   : > { %3628 = vmatpush1.bf16.msra.mxu0 %v3627_v62  ;;  %v514_v62 = vld [vmem:[%s4939_s20 + $0x840] sm:$0xff] }
  0xd8   : > { %3692 = vmatpush1.bf16.msra.mxu1 %v3691_v63  ;;  %3630 = vmatprep.subr.bf16.mxu0 %v3629_v0  ;;  %v546_v63 = vld [vmem:[%s4939_s20 + $0x940] sm:$0xff]  ;;  %v516_v0 = vld [vmem:[%s4939_s20 + $0x850] sm:$0xff] }
  0xd9   : > { %3694 = vmatprep.subr.bf16.mxu1 %v3693_v4  ;;  %v611_v4 = vld [vmem:[%s4939_s20 + $0xb48] sm:$0xff]  ;;  %v3715_v7 = vpack.c.bf16 %v546_v63, %v514_v62  ;;  %v3779_v8 = vpack.c.bf16 %v548_v2, %v516_v0  ;;  %v3797_v62 = vpack.c.bf16 %v869_v55, %v837_v54  ;;  %v868_v63 = vld [vmem:[%s4939_s20 + $0x1350] sm:$0xff]  ;;  %v901_v2 = vld [vmem:[%s4939_s20 + $0x1458] sm:$0xff] }
  0xda   : > { %v3717_v9 = vpack.c.bf16 %v611_v4, %v579_v3  ;;  %v899_v0 = vld [vmem:[%s4939_s20 + $0x1448] sm:$0xff]  ;;  %v933_v3 = vld [vmem:[%s4939_s20 + $0x1558] sm:$0xff] }
  0xdb   : > { %3632 = vmatpush1.bf16.msra.mxu0 %v3631_v10  ;;  %v578_v10 = vld [vmem:[%s4939_s20 + $0xa40] sm:$0xff] }
  0xdc   : > { %3696 = vmatpush1.bf16.msra.mxu1 %v3695_v11  ;;  %3698 = vmatprep.subr.bf16.mxu0 %v3697_v12  ;;  %v610_v11 = vld [vmem:[%s4939_s20 + $0xb40] sm:$0xff]  ;;  %v580_v12 = vld [vmem:[%s4939_s20 + $0xa50] sm:$0xff] }
  0xdd   : > { %3762 = vmatprep.subr.bf16.mxu1 %v3761_v17  ;;  %v675_v17 = vld [vmem:[%s4939_s20 + $0xd48] sm:$0xff]  ;;  %v3719_v21 = vpack.c.bf16 %v610_v11, %v578_v10  ;;  %v3783_v22 = vpack.c.bf16 %v612_v14, %v580_v12  ;;  %v3801_v10 = vpack.c.bf16 %v933_v3, %v901_v2  ;;  %v932_v11 = vld [vmem:[%s4939_s20 + $0x1550] sm:$0xff]  ;;  %v965_v14 = vld [vmem:[%s4939_s20 + $0x1658] sm:$0xff] }
  0xde   : > { %1492 = vmatmul.mubr.f32.vlgmr.msra.gmra.mrb[2].mxu0 %v5043_v16  ;;  %v3721_v23 = vpack.c.bf16 %v675_v17, %v643_v15  ;;  %v963_v12 = vld [vmem:[%s4939_s20 + $0x1648] sm:$0xff]  ;;  %v997_v15 = vld [vmem:[%s4939_s20 + $0x1758] sm:$0xff] }
  0xdf   : > { %1563 = vmatmul.mubr.f32.vlgmr.msra.gmra.mrb[2].mxu1 %v5043_v16  ;;  %3700 = vmatpush1.bf16.msra.mxu0 %v3699_v24  ;;  %v453_v16 = vld [vmem:[%s4939_s20 + $0x658] sm:$0xff]  ;;  %v642_v24 = vld [vmem:[%s4939_s20 + $0xc40] sm:$0xff] }
  0xe0   : > { %3764 = vmatpush1.bf16.msra.mxu1 %v3763_v25  ;;  %3702 = vmatprep.subr.bf16.mxu0 %v3701_v26  ;;  %v3773_v53 = vpack.c.bf16 %v485_v46, %v453_v16  ;;  %v674_v25 = vld [vmem:[%s4939_s20 + $0xd40] sm:$0xff]  ;;  %v644_v26 = vld [vmem:[%s4939_s20 + $0xc50] sm:$0xff] }
  0xe1   : > { %3766 = vmatprep.subr.bf16.mxu1 %v3765_v30  ;;  %1633 = vmatprep.mubr.f32.mxu0 %v5049_v19  ;;  %v739_v30 = vld [vmem:[%s4939_s20 + $0xf48] sm:$0xff]  ;;  %v3723_v33 = vpack.c.bf16 %v674_v25, %v642_v24  ;;  %v3787_v34 = vpack.c.bf16 %v676_v28, %v644_v26  ;;  %v3805_v24 = vpack.c.bf16 %v997_v15, %v965_v14  ;;  %v996_v25 = vld [vmem:[%s4939_s20 + $0x1750] sm:$0xff]  ;;  %v1029_v28 = vld [vmem:[%s4939_s20 + $0x1858] sm:$0xff] }
  0xe2   : > { %1704 = vmatprep.mubr.f32.mxu1 %v5049_v19  ;;  %v3725_v35 = vpack.c.bf16 %v739_v30, %v707_v29  ;;  %v1027_v26 = vld [vmem:[%s4939_s20 + $0x1848] sm:$0xff]  ;;  %v1061_v29 = vld [vmem:[%s4939_s20 + $0x1958] sm:$0xff] }
  0xe3   : > { %3704 = vmatpush1.bf16.msra.mxu0 %v3703_v36  ;;  %v706_v36 = vld [vmem:[%s4939_s20 + $0xe40] sm:$0xff] }
  0xe4   : > { %3768 = vmatpush1.bf16.msra.mxu1 %v3767_v37  ;;  %3706 = vmatprep.subr.bf16.mxu0 %v3705_v38  ;;  %v738_v37 = vld [vmem:[%s4939_s20 + $0xf40] sm:$0xff]  ;;  %v708_v38 = vld [vmem:[%s4939_s20 + $0xe50] sm:$0xff] }
  0xe5   : > { %3770 = vmatprep.subr.bf16.mxu1 %v3769_v42  ;;  %v803_v42 = vld [vmem:[%s4939_s20 + $0x1148] sm:$0xff]  ;;  %v3727_v45 = vpack.c.bf16 %v738_v37, %v706_v36  ;;  %v3791_v16 = vpack.c.bf16 %v740_v40, %v708_v38  ;;  %v3809_v36 = vpack.c.bf16 %v1061_v29, %v1029_v28  ;;  %v1060_v37 = vld [vmem:[%s4939_s20 + $0x1950] sm:$0xff]  ;;  %v1093_v40 = vld [vmem:[%s4939_s20 + $0x1a58] sm:$0xff] }
  0xe6   : > { %v3729_v46 = vpack.c.bf16 %v803_v42, %v771_v41  ;;  %v1091_v38 = vld [vmem:[%s4939_s20 + $0x1a48] sm:$0xff]  ;;  %v1125_v41 = vld [vmem:[%s4939_s20 + $0x1b58] sm:$0xff] }
  0xe7   : > { %3708 = vmatpush1.bf16.msra.mxu0 %v3707_v47  ;;  %v770_v47 = vld [vmem:[%s4939_s20 + $0x1040] sm:$0xff] }
  0xe8   : > { %3772 = vmatpush1.bf16.msra.mxu1 %v3771_v48  ;;  %3710 = vmatprep.subr.bf16.mxu0 %v3709_v49  ;;  %v802_v48 = vld [vmem:[%s4939_s20 + $0x1140] sm:$0xff]  ;;  %v772_v49 = vld [vmem:[%s4939_s20 + $0x1050] sm:$0xff] }
  0xe9   : > { %3774 = vmatprep.subr.bf16.mxu1 %v3773_v53  ;;  %v867_v53 = vld [vmem:[%s4939_s20 + $0x1348] sm:$0xff]  ;;  %v3731_v56 = vpack.c.bf16 %v802_v48, %v770_v47  ;;  %v3795_v57 = vpack.c.bf16 %v804_v51, %v772_v49  ;;  %v3813_v47 = vpack.c.bf16 %v1125_v41, %v1093_v40  ;;  %v1124_v48 = vld [vmem:[%s4939_s20 + $0x1b50] sm:$0xff]  ;;  %v1157_v51 = vld [vmem:[%s4939_s20 + $0x1c58] sm:$0xff] }
  0xea   : > { %v3733_v58 = vpack.c.bf16 %v867_v53, %v835_v52  ;;  %v1155_v49 = vld [vmem:[%s4939_s20 + $0x1c48] sm:$0xff]  ;;  %v1189_v52 = vld [vmem:[%s4939_s20 + $0x1d58] sm:$0xff] }
  0xeb   : > { %3712 = vmatpush1.bf16.msra.mxu0 %v3711_v59  ;;  %v834_v59 = vld [vmem:[%s4939_s20 + $0x1240] sm:$0xff] }
  0xec   : > { %3776 = vmatpush1.bf16.msra.mxu1 %v3775_v60  ;;  %3714 = vmatprep.subr.bf16.mxu0 %v3713_v61  ;;  %v866_v60 = vld [vmem:[%s4939_s20 + $0x1340] sm:$0xff]  ;;  %v836_v61 = vld [vmem:[%s4939_s20 + $0x1250] sm:$0xff] }
  0xed   : > { %3778 = vmatprep.subr.bf16.mxu1 %v3777_v1  ;;  %v931_v1 = vld [vmem:[%s4939_s20 + $0x1548] sm:$0xff]  ;;  %v3735_v4 = vpack.c.bf16 %v866_v60, %v834_v59  ;;  %v3799_v5 = vpack.c.bf16 %v868_v63, %v836_v61  ;;  %v3817_v59 = vpack.c.bf16 %v1189_v52, %v1157_v51  ;;  %v1188_v60 = vld [vmem:[%s4939_s20 + $0x1d50] sm:$0xff]  ;;  %v1221_v63 = vld [vmem:[%s4939_s20 + $0x1e58] sm:$0xff] }
  0xee   : > { %v3737_v6 = vpack.c.bf16 %v931_v1, %v899_v0  ;;  %v1219_v61 = vld [vmem:[%s4939_s20 + $0x1e48] sm:$0xff]  ;;  %v1253_v0 = vld [vmem:[%s4939_s20 + $0x1f58] sm:$0xff] }
  0xef   : > { %3716 = vmatpush1.bf16.msra.mxu0 %v3715_v7  ;;  %v898_v7 = vld [vmem:[%s4939_s20 + $0x1440] sm:$0xff] }
  0xf0   : > { %3780 = vmatpush1.bf16.msra.mxu1 %v3779_v8  ;;  %3718 = vmatprep.subr.bf16.mxu0 %v3717_v9  ;;  %v930_v8 = vld [vmem:[%s4939_s20 + $0x1540] sm:$0xff]  ;;  %v900_v9 = vld [vmem:[%s4939_s20 + $0x1450] sm:$0xff] }
  0xf1   : > { %3782 = vmatprep.subr.bf16.mxu1 %v3781_v13  ;;  %v995_v13 = vld [vmem:[%s4939_s20 + $0x1748] sm:$0xff]  ;;  %v3739_v17 = vpack.c.bf16 %v930_v8, %v898_v7  ;;  %v3803_v18 = vpack.c.bf16 %v932_v11, %v900_v9  ;;  %v3821_v7 = vpack.c.bf16 %v1253_v0, %v1221_v63  ;;  %v1252_v8 = vld [vmem:[%s4939_s20 + $0x1f50] sm:$0xff]  ;;  %v265_v11 = vld [vmem:[%s4939_s20 + $0x78] sm:$0xff] }
  0xf2   : > { %v3741_v20 = vpack.c.bf16 %v995_v13, %v963_v12  ;;  %v263_v9 = vld [vmem:[%s4939_s20 + $0x68] sm:$0xff]  ;;  %v297_v12 = vld [vmem:[%s4939_s20 + $0x178] sm:$0xff] }
  0xf3   : > { %3720 = vmatpush1.bf16.msra.mxu0 %v3719_v21  ;;  %v962_v21 = vld [vmem:[%s4939_s20 + $0x1640] sm:$0xff] }
  0xf4   : > { %3784 = vmatpush1.bf16.msra.mxu1 %v3783_v22  ;;  %3722 = vmatprep.subr.bf16.mxu0 %v3721_v23  ;;  %v994_v22 = vld [vmem:[%s4939_s20 + $0x1740] sm:$0xff]  ;;  %v964_v23 = vld [vmem:[%s4939_s20 + $0x1650] sm:$0xff] }
  0xf5   : > { %3786 = vmatprep.subr.bf16.mxu1 %v3785_v27  ;;  %v1059_v27 = vld [vmem:[%s4939_s20 + $0x1948] sm:$0xff]  ;;  %v3743_v30 = vpack.c.bf16 %v994_v22, %v962_v21  ;;  %v3807_v31 = vpack.c.bf16 %v996_v25, %v964_v23  ;;  %v3889_v21 = vpack.c.bf16 %v297_v12, %v265_v11  ;;  %v296_v22 = vld [vmem:[%s4939_s20 + $0x170] sm:$0xff]  ;;  %v329_v25 = vld [vmem:[%s4939_s20 + $0x278] sm:$0xff] }
  0xf6   : > { %v3745_v32 = vpack.c.bf16 %v1059_v27, %v1027_v26  ;;  %v327_v23 = vld [vmem:[%s4939_s20 + $0x268] sm:$0xff]  ;;  %v361_v26 = vld [vmem:[%s4939_s20 + $0x378] sm:$0xff] }
  0xf7   : > { %3724 = vmatpush1.bf16.msra.mxu0 %v3723_v33  ;;  %v1026_v33 = vld [vmem:[%s4939_s20 + $0x1840] sm:$0xff] }
  0xf8   : > { %3788 = vmatpush1.bf16.msra.mxu1 %v3787_v34  ;;  %3726 = vmatprep.subr.bf16.mxu0 %v3725_v35  ;;  %v1058_v34 = vld [vmem:[%s4939_s20 + $0x1940] sm:$0xff]  ;;  %v1028_v35 = vld [vmem:[%s4939_s20 + $0x1850] sm:$0xff] }
  0xf9   : > { %3790 = vmatprep.subr.bf16.mxu1 %v3789_v39  ;;  %v1123_v39 = vld [vmem:[%s4939_s20 + $0x1b48] sm:$0xff]  ;;  %v3747_v42 = vpack.c.bf16 %v1058_v34, %v1026_v33  ;;  %v3811_v43 = vpack.c.bf16 %v1060_v37, %v1028_v35  ;;  %v3893_v33 = vpack.c.bf16 %v361_v26, %v329_v25  ;;  %v360_v34 = vld [vmem:[%s4939_s20 + $0x370] sm:$0xff]  ;;  %v5363_v37 = vld.sshfl [vmem:[#allocation3] sm:$0x33 pattern:$0x76325410] }
  0xfa   : > { %v3749_v44 = vpack.c.bf16 %v1123_v39, %v1091_v38  ;;  %v391_v35 = vld [vmem:[%s4939_s20 + $0x468] sm:$0xff]  ;;  %v393_v38 = vld [vmem:[%s4939_s20 + $0x478] sm:$0xff] }
  0xfb   : > { %3728 = vmatpush1.bf16.msra.mxu0 %v3727_v45  ;;  %v1090_v45 = vld [vmem:[%s4939_s20 + $0x1a40] sm:$0xff]  ;;  %v425_v39 = vld [vmem:[%s4939_s20 + $0x578] sm:$0xff] }
  0xfc   : > { %3792 = vmatpush1.bf16.msra.mxu1 %v3791_v16  ;;  %3730 = vmatprep.subr.bf16.mxu0 %v3729_v46  ;;  %v1122_v16 = vld [vmem:[%s4939_s20 + $0x1b40] sm:$0xff]  ;;  %v1092_v46 = vld [vmem:[%s4939_s20 + $0x1a50] sm:$0xff] }
  0xfd   : > { %3794 = vmatprep.subr.bf16.mxu1 %v3793_v50  ;;  %v1187_v50 = vld [vmem:[%s4939_s20 + $0x1d48] sm:$0xff]  ;;  %v3751_v53 = vpack.c.bf16 %v1122_v16, %v1090_v45  ;;  %v3815_v54 = vpack.c.bf16 %v1124_v48, %v1092_v46  ;;  %v392_v45 = vld [vmem:[%s4939_s20 + $0x470] sm:$0xff]  ;;  %v3897_v16 = vpack.c.bf16 %v425_v39, %v393_v38 }
  0xfe   : > { %v3753_v55 = vpack.c.bf16 %v1187_v50, %v1155_v49  ;;  %v424_v46 = vld [vmem:[%s4939_s20 + $0x570] sm:$0xff]  ;;  %v487_v48 = vld [vmem:[%s4939_s20 + $0x768] sm:$0xff]  ;;  %v457_v49 = vld [vmem:[%s4939_s20 + $0x678] sm:$0xff] }
  0xff   : > { %3732 = vmatpush1.bf16.msra.mxu0 %v3731_v56  ;;  %v1154_v56 = vld [vmem:[%s4939_s20 + $0x1c40] sm:$0xff]  ;;  %v489_v50 = vld [vmem:[%s4939_s20 + $0x778] sm:$0xff]  ;;  %v3899_v52 = vpack.c.bf16 %v424_v46, %v392_v45  ;;  %v744_v45 = vld [vmem:[%s4939_s20 + $0xf70] sm:$0xff] }
 0x100   : > { %3796 = vmatpush1.bf16.msra.mxu1 %v3795_v57  ;;  %3734 = vmatprep.subr.bf16.mxu0 %v3733_v58  ;;  %v1186_v57 = vld [vmem:[%s4939_s20 + $0x1d40] sm:$0xff]  ;;  %v1156_v58 = vld [vmem:[%s4939_s20 + $0x1c50] sm:$0xff]  ;;  %v807_v46 = vld [vmem:[%s4939_s20 + $0x1168] sm:$0xff] }
 0x101   : > { %3798 = vmatprep.subr.bf16.mxu1 %v3797_v62  ;;  %v1251_v62 = vld [vmem:[%s4939_s20 + $0x1f48] sm:$0xff]  ;;  %v3755_v1 = vpack.c.bf16 %v1186_v57, %v1154_v56  ;;  %v3819_v2 = vpack.c.bf16 %v1188_v60, %v1156_v58  ;;  %v456_v56 = vld [vmem:[%s4939_s20 + $0x670] sm:$0xff]  ;;  %v3901_v57 = vpack.c.bf16 %v489_v50, %v457_v49 }
 0x102   : > { %v3757_v3 = vpack.c.bf16 %v1251_v62, %v1219_v61  ;;  %v488_v58 = vld [vmem:[%s4939_s20 + $0x770] sm:$0xff]  ;;  %v551_v60 = vld [vmem:[%s4939_s20 + $0x968] sm:$0xff]  ;;  %v521_v61 = vld [vmem:[%s4939_s20 + $0x878] sm:$0xff] }
 0x103   : > { %3736 = vmatpush1.bf16.msra.mxu0 %v3735_v4  ;;  %v1218_v4 = vld [vmem:[%s4939_s20 + $0x1e40] sm:$0xff]  ;;  %v553_v62 = vld [vmem:[%s4939_s20 + $0x978] sm:$0xff]  ;;  %v3903_v0 = vpack.c.bf16 %v488_v58, %v456_v56  ;;  %v808_v56 = vld [vmem:[%s4939_s20 + $0x1170] sm:$0xff] }
 0x104   : > { %3800 = vmatpush1.bf16.msra.mxu1 %v3799_v5  ;;  %3738 = vmatprep.subr.bf16.mxu0 %v3737_v6  ;;  %v1250_v5 = vld [vmem:[%s4939_s20 + $0x1f40] sm:$0xff]  ;;  %v1220_v6 = vld [vmem:[%s4939_s20 + $0x1e50] sm:$0xff]  ;;  %v871_v58 = vld [vmem:[%s4939_s20 + $0x1368] sm:$0xff] }
 0x105   : > { %3802 = vmatprep.subr.bf16.mxu1 %v3801_v10  ;;  %v295_v10 = vld [vmem:[%s4939_s20 + $0x168] sm:$0xff]  ;;  %v3759_v13 = vpack.c.bf16 %v1250_v5, %v1218_v4  ;;  %v3823_v14 = vpack.c.bf16 %v1252_v8, %v1220_v6  ;;  %v520_v4 = vld [vmem:[%s4939_s20 + $0x870] sm:$0xff]  ;;  %v3905_v5 = vpack.c.bf16 %v553_v62, %v521_v61 }
 0x106   : > { %v3825_v15 = vpack.c.bf16 %v295_v10, %v263_v9  ;;  %v552_v6 = vld [vmem:[%s4939_s20 + $0x970] sm:$0xff]  ;;  %v615_v8 = vld [vmem:[%s4939_s20 + $0xb68] sm:$0xff]  ;;  %v585_v9 = vld [vmem:[%s4939_s20 + $0xa78] sm:$0xff] }
 0x107   : > { %3740 = vmatpush1.bf16.msra.mxu0 %v3739_v17  ;;  %v262_v17 = vld [vmem:[%s4939_s20 + $0x60] sm:$0xff]  ;;  %v617_v10 = vld [vmem:[%s4939_s20 + $0xb78] sm:$0xff]  ;;  %v3907_v12 = vpack.c.bf16 %v552_v6, %v520_v4  ;;  %v872_v4 = vld [vmem:[%s4939_s20 + $0x1370] sm:$0xff] }
 0x108   : > { %3804 = vmatpush1.bf16.msra.mxu1 %v3803_v18  ;;  %3742 = vmatprep.subr.bf16.mxu0 %v3741_v20  ;;  %v294_v18 = vld [vmem:[%s4939_s20 + $0x160] sm:$0xff]  ;;  %v264_v20 = vld [vmem:[%s4939_s20 + $0x70] sm:$0xff]  ;;  %v935_v6 = vld [vmem:[%s4939_s20 + $0x1568] sm:$0xff] }
 0x109   : > { %3806 = vmatprep.subr.bf16.mxu1 %v3805_v24  ;;  %v359_v24 = vld [vmem:[%s4939_s20 + $0x368] sm:$0xff]  ;;  %v3827_v27 = vpack.c.bf16 %v294_v18, %v262_v17  ;;  %v3891_v28 = vpack.c.bf16 %v296_v22, %v264_v20  ;;  %v584_v17 = vld [vmem:[%s4939_s20 + $0xa70] sm:$0xff]  ;;  %v3909_v18 = vpack.c.bf16 %v617_v10, %v585_v9 }
 0x10a   : > { %v3829_v29 = vpack.c.bf16 %v359_v24, %v327_v23  ;;  %v616_v20 = vld [vmem:[%s4939_s20 + $0xb70] sm:$0xff]  ;;  %v679_v22 = vld [vmem:[%s4939_s20 + $0xd68] sm:$0xff]  ;;  %v649_v23 = vld [vmem:[%s4939_s20 + $0xc78] sm:$0xff] }
 0x10b   : > { %3744 = vmatpush1.bf16.msra.mxu0 %v3743_v30  ;;  %v326_v30 = vld [vmem:[%s4939_s20 + $0x260] sm:$0xff]  ;;  %v681_v24 = vld [vmem:[%s4939_s20 + $0xd78] sm:$0xff]  ;;  %v3911_v26 = vpack.c.bf16 %v616_v20, %v584_v17  ;;  %v936_v17 = vld [vmem:[%s4939_s20 + $0x1570] sm:$0xff] }
 0x10c   : > { %3808 = vmatpush1.bf16.msra.mxu1 %v3807_v31  ;;  %3746 = vmatprep.subr.bf16.mxu0 %v3745_v32  ;;  %v358_v31 = vld [vmem:[%s4939_s20 + $0x360] sm:$0xff]  ;;  %v328_v32 = vld [vmem:[%s4939_s20 + $0x270] sm:$0xff]  ;;  %v999_v20 = vld [vmem:[%s4939_s20 + $0x1768] sm:$0xff] }
 0x10d   : > { %3810 = vmatprep.subr.bf16.mxu1 %v3809_v36  ;;  %v423_v36 = vld [vmem:[%s4939_s20 + $0x568] sm:$0xff]  ;;  %v3831_v40 = vpack.c.bf16 %v358_v31, %v326_v30  ;;  %v3895_v41 = vpack.c.bf16 %v360_v34, %v328_v32  ;;  %v648_v30 = vld [vmem:[%s4939_s20 + $0xc70] sm:$0xff]  ;;  %v3913_v31 = vpack.c.bf16 %v681_v24, %v649_v23  ;;  %v1001_v23 = vld [vmem:[%s4939_s20 + $0x1778] sm:$0xff] }
 0x10e   : > { %v680_v32 = vld [vmem:[%s4939_s20 + $0xd70] sm:$0xff]  ;;  %v743_v34 = vld [vmem:[%s4939_s20 + $0xf68] sm:$0xff] }
 0x10f   : > { %3748 = vmatpush1.bf16.msra.mxu0 %v3747_v42  ;;  %v3833_v42 = vpack.c.bf16 %v423_v36, %v391_v35  ;;  %v713_v35 = vld [vmem:[%s4939_s20 + $0xe78] sm:$0xff]  ;;  %v3915_v39 = vpack.c.bf16 %v680_v32, %v648_v30  ;;  %v1031_v32 = vld [vmem:[%s4939_s20 + $0x1868] sm:$0xff] }
 0x110   : > { %3812 = vmatpush1.bf16.msra.mxu1 %v3811_v43  ;;  %3750 = vmatprep.subr.bf16.mxu0 %v3749_v44  ;;  %v390_v43 = vld [vmem:[%s4939_s20 + $0x460] sm:$0xff]  ;;  %v745_v36 = vld [vmem:[%s4939_s20 + $0xf78] sm:$0xff] }
 0x111   : > { %3814 = vmatprep.subr.bf16.mxu1 %v3813_v47  ;;  %v422_v44 = vld [vmem:[%s4939_s20 + $0x560] sm:$0xff]  ;;  %v455_v47 = vld [vmem:[%s4939_s20 + $0x668] sm:$0xff] }
 0x112   : > { %v3835_v51 = vpack.c.bf16 %v422_v44, %v390_v43  ;;  %v712_v43 = vld [vmem:[%s4939_s20 + $0xe70] sm:$0xff]  ;;  %v3917_v44 = vpack.c.bf16 %v745_v36, %v713_v35  ;;  %v1065_v35 = vld [vmem:[%s4939_s20 + $0x1978] sm:$0xff] }
 0x113   : > { %3752 = vmatpush1.bf16.msra.mxu0 %v3751_v53  ;;  %v3837_v53 = vpack.c.bf16 %v487_v48, %v455_v47  ;;  %v777_v47 = vld [vmem:[%s4939_s20 + $0x1078] sm:$0xff]  ;;  %v3919_v50 = vpack.c.bf16 %v744_v45, %v712_v43  ;;  %v1064_v45 = vld [vmem:[%s4939_s20 + $0x1970] sm:$0xff] }
 0x114   : > { %3816 = vmatpush1.bf16.msra.mxu1 %v3815_v54  ;;  %3754 = vmatprep.subr.bf16.mxu0 %v3753_v55  ;;  %v454_v54 = vld [vmem:[%s4939_s20 + $0x660] sm:$0xff]  ;;  %v809_v48 = vld [vmem:[%s4939_s20 + $0x1178] sm:$0xff] }
 0x115   : > { %3818 = vmatprep.subr.bf16.mxu1 %v3817_v59  ;;  %v486_v55 = vld [vmem:[%s4939_s20 + $0x760] sm:$0xff]  ;;  %v519_v59 = vld [vmem:[%s4939_s20 + $0x868] sm:$0xff] }
 0x116   : > { %v3839_v63 = vpack.c.bf16 %v486_v55, %v454_v54  ;;  %v776_v54 = vld [vmem:[%s4939_s20 + $0x1070] sm:$0xff]  ;;  %v3921_v55 = vpack.c.bf16 %v809_v48, %v777_v47  ;;  %v2960_v43 = vld [vmem:[%s5462_s22] sm:$0xff] }
 0x117   : > { %3756 = vmatpush1.bf16.msra.mxu0 %v3755_v1  ;;  %v3841_v1 = vpack.c.bf16 %v551_v60, %v519_v59  ;;  %v841_v59 = vld [vmem:[%s4939_s20 + $0x1278] sm:$0xff]  ;;  %v3923_v62 = vpack.c.bf16 %v808_v56, %v776_v54  ;;  %v1096_v54 = vld [vmem:[%s4939_s20 + $0x1a70] sm:$0xff] }
 0x118   : > { %3820 = vmatpush1.bf16.msra.mxu1 %v3819_v2  ;;  %3758 = vmatprep.subr.bf16.mxu0 %v3757_v3  ;;  %v518_v2 = vld [vmem:[%s4939_s20 + $0x860] sm:$0xff]  ;;  %v873_v60 = vld [vmem:[%s4939_s20 + $0x1378] sm:$0xff]  ;;  %v1128_v56 = vld [vmem:[%s4939_s20 + $0x1b70] sm:$0xff] }
 0x119   : > { %3822 = vmatprep.subr.bf16.mxu1 %v3821_v7  ;;  %v550_v3 = vld [vmem:[%s4939_s20 + $0x960] sm:$0xff]  ;;  %v583_v7 = vld [vmem:[%s4939_s20 + $0xa68] sm:$0xff]  ;;  %v1097_v47 = vld [vmem:[%s4939_s20 + $0x1a78] sm:$0xff] }
 0x11a   : > { %v3843_v11 = vpack.c.bf16 %v550_v3, %v518_v2  ;;  %v840_v2 = vld [vmem:[%s4939_s20 + $0x1270] sm:$0xff]  ;;  %v3925_v3 = vpack.c.bf16 %v873_v60, %v841_v59  ;;  %v1129_v48 = vld [vmem:[%s4939_s20 + $0x1b78] sm:$0xff] }
 0x11b   : > { %3760 = vmatpush1.bf16.msra.mxu0 %v3759_v13  ;;  %v3845_v13 = vpack.c.bf16 %v615_v8, %v583_v7  ;;  %v905_v7 = vld [vmem:[%s4939_s20 + $0x1478] sm:$0xff]  ;;  %v3927_v10 = vpack.c.bf16 %v872_v4, %v840_v2  ;;  %v1160_v2 = vld [vmem:[%s4939_s20 + $0x1c70] sm:$0xff] }
 0x11c   : > { %3824 = vmatpush1.bf16.msra.mxu1 %v3823_v14  ;;  %3826 = vmatprep.subr.bf16.mxu0 %v3825_v15  ;;  %v582_v14 = vld [vmem:[%s4939_s20 + $0xa60] sm:$0xff]  ;;  %v937_v8 = vld [vmem:[%s4939_s20 + $0x1578] sm:$0xff]  ;;  %v1192_v4 = vld [vmem:[%s4939_s20 + $0x1d70] sm:$0xff] }
 0x11d   : > { %3890 = vmatprep.subr.bf16.mxu1 %v3889_v21  ;;  %v614_v15 = vld [vmem:[%s4939_s20 + $0xb60] sm:$0xff]  ;;  %v647_v21 = vld [vmem:[%s4939_s20 + $0xc68] sm:$0xff]  ;;  %v1161_v59 = vld [vmem:[%s4939_s20 + $0x1c78] sm:$0xff] }
 0x11e   : > { %1634 = vmatmul.mubr.f32.vlgmr.msra.gmra.mrb[4].mxu0 %v5363_v37  ;;  %v3847_v25 = vpack.c.bf16 %v614_v15, %v582_v14  ;;  %v904_v14 = vld [vmem:[%s4939_s20 + $0x1470] sm:$0xff]  ;;  %v3929_v15 = vpack.c.bf16 %v937_v8, %v905_v7  ;;  %v1193_v60 = vld [vmem:[%s4939_s20 + $0x1d78] sm:$0xff] }
 0x11f   : > { %1705 = vmatmul.mubr.f32.vlgmr.msra.gmra.mrb[4].mxu1 %v5363_v37  ;;  %3828 = vmatpush1.bf16.msra.mxu0 %v3827_v27  ;;  %v3849_v27 = vpack.c.bf16 %v679_v22, %v647_v21  ;;  %v4744_v21 = vmov 0   ;;  %v969_v22 = vld [vmem:[%s4939_s20 + $0x1678] sm:$0xff] }
 0x120   : > { %3892 = vmatpush1.bf16.msra.mxu1 %v3891_v28  ;;  %3830 = vmatprep.subr.bf16.mxu0 %v3829_v29  ;;  %v646_v28 = vld [vmem:[%s4939_s20 + $0xc60] sm:$0xff]  ;;  %v3933_v30 = vpack.c.bf16 %v1001_v23, %v969_v22  ;;  %v1225_v7 = vld [vmem:[%s4939_s20 + $0x1e78] sm:$0xff] }
 0x121   : > { %3894 = vmatprep.subr.bf16.mxu1 %v3893_v33  ;;  %1775 = vmatprep.mubr.f32.mxu0 %v5049_v19  ;;  %v678_v29 = vld [vmem:[%s4939_s20 + $0xd60] sm:$0xff]  ;;  %v711_v33 = vld [vmem:[%s4939_s20 + $0xe68] sm:$0xff]  ;;  %v1257_v8 = vld [vmem:[%s4939_s20 + $0x1f78] sm:$0xff] }
 0x122   : > { %1846 = vmatprep.mubr.f32.mxu1 %v5049_v19  ;;  %v3851_v38 = vpack.c.bf16 %v678_v29, %v646_v28  ;;  %4560 = vset.pattern.permute.xlu0 %v4744_v21  ;;  %v998_v28 = vld [vmem:[%s4939_s20 + $0x1760] sm:$0xff]  ;;  %v968_v29 = vld [vmem:[%s4939_s20 + $0x1670] sm:$0xff]  ;;  %v269_v21 = vld [vmem:[%s4939_s20 + $0x98] sm:$0xff] }
 0x123   : > { %3832 = vmatpush1.bf16.msra.mxu0 %v3831_v40  ;;  %v3853_v40 = vpack.c.bf16 %v743_v34, %v711_v33  ;;  %v1063_v33 = vld [vmem:[%s4939_s20 + $0x1968] sm:$0xff]  ;;  %v1033_v34 = vld [vmem:[%s4939_s20 + $0x1878] sm:$0xff]  ;;  %2964 = vperm.xlu0 %4560, %v2960_v43   ;;  %v364_v43 = vld [vmem:[%s4939_s20 + $0x390] sm:$0xff] }
 0x124   : > { %3896 = vmatpush1.bf16.msra.mxu1 %v3895_v41  ;;  %3834 = vmatprep.subr.bf16.mxu0 %v3833_v42  ;;  %v710_v41 = vld [vmem:[%s4939_s20 + $0xe60] sm:$0xff]  ;;  %v301_v22 = vld [vmem:[%s4939_s20 + $0x198] sm:$0xff] }
 0x125   : > { %3898 = vmatprep.subr.bf16.mxu1 %v3897_v16  ;;  %v742_v42 = vld [vmem:[%s4939_s20 + $0xf60] sm:$0xff]  ;;  %v775_v16 = vld [vmem:[%s4939_s20 + $0x1068] sm:$0xff] }
 0x126   : > { %v3855_v49 = vpack.c.bf16 %v742_v42, %v710_v41  ;;  %v1062_v41 = vld [vmem:[%s4939_s20 + $0x1960] sm:$0xff]  ;;  %v1032_v42 = vld [vmem:[%s4939_s20 + $0x1870] sm:$0xff] }
 0x127   : > { %3836 = vmatpush1.bf16.msra.mxu0 %v3835_v51  ;;  %v3857_v51 = vpack.c.bf16 %v807_v46, %v775_v16  ;;  %v1095_v16 = vld [vmem:[%s4939_s20 + $0x1a68] sm:$0xff] }
 0x128   : > { %3900 = vmatpush1.bf16.msra.mxu1 %v3899_v52  ;;  %3838 = vmatprep.subr.bf16.mxu0 %v3837_v53  ;;  %v774_v52 = vld [vmem:[%s4939_s20 + $0x1060] sm:$0xff]  ;;  %v1127_v46 = vld [vmem:[%s4939_s20 + $0x1b68] sm:$0xff] }
 0x129   : > { %3902 = vmatprep.subr.bf16.mxu1 %v3901_v57  ;;  %v806_v53 = vld [vmem:[%s4939_s20 + $0x1160] sm:$0xff]  ;;  %v839_v57 = vld [vmem:[%s4939_s20 + $0x1268] sm:$0xff] }
 0x12a   : > { %v3859_v61 = vpack.c.bf16 %v806_v53, %v774_v52  ;;  %v1094_v52 = vld [vmem:[%s4939_s20 + $0x1a60] sm:$0xff] }
 0x12b   : > { %3840 = vmatpush1.bf16.msra.mxu0 %v3839_v63  ;;  %v3861_v63 = vpack.c.bf16 %v871_v58, %v839_v57  ;;  %v1126_v53 = vld [vmem:[%s4939_s20 + $0x1b60] sm:$0xff]  ;;  %v1159_v57 = vld [vmem:[%s4939_s20 + $0x1c68] sm:$0xff] }
 0x12c   : > { %3904 = vmatpush1.bf16.msra.mxu1 %v3903_v0  ;;  %3842 = vmatprep.subr.bf16.mxu0 %v3841_v1  ;;  %v838_v0 = vld [vmem:[%s4939_s20 + $0x1260] sm:$0xff]  ;;  %v1191_v58 = vld [vmem:[%s4939_s20 + $0x1d68] sm:$0xff] }
 0x12d   : > { %3906 = vmatprep.subr.bf16.mxu1 %v3905_v5  ;;  %v870_v1 = vld [vmem:[%s4939_s20 + $0x1360] sm:$0xff]  ;;  %v903_v5 = vld [vmem:[%s4939_s20 + $0x1468] sm:$0xff] }
 0x12e   : > { %v3863_v9 = vpack.c.bf16 %v870_v1, %v838_v0  ;;  %v1158_v0 = vld [vmem:[%s4939_s20 + $0x1c60] sm:$0xff] }
 0x12f   : > { %3844 = vmatpush1.bf16.msra.mxu0 %v3843_v11  ;;  %v3865_v11 = vpack.c.bf16 %v935_v6, %v903_v5  ;;  %v1190_v1 = vld [vmem:[%s4939_s20 + $0x1d60] sm:$0xff]  ;;  %v1223_v5 = vld [vmem:[%s4939_s20 + $0x1e68] sm:$0xff] }
 0x130   : > { %3908 = vmatpush1.bf16.msra.mxu1 %v3907_v12  ;;  %3846 = vmatprep.subr.bf16.mxu0 %v3845_v13  ;;  %v902_v12 = vld [vmem:[%s4939_s20 + $0x1460] sm:$0xff]  ;;  %v1255_v6 = vld [vmem:[%s4939_s20 + $0x1f68] sm:$0xff] }
 0x131   : > { %3910 = vmatprep.subr.bf16.mxu1 %v3909_v18  ;;  %v934_v13 = vld [vmem:[%s4939_s20 + $0x1560] sm:$0xff]  ;;  %v967_v18 = vld [vmem:[%s4939_s20 + $0x1668] sm:$0xff] }
 0x132   : > { %v3867_v24 = vpack.c.bf16 %v934_v13, %v902_v12  ;;  %v1222_v12 = vld [vmem:[%s4939_s20 + $0x1e60] sm:$0xff] }
 0x133   : > { %3848 = vmatpush1.bf16.msra.mxu0 %v3847_v25  ;;  %v3931_v25 = vpack.c.bf16 %v936_v17, %v904_v14  ;;  %v1254_v13 = vld [vmem:[%s4939_s20 + $0x1f60] sm:$0xff]  ;;  %v1224_v14 = vld [vmem:[%s4939_s20 + $0x1e70] sm:$0xff] }
 0x134   : > { %3912 = vmatpush1.bf16.msra.mxu1 %v3911_v26  ;;  %3850 = vmatprep.subr.bf16.mxu0 %v3849_v27  ;;  %v3869_v26 = vpack.c.bf16 %v999_v20, %v967_v18  ;;  %v966_v27 = vld [vmem:[%s4939_s20 + $0x1660] sm:$0xff]  ;;  %v1256_v17 = vld [vmem:[%s4939_s20 + $0x1f70] sm:$0xff]  ;;  %v267_v18 = vld [vmem:[%s4939_s20 + $0x88] sm:$0xff]  ;;  %v3887_v23 = vpack.c.bf16 %v1254_v13, %v1222_v12 }
 0x135   : > { %3914 = vmatprep.subr.bf16.mxu1 %v3913_v31  ;;  %v1000_v31 = vld [vmem:[%s4939_s20 + $0x1770] sm:$0xff]  ;;  %v3871_v36 = vpack.c.bf16 %v998_v28, %v966_v27  ;;  %v299_v20 = vld [vmem:[%s4939_s20 + $0x188] sm:$0xff]  ;;  %v298_v27 = vld [vmem:[%s4939_s20 + $0x180] sm:$0xff] }
 0x136   : > { %v268_v28 = vld [vmem:[%s4939_s20 + $0x90] sm:$0xff] }
 0x137   : > { %3852 = vmatpush1.bf16.msra.mxu0 %v3851_v38  ;;  %v1030_v38 = vld [vmem:[%s4939_s20 + $0x1860] sm:$0xff]  ;;  %v556_v13 = vld [vmem:[%s4939_s20 + $0x990] sm:$0xff] }
 0x138   : > { %3916 = vmatpush1.bf16.msra.mxu1 %v3915_v39  ;;  %3854 = vmatprep.subr.bf16.mxu0 %v3853_v40  ;;  %v3935_v39 = vpack.c.bf16 %v1000_v31, %v968_v29  ;;  %v3873_v40 = vpack.c.bf16 %v1063_v33, %v1031_v32  ;;  %v4017_v29 = vpack.c.bf16 %v301_v22, %v269_v21  ;;  %v331_v31 = vld [vmem:[%s4939_s20 + $0x288] sm:$0xff]  ;;  %v333_v33 = vld [vmem:[%s4939_s20 + $0x298] sm:$0xff] }
 0x139   : > { %3918 = vmatprep.subr.bf16.mxu1 %v3917_v44  ;;  %v3937_v44 = vpack.c.bf16 %v1065_v35, %v1033_v34  ;;  %v363_v32 = vld [vmem:[%s4939_s20 + $0x388] sm:$0xff]  ;;  %v365_v34 = vld [vmem:[%s4939_s20 + $0x398] sm:$0xff] }
 0x13a   : > { %v589_v21 = vld [vmem:[%s4939_s20 + $0xa98] sm:$0xff] }
 0x13b   : > { %3856 = vmatpush1.bf16.msra.mxu0 %v3855_v49  ;;  %v3875_v49 = vpack.c.bf16 %v1062_v41, %v1030_v38  ;;  %v3957_v38 = vpack.c.bf16 %v363_v32, %v331_v31  ;;  %v332_v41 = vld [vmem:[%s4939_s20 + $0x290] sm:$0xff]  ;;  %v621_v22 = vld [vmem:[%s4939_s20 + $0xb98] sm:$0xff] }
 0x13c   : > { %3920 = vmatpush1.bf16.msra.mxu1 %v3919_v50  ;;  %3858 = vmatprep.subr.bf16.mxu0 %v3857_v51  ;;  %v3939_v50 = vpack.c.bf16 %v1064_v45, %v1032_v42  ;;  %v3877_v51 = vpack.c.bf16 %v1127_v46, %v1095_v16  ;;  %v4021_v42 = vpack.c.bf16 %v365_v34, %v333_v33  ;;  %v427_v45 = vld [vmem:[%s4939_s20 + $0x588] sm:$0xff]  ;;  %v397_v16 = vld [vmem:[%s4939_s20 + $0x498] sm:$0xff]  ;;  %v620_v32 = vld [vmem:[%s4939_s20 + $0xb90] sm:$0xff] }
 0x13d   : > { %3922 = vmatprep.subr.bf16.mxu1 %v3921_v55  ;;  %v3941_v55 = vpack.c.bf16 %v1129_v48, %v1097_v47  ;;  %v429_v46 = vld [vmem:[%s4939_s20 + $0x598] sm:$0xff]  ;;  %v4023_v48 = vpack.c.bf16 %v364_v43, %v332_v41  ;;  %v4037_v31 = vpack.c.bf16 %v621_v22, %v589_v21  ;;  %v651_v33 = vld [vmem:[%s4939_s20 + $0xc88] sm:$0xff]  ;;  %v650_v41 = vld [vmem:[%s4939_s20 + $0xc80] sm:$0xff] }
 0x13e   : > { %v683_v34 = vld [vmem:[%s4939_s20 + $0xd88] sm:$0xff]  ;;  %v652_v43 = vld [vmem:[%s4939_s20 + $0xc90] sm:$0xff] }
 0x13f   : > { %3860 = vmatpush1.bf16.msra.mxu0 %v3859_v61  ;;  %v3879_v61 = vpack.c.bf16 %v1126_v53, %v1094_v52  ;;  %v396_v52 = vld [vmem:[%s4939_s20 + $0x490] sm:$0xff]  ;;  %v4025_v53 = vpack.c.bf16 %v429_v46, %v397_v16  ;;  %v843_v21 = vld [vmem:[%s4939_s20 + $0x1288] sm:$0xff] }
 0x140   : > { %3924 = vmatpush1.bf16.msra.mxu1 %v3923_v62  ;;  %3862 = vmatprep.subr.bf16.mxu0 %v3861_v63  ;;  %v3943_v62 = vpack.c.bf16 %v1128_v56, %v1096_v54  ;;  %v3881_v63 = vpack.c.bf16 %v1191_v58, %v1159_v57  ;;  %v428_v54 = vld [vmem:[%s4939_s20 + $0x590] sm:$0xff]  ;;  %v491_v56 = vld [vmem:[%s4939_s20 + $0x788] sm:$0xff]  ;;  %v493_v57 = vld [vmem:[%s4939_s20 + $0x798] sm:$0xff] }
 0x141   : > { %3926 = vmatprep.subr.bf16.mxu1 %v3925_v3  ;;  %v3945_v3 = vpack.c.bf16 %v1193_v60, %v1161_v59  ;;  %v4027_v59 = vpack.c.bf16 %v428_v54, %v396_v52  ;;  %v684_v46 = vld [vmem:[%s4939_s20 + $0xd90] sm:$0xff]  ;;  %v749_v52 = vld [vmem:[%s4939_s20 + $0xf98] sm:$0xff]  ;;  %v875_v22 = vld [vmem:[%s4939_s20 + $0x1388] sm:$0xff] }
 0x143   : > { %3864 = vmatpush1.bf16.msra.mxu0 %v3863_v9  ;;  %v3883_v9 = vpack.c.bf16 %v1190_v1, %v1158_v0  ;;  %v492_v1 = vld [vmem:[%s4939_s20 + $0x790] sm:$0xff] }
 0x144   : > { %3928 = vmatpush1.bf16.msra.mxu1 %v3927_v10  ;;  %3866 = vmatprep.subr.bf16.mxu0 %v3865_v11  ;;  %v3947_v10 = vpack.c.bf16 %v1192_v4, %v1160_v2  ;;  %v3885_v11 = vpack.c.bf16 %v1255_v6, %v1223_v5  ;;  %v523_v2 = vld [vmem:[%s4939_s20 + $0x888] sm:$0xff]  ;;  %v525_v4 = vld [vmem:[%s4939_s20 + $0x898] sm:$0xff] }
 0x145   : > { %3930 = vmatprep.subr.bf16.mxu1 %v3929_v15  ;;  %v3949_v15 = vpack.c.bf16 %v1257_v8, %v1225_v7  ;;  %v557_v5 = vld [vmem:[%s4939_s20 + $0x998] sm:$0xff] }
 0x146   : > { %v4033_v12 = vpack.c.bf16 %v557_v5, %v525_v4  ;;  %v781_v4 = vld [vmem:[%s4939_s20 + $0x1098] sm:$0xff] }
 0x147   : > { %3868 = vmatpush1.bf16.msra.mxu0 %v3867_v24  ;;  %v3951_v24 = vpack.c.bf16 %v1256_v17, %v1224_v14  ;;  %v4745_v14 = vmov 1966171168   ;;  %v2427_v17 = vlaneseq  ;;  %v813_v5 = vld [vmem:[%s4939_s20 + $0x1198] sm:$0xff] }
 0x148   : > { %3932 = vmatpush1.bf16.msra.mxu1 %v3931_v25  ;;  %3870 = vmatprep.subr.bf16.mxu0 %v3869_v26  ;;  %v3953_v25 = vpack.c.bf16 %v299_v20, %v267_v18  ;;  %v266_v26 = vld [vmem:[%s4939_s20 + $0x80] sm:$0xff]  ;;  %v587_v18 = vld [vmem:[%s4939_s20 + $0xa88] sm:$0xff] }
 0x149   : > { %3934 = vmatprep.subr.bf16.mxu1 %v3933_v30  ;;  %v300_v30 = vld [vmem:[%s4939_s20 + $0x190] sm:$0xff]  ;;  %v3955_v35 = vpack.c.bf16 %v298_v27, %v266_v26  ;;  %v619_v20 = vld [vmem:[%s4939_s20 + $0xb88] sm:$0xff]  ;;  %v586_v26 = vld [vmem:[%s4939_s20 + $0xa80] sm:$0xff]  ;;  %vm5568_vm0 = vcmp.lt.s32.totalorder %v2427_v17, 256 }
 0x14a   : > { %v618_v27 = vld [vmem:[%s4939_s20 + $0xb80] sm:$0xff] }
 0x14b   : > { %3872 = vmatpush1.bf16.msra.mxu0 %v3871_v36  ;;  %v4019_v36 = vpack.c.bf16 %v300_v30, %v268_v28  ;;  %v588_v28 = vld [vmem:[%s4939_s20 + $0xa90] sm:$0xff]  ;;  %v2428_v30 = vshrl.u32 %v2427_v17, 7 }
 0x14c   : > { %3936 = vmatpush1.bf16.msra.mxu1 %v3935_v39  ;;  %3874 = vmatprep.subr.bf16.mxu0 %v3873_v40  ;;  %v330_v39 = vld [vmem:[%s4939_s20 + $0x280] sm:$0xff] }
 0x14d   : > { %3938 = vmatprep.subr.bf16.mxu1 %v3937_v44  ;;  %v362_v40 = vld [vmem:[%s4939_s20 + $0x380] sm:$0xff]  ;;  %v395_v44 = vld [vmem:[%s4939_s20 + $0x488] sm:$0xff] }
 0x14e   : > { %v3959_v47 = vpack.c.bf16 %v362_v40, %v330_v39  ;;  %v4039_v39 = vpack.c.bf16 %v620_v32, %v588_v28  ;;  %v3977_v40 = vpack.c.bf16 %v683_v34, %v651_v33  ;;  %v3989_v28 = vpack.c.bf16 %v875_v22, %v843_v21  ;;  %v876_v33 = vld [vmem:[%s4939_s20 + $0x1390] sm:$0xff]  ;;  %v907_v34 = vld [vmem:[%s4939_s20 + $0x1488] sm:$0xff] }
 0x14f   : > { %3876 = vmatpush1.bf16.msra.mxu0 %v3875_v49  ;;  %v3961_v49 = vpack.c.bf16 %v427_v45, %v395_v44  ;;  %v1163_v21 = vld [vmem:[%s4939_s20 + $0x1c88] sm:$0xff] }
 0x150   : > { %3940 = vmatpush1.bf16.msra.mxu1 %v3939_v50  ;;  %3878 = vmatprep.subr.bf16.mxu0 %v3877_v51  ;;  %v394_v50 = vld [vmem:[%s4939_s20 + $0x480] sm:$0xff]  ;;  %v1195_v22 = vld [vmem:[%s4939_s20 + $0x1d88] sm:$0xff] }
 0x151   : > { %3942 = vmatprep.subr.bf16.mxu1 %v3941_v55  ;;  %v426_v51 = vld [vmem:[%s4939_s20 + $0x580] sm:$0xff]  ;;  %v459_v55 = vld [vmem:[%s4939_s20 + $0x688] sm:$0xff] }
 0x152   : > { %v3963_v58 = vpack.c.bf16 %v426_v51, %v394_v50  ;;  %v3965_v60 = vpack.c.bf16 %v491_v56, %v459_v55  ;;  %v717_v51 = vld [vmem:[%s4939_s20 + $0xe98] sm:$0xff]  ;;  %v714_v56 = vld [vmem:[%s4939_s20 + $0xe80] sm:$0xff] }
 0x153   : > { %3880 = vmatpush1.bf16.msra.mxu0 %v3879_v61  ;;  %v458_v61 = vld [vmem:[%s4939_s20 + $0x680] sm:$0xff] }
 0x154   : > { %3944 = vmatpush1.bf16.msra.mxu1 %v3943_v62  ;;  %3882 = vmatprep.subr.bf16.mxu0 %v3881_v63  ;;  %v490_v62 = vld [vmem:[%s4939_s20 + $0x780] sm:$0xff]  ;;  %v460_v63 = vld [vmem:[%s4939_s20 + $0x690] sm:$0xff] }
 0x155   : > { %3946 = vmatprep.subr.bf16.mxu1 %v3945_v3  ;;  %v555_v3 = vld [vmem:[%s4939_s20 + $0x988] sm:$0xff]  ;;  %v3967_v6 = vpack.c.bf16 %v490_v62, %v458_v61  ;;  %v4031_v7 = vpack.c.bf16 %v492_v1, %v460_v63  ;;  %v748_v61 = vld [vmem:[%s4939_s20 + $0xf90] sm:$0xff]  ;;  %v4045_v63 = vpack.c.bf16 %v749_v52, %v717_v51 }
 0x156   : > { %v3969_v8 = vpack.c.bf16 %v555_v3, %v523_v2  ;;  %v811_v1 = vld [vmem:[%s4939_s20 + $0x1188] sm:$0xff] }
 0x157   : > { %3884 = vmatpush1.bf16.msra.mxu0 %v3883_v9  ;;  %v522_v9 = vld [vmem:[%s4939_s20 + $0x880] sm:$0xff] }
 0x158   : > { %3948 = vmatpush1.bf16.msra.mxu1 %v3947_v10  ;;  %3886 = vmatprep.subr.bf16.mxu0 %v3885_v11  ;;  %v554_v10 = vld [vmem:[%s4939_s20 + $0x980] sm:$0xff]  ;;  %v524_v11 = vld [vmem:[%s4939_s20 + $0x890] sm:$0xff] }
 0x159   : > { %3950 = vmatprep.subr.bf16.mxu1 %v3949_v15  ;;  %v2425_v15 = vunpack.c.l.s4 %v4745_v14  ;;  %v810_v14 = vld [vmem:[%s4939_s20 + $0x1180] sm:$0xff] }
 0x15b   : > { %3888 = vmatpush1.bf16.msra.mxu0 %v3887_v23  ;;  %v3971_v23 = vpack.c.bf16 %v554_v10, %v522_v9 }
 0x15c   : > { %3952 = vmatpush1.bf16.msra.mxu1 %v3951_v24  ;;  %3954 = vmatprep.subr.bf16.mxu0 %v3953_v25  ;;  %v4035_v24 = vpack.c.bf16 %v556_v13, %v524_v11  ;;  %v3973_v25 = vpack.c.bf16 %v619_v20, %v587_v18  ;;  %v778_v13 = vld [vmem:[%s4939_s20 + $0x1080] sm:$0xff]  ;;  %v4049_v18 = vpack.c.bf16 %v813_v5, %v781_v4  ;;  %v812_v20 = vld [vmem:[%s4939_s20 + $0x1190] sm:$0xff] }
 0x15d   : > { %4018 = vmatprep.subr.bf16.mxu1 %v4017_v29  ;;  %v2426_v29 = vunpack.c.0.s8 %v2425_v15  ;;  %v780_v15 = vld [vmem:[%s4939_s20 + $0x1090] sm:$0xff] }
 0x15e   : > { %1776 = vmatmul.mubr.f32.vlgmr.msra.gmra.mrb[6].mxu0 %v5363_v37  ;;  %v1036_v4 = vld [vmem:[%s4939_s20 + $0x1890] sm:$0xff] }
 0x15f   : > { %1847 = vmatmul.mubr.f32.vlgmr.msra.gmra.mrb[6].mxu1 %v5363_v37  ;;  %3956 = vmatpush1.bf16.msra.mxu0 %v3955_v35  ;;  %v461_v37 = vld [vmem:[%s4939_s20 + $0x698] sm:$0xff]  ;;  %v5554_v45 = vsub.s32 %v2426_v29, %v2428_v30  ;;  %v842_v29 = vld [vmem:[%s4939_s20 + $0x1280] sm:$0xff] }
 0x160   : > { %4020 = vmatpush1.bf16.msra.mxu1 %v4019_v36  ;;  %3958 = vmatprep.subr.bf16.mxu0 %v3957_v38  ;;  %v4029_v0 = vpack.c.bf16 %v493_v57, %v461_v37  ;;  %v653_v35 = vld [vmem:[%s4939_s20 + $0xc98] sm:$0xff]  ;;  %v3975_v38 = vpack.c.bf16 %v618_v27, %v586_v26  ;;  %v4043_v57 = vpack.c.bf16 %v684_v46, %v652_v43  ;;  %v874_v30 = vld [vmem:[%s4939_s20 + $0x1380] sm:$0xff]  ;;  %v940_v46 = vld [vmem:[%s4939_s20 + $0x1590] sm:$0xff] }
 0x161   : > { %4022 = vmatprep.subr.bf16.mxu1 %v4021_v42  ;;  %1917 = vmatprep.mubr.f32.mxu0 %v5049_v19  ;;  %v685_v36 = vld [vmem:[%s4939_s20 + $0xd98] sm:$0xff]  ;;  %v682_v42 = vld [vmem:[%s4939_s20 + $0xd80] sm:$0xff]  ;;  %v3987_v26 = vpack.c.bf16 %v810_v14, %v778_v13  ;;  %v4051_v27 = vpack.c.bf16 %v812_v20, %v780_v15  ;;  %v1132_v20 = vld [vmem:[%s4939_s20 + $0x1b90] sm:$0xff] }
 0x162   : > { %1988 = vmatprep.mubr.f32.mxu1 %v5049_v19  ;;  %v4041_v16 = vpack.c.bf16 %v685_v36, %v653_v35  ;;  %v3979_v55 = vpack.c.bf16 %v682_v42, %v650_v41  ;;  %v939_v35 = vld [vmem:[%s4939_s20 + $0x1588] sm:$0xff]  ;;  %v909_v36 = vld [vmem:[%s4939_s20 + $0x1498] sm:$0xff]  ;;  %v906_v42 = vld [vmem:[%s4939_s20 + $0x1480] sm:$0xff] }
 0x163   : > { %3960 = vmatpush1.bf16.msra.mxu0 %v3959_v47  ;;  %v715_v47 = vld [vmem:[%s4939_s20 + $0xe88] sm:$0xff]  ;;  %v3993_v41 = vpack.c.bf16 %v939_v35, %v907_v34  ;;  %v938_v43 = vld [vmem:[%s4939_s20 + $0x1580] sm:$0xff]  ;;  %v1229_v35 = vld [vmem:[%s4939_s20 + $0x1e98] sm:$0xff] }
 0x164   : > { %4024 = vmatpush1.bf16.msra.mxu1 %v4023_v48  ;;  %3962 = vmatprep.subr.bf16.mxu0 %v3961_v49  ;;  %v747_v48 = vld [vmem:[%s4939_s20 + $0xf88] sm:$0xff]  ;;  %v3995_v51 = vpack.c.bf16 %v938_v43, %v906_v42  ;;  %v1098_v14 = vld [vmem:[%s4939_s20 + $0x1a80] sm:$0xff]  ;;  %v1228_v43 = vld [vmem:[%s4939_s20 + $0x1e90] sm:$0xff] }
 0x165   : > { %4026 = vmatprep.subr.bf16.mxu1 %v4025_v53  ;;  %v1130_v15 = vld [vmem:[%s4939_s20 + $0x1b80] sm:$0xff]  ;;  %v1259_v34 = vld [vmem:[%s4939_s20 + $0x1f88] sm:$0xff] }
 0x166   : > { %v1258_v42 = vld [vmem:[%s4939_s20 + $0x1f80] sm:$0xff] }
 0x167   : > { %3964 = vmatpush1.bf16.msra.mxu0 %v3963_v58  ;;  %v3981_v58 = vpack.c.bf16 %v747_v48, %v715_v47  ;;  %v971_v47 = vld [vmem:[%s4939_s20 + $0x1688] sm:$0xff] }
 0x168   : > { %4028 = vmatpush1.bf16.msra.mxu1 %v4027_v59  ;;  %3966 = vmatprep.subr.bf16.mxu0 %v3965_v60  ;;  %v746_v59 = vld [vmem:[%s4939_s20 + $0xf80] sm:$0xff]  ;;  %v716_v60 = vld [vmem:[%s4939_s20 + $0xe90] sm:$0xff]  ;;  %v1003_v48 = vld [vmem:[%s4939_s20 + $0x1788] sm:$0xff] }
 0x169   : > { %4030 = vmatprep.subr.bf16.mxu1 %v4029_v0  ;;  %v779_v0 = vld [vmem:[%s4939_s20 + $0x1088] sm:$0xff]  ;;  %v4047_v9 = vpack.c.bf16 %v748_v61, %v716_v60  ;;  %v1037_v60 = vld [vmem:[%s4939_s20 + $0x1898] sm:$0xff] }
 0x16a   : > { %v1069_v61 = vld [vmem:[%s4939_s20 + $0x1998] sm:$0xff] }
 0x16b   : > { %3968 = vmatpush1.bf16.msra.mxu0 %v3967_v6  ;;  %v4065_v5 = vpack.c.bf16 %v1069_v61, %v1037_v60  ;;  %v369_v60 = vld [vmem:[%s4939_s20 + $0x3b8] sm:$0xff] }
 0x16c   : > { %4032 = vmatpush1.bf16.msra.mxu1 %v4031_v7  ;;  %3970 = vmatprep.subr.bf16.mxu0 %v3969_v8  ;;  %v3983_v8 = vpack.c.bf16 %v746_v59, %v714_v56  ;;  %v972_v56 = vld [vmem:[%s4939_s20 + $0x1690] sm:$0xff]  ;;  %v1067_v59 = vld [vmem:[%s4939_s20 + $0x1988] sm:$0xff] }
 0x16d   : > { %4034 = vmatprep.subr.bf16.mxu1 %v4033_v12  ;;  %v3985_v12 = vpack.c.bf16 %v811_v1, %v779_v0  ;;  %v1034_v1 = vld [vmem:[%s4939_s20 + $0x1880] sm:$0xff] }
 0x16f   : > { %3972 = vmatpush1.bf16.msra.mxu0 %v3971_v23 }
 0x170   : > { %4036 = vmatpush1.bf16.msra.mxu1 %v4035_v24  ;;  %3974 = vmatprep.subr.bf16.mxu0 %v3973_v25  ;;  %v845_v24 = vld [vmem:[%s4939_s20 + $0x1298] sm:$0xff] }
 0x171   : > { %v1351_v44 = vpop.f32.mrb[0].mxu0  ;;  %4038 = vmatprep.subr.bf16.mxu1 %v4037_v31  ;;  %v877_v25 = vld [vmem:[%s4939_s20 + $0x1398] sm:$0xff]  ;;  %v844_v31 = vld [vmem:[%s4939_s20 + $0x1290] sm:$0xff] }
 0x172   : > { %v1422_v49 = vpop.f32.mrb[0].mxu1  ;;  %v1353_v50 = vpop.f32.mrb[1].mxu0  ;;  %v4053_v32 = vpack.c.bf16 %v877_v25, %v845_v24  ;;  %v1197_v24 = vld [vmem:[%s4939_s20 + $0x1d98] sm:$0xff]  ;;  %v4007_v25 = vpack.c.bf16 %v1130_v15, %v1098_v14  ;;  %v398_v14 = vld [vmem:[%s4939_s20 + $0x4a0] sm:$0xff] }
 0x173   : > { %v2423_v53 = vcombine.low %v1351_v44, %v1353_v50  ;;  %v1424_v54 = vpop.f32.mrb[1].mxu1  ;;  %3976 = vmatpush1.bf16.msra.mxu0 %v3975_v38  ;;  %v941_v38 = vld [vmem:[%s4939_s20 + $0x1598] sm:$0xff]  ;;  %v908_v44 = vld [vmem:[%s4939_s20 + $0x1490] sm:$0xff]  ;;  %v430_v15 = vld [vmem:[%s4939_s20 + $0x5a0] sm:$0xff] }
 0x174   : > { %v2459_v37 = vcombine.low %v1422_v49, %v1424_v54  ;;  %4040 = vmatpush1.bf16.msra.mxu1 %v4039_v39  ;;  %3978 = vmatprep.subr.bf16.mxu0 %v3977_v40  ;;  %v3991_v39 = vpack.c.bf16 %v874_v30, %v842_v29  ;;  %v4055_v40 = vpack.c.bf16 %v876_v33, %v844_v31  ;;  %v973_v49 = vld [vmem:[%s4939_s20 + $0x1698] sm:$0xff]  ;;  %v970_v54 = vld [vmem:[%s4939_s20 + $0x1680] sm:$0xff]  ;;  %v1164_v30 = vld [vmem:[%s4939_s20 + $0x1c90] sm:$0xff] }
 0x175   : > { %v2430_v62 = vrot.slane %v2423_v53, %v5554_v45  ;;  %4042 = vmatprep.subr.bf16.mxu1 %v4041_v16  ;;  %v4057_v16 = vpack.c.bf16 %v941_v38, %v909_v36  ;;  %v1005_v50 = vld [vmem:[%s4939_s20 + $0x1798] sm:$0xff]  ;;  %v4059_v52 = vpack.c.bf16 %v940_v46, %v908_v44  ;;  %v3997_v53 = vpack.c.bf16 %v1003_v48, %v971_v47  ;;  %v1194_v29 = vld [vmem:[%s4939_s20 + $0x1d80] sm:$0xff]  ;;  %v1227_v33 = vld [vmem:[%s4939_s20 + $0x1e88] sm:$0xff] }
 0x176   : > { %v2466_v3 = vrot.slane %v2459_v37, %v5554_v45  ;;  %v4061_v37 = vpack.c.bf16 %v1005_v50, %v973_v49  ;;  %v1261_v36 = vld [vmem:[%s4939_s20 + $0x1f98] sm:$0xff]  ;;  %v271_v46 = vld [vmem:[%s4939_s20 + $0xa8] sm:$0xff] }
 0x177   : > { %v2431_v6 = vcombine.high %v2430_v62, %v2430_v62  ;;  %v2438_v7 = vrot.slane %v2430_v62, %v5554_v45  ;;  %3980 = vmatpush1.bf16.msra.mxu0 %v3979_v55  ;;  %v1002_v55 = vld [vmem:[%s4939_s20 + $0x1780] sm:$0xff]  ;;  %v4077_v44 = vpack.c.bf16 %v1261_v36, %v1229_v35  ;;  %v303_v47 = vld [vmem:[%s4939_s20 + $0x1a8] sm:$0xff]  ;;  %v273_v48 = vld [vmem:[%s4939_s20 + $0xb8] sm:$0xff] }
 0x178   : > { %v2467_v10 = vcombine.high %v2466_v3, %v2466_v3  ;;  %v2474_v11 = vrot.slane %v2466_v3, %v5554_v45  ;;  %4044 = vmatpush1.bf16.msra.mxu1 %v4043_v57  ;;  %3982 = vmatprep.subr.bf16.mxu0 %v3981_v58  ;;  %v1004_v57 = vld [vmem:[%s4939_s20 + $0x1790] sm:$0xff]  ;;  %v1035_v58 = vld [vmem:[%s4939_s20 + $0x1888] sm:$0xff]  ;;  %v3999_v62 = vpack.c.bf16 %v1002_v55, %v970_v54  ;;  %v1066_v3 = vld [vmem:[%s4939_s20 + $0x1980] sm:$0xff] }
 0x179   : > { %v2445_v17 = vrot.slane %v2431_v6, %v5554_v45  ;;  %2452 = vst.msk [vmem:[#allocation2] ss:$8 sm:$0x3] %vm5568_vm0, %v2438_v7  ;;  %4046 = vmatprep.subr.bf16.mxu1 %v4045_v63  ;;  %v4063_v63 = vpack.c.bf16 %v1004_v57, %v972_v56  ;;  %v4001_v0 = vpack.c.bf16 %v1067_v59, %v1035_v58  ;;  %v1068_v6 = vld [vmem:[%s4939_s20 + $0x1990] sm:$0xff]  ;;  %v1099_v7 = vld [vmem:[%s4939_s20 + $0x1a88] sm:$0xff]  ;;  %v305_v49 = vld [vmem:[%s4939_s20 + $0x1b8] sm:$0xff] }
 0x17a   : > { %v2481_v23 = vrot.slane %v2467_v10, %v5554_v45  ;;  %2485 = vst.msk [vmem:[#allocation2 + $0x1] ss:$8 sm:$0x3] %vm5568_vm0, %v2474_v11  ;;  %v1133_v10 = vld [vmem:[%s4939_s20 + $0x1b98] sm:$0xff]  ;;  %v4003_v11 = vpack.c.bf16 %v1066_v3, %v1034_v1  ;;  %v302_v54 = vld [vmem:[%s4939_s20 + $0x1a0] sm:$0xff]  ;;  %v272_v55 = vld [vmem:[%s4939_s20 + $0xb0] sm:$0xff]  ;;  %v4145_v56 = vpack.c.bf16 %v305_v49, %v273_v48 }
 0x17b   : > { %2455 = vst.msk [vmem:[#allocation2 + $0x20] ss:$8 sm:$0x3] %vm5568_vm0, %v2445_v17  ;;  %3984 = vmatpush1.bf16.msra.mxu0 %v3983_v8  ;;  %v1131_v8 = vld [vmem:[%s4939_s20 + $0x1b88] sm:$0xff]  ;;  %v1100_v17 = vld [vmem:[%s4939_s20 + $0x1a90] sm:$0xff]  ;;  %v337_v59 = vld [vmem:[%s4939_s20 + $0x2b8] sm:$0xff] }
 0x17c   : > { %2488 = vst.msk [vmem:[#allocation2 + $0x21] ss:$8 sm:$0x3] %vm5568_vm0, %v2481_v23  ;;  %4048 = vmatpush1.bf16.msra.mxu1 %v4047_v9  ;;  %3986 = vmatprep.subr.bf16.mxu0 %v3985_v12  ;;  %v1101_v9 = vld [vmem:[%s4939_s20 + $0x1a98] sm:$0xff]  ;;  %v4067_v12 = vpack.c.bf16 %v1068_v6, %v1036_v4  ;;  %v4005_v13 = vpack.c.bf16 %v1131_v8, %v1099_v7  ;;  %v335_v57 = vld [vmem:[%s4939_s20 + $0x2a8] sm:$0xff]  ;;  %v366_v1 = vld [vmem:[%s4939_s20 + $0x3a0] sm:$0xff] }
 0x17d   : > { %4050 = vmatprep.subr.bf16.mxu1 %v4049_v18  ;;  %v4069_v18 = vpack.c.bf16 %v1133_v10, %v1101_v9  ;;  %v1165_v23 = vld [vmem:[%s4939_s20 + $0x1c98] sm:$0xff]  ;;  %v367_v58 = vld [vmem:[%s4939_s20 + $0x3a8] sm:$0xff]  ;;  %v336_v3 = vld [vmem:[%s4939_s20 + $0x2b0] sm:$0xff]  ;;  %v4149_v4 = vpack.c.bf16 %v369_v60, %v337_v59 }
 0x17e   : > { %v4073_v31 = vpack.c.bf16 %v1197_v24, %v1165_v23  ;;  %v399_v6 = vld [vmem:[%s4939_s20 + $0x4a8] sm:$0xff]  ;;  %v5665_v8 = vld.sshfl [vmem:[#allocation3] sm:$0x33 pattern:$0x76325410] }
 0x17f   : > { %3988 = vmatpush1.bf16.msra.mxu0 %v3987_v26  ;;  %v4071_v26 = vpack.c.bf16 %v1132_v20, %v1100_v17  ;;  %v431_v7 = vld [vmem:[%s4939_s20 + $0x5a8] sm:$0xff]  ;;  %v401_v9 = vld [vmem:[%s4939_s20 + $0x4b8] sm:$0xff]  ;;  %v400_v17 = vld [vmem:[%s4939_s20 + $0x4b0] sm:$0xff] }
 0x180   : > { %4052 = vmatpush1.bf16.msra.mxu1 %v4051_v27  ;;  %3990 = vmatprep.subr.bf16.mxu0 %v3989_v28  ;;  %v4009_v27 = vpack.c.bf16 %v1195_v22, %v1163_v21  ;;  %v1162_v28 = vld [vmem:[%s4939_s20 + $0x1c80] sm:$0xff]  ;;  %v433_v10 = vld [vmem:[%s4939_s20 + $0x5b8] sm:$0xff]  ;;  %v432_v20 = vld [vmem:[%s4939_s20 + $0x5b0] sm:$0xff] }
 0x181   : > { %4054 = vmatprep.subr.bf16.mxu1 %v4053_v32  ;;  %v1196_v32 = vld [vmem:[%s4939_s20 + $0x1d90] sm:$0xff]  ;;  %v4011_v38 = vpack.c.bf16 %v1194_v29, %v1162_v28  ;;  %v463_v21 = vld [vmem:[%s4939_s20 + $0x6a8] sm:$0xff]  ;;  %v465_v23 = vld [vmem:[%s4939_s20 + $0x6b8] sm:$0xff] }
 0x182   : > { %v495_v22 = vld [vmem:[%s4939_s20 + $0x7a8] sm:$0xff]  ;;  %v497_v24 = vld [vmem:[%s4939_s20 + $0x7b8] sm:$0xff]  ;;  %v462_v28 = vld [vmem:[%s4939_s20 + $0x6a0] sm:$0xff] }
 0x183   : > { %3992 = vmatpush1.bf16.msra.mxu0 %v3991_v39  ;;  %v4075_v39 = vpack.c.bf16 %v1196_v32, %v1164_v30  ;;  %v494_v29 = vld [vmem:[%s4939_s20 + $0x7a0] sm:$0xff]  ;;  %v464_v30 = vld [vmem:[%s4939_s20 + $0x6b0] sm:$0xff]  ;;  %v529_v35 = vld [vmem:[%s4939_s20 + $0x8b8] sm:$0xff] }
 0x184   : > { %4056 = vmatpush1.bf16.msra.mxu1 %v4055_v40  ;;  %3994 = vmatprep.subr.bf16.mxu0 %v3993_v41  ;;  %v4013_v40 = vpack.c.bf16 %v1259_v34, %v1227_v33  ;;  %v1226_v41 = vld [vmem:[%s4939_s20 + $0x1e80] sm:$0xff]  ;;  %v496_v32 = vld [vmem:[%s4939_s20 + $0x7b0] sm:$0xff]  ;;  %v527_v33 = vld [vmem:[%s4939_s20 + $0x8a8] sm:$0xff] }
 0x185   : > { %4058 = vmatprep.subr.bf16.mxu1 %v4057_v16  ;;  %v1260_v16 = vld [vmem:[%s4939_s20 + $0x1f90] sm:$0xff]  ;;  %v4015_v50 = vpack.c.bf16 %v1258_v42, %v1226_v41  ;;  %v559_v34 = vld [vmem:[%s4939_s20 + $0x9a8] sm:$0xff]  ;;  %v561_v36 = vld [vmem:[%s4939_s20 + $0x9b8] sm:$0xff] }
 0x186   : > { %v4097_v41 = vpack.c.bf16 %v559_v34, %v527_v33  ;;  %v558_v42 = vld [vmem:[%s4939_s20 + $0x9a0] sm:$0xff]  ;;  %v623_v48 = vld [vmem:[%s4939_s20 + $0xba8] sm:$0xff]  ;;  %v593_v49 = vld [vmem:[%s4939_s20 + $0xab8] sm:$0xff] }
 0x187   : > { %3996 = vmatpush1.bf16.msra.mxu0 %v3995_v51  ;;  %v4079_v51 = vpack.c.bf16 %v1260_v16, %v1228_v43  ;;  %v528_v43 = vld [vmem:[%s4939_s20 + $0x8b0] sm:$0xff]  ;;  %v4161_v16 = vpack.c.bf16 %v561_v36, %v529_v35  ;;  %v687_v59 = vld [vmem:[%s4939_s20 + $0xda8] sm:$0xff]  ;;  %v657_v60 = vld [vmem:[%s4939_s20 + $0xcb8] sm:$0xff] }
 0x188   : > { %4060 = vmatpush1.bf16.msra.mxu1 %v4059_v52  ;;  %3998 = vmatprep.subr.bf16.mxu0 %v3997_v53  ;;  %v4081_v52 = vpack.c.bf16 %v303_v47, %v271_v46  ;;  %v270_v53 = vld [vmem:[%s4939_s20 + $0xa0] sm:$0xff]  ;;  %v560_v46 = vld [vmem:[%s4939_s20 + $0x9b0] sm:$0xff]  ;;  %v591_v47 = vld [vmem:[%s4939_s20 + $0xaa8] sm:$0xff] }
 0x189   : > { %4062 = vmatprep.subr.bf16.mxu1 %v4061_v37  ;;  %v304_v37 = vld [vmem:[%s4939_s20 + $0x1b0] sm:$0xff]  ;;  %v4083_v61 = vpack.c.bf16 %v302_v54, %v270_v53  ;;  %v4101_v53 = vpack.c.bf16 %v623_v48, %v591_v47  ;;  %v590_v54 = vld [vmem:[%s4939_s20 + $0xaa0] sm:$0xff]  ;;  %v817_v33 = vld [vmem:[%s4939_s20 + $0x11b8] sm:$0xff] }
 0x18a   : > { %v816_v47 = vld [vmem:[%s4939_s20 + $0x11b0] sm:$0xff]  ;;  %v847_v48 = vld [vmem:[%s4939_s20 + $0x12a8] sm:$0xff] }
 0x18b   : > { %4000 = vmatpush1.bf16.msra.mxu0 %v3999_v62  ;;  %v4147_v62 = vpack.c.bf16 %v304_v37, %v272_v55  ;;  %v622_v55 = vld [vmem:[%s4939_s20 + $0xba0] sm:$0xff] }
 0x18c   : > { %4064 = vmatpush1.bf16.msra.mxu1 %v4063_v63  ;;  %4002 = vmatprep.subr.bf16.mxu0 %v4001_v0  ;;  %v4085_v63 = vpack.c.bf16 %v367_v58, %v335_v57  ;;  %v334_v0 = vld [vmem:[%s4939_s20 + $0x2a0] sm:$0xff]  ;;  %v624_v57 = vld [vmem:[%s4939_s20 + $0xbb0] sm:$0xff]  ;;  %v655_v58 = vld [vmem:[%s4939_s20 + $0xca8] sm:$0xff] }
 0x18d   : > { %4066 = vmatprep.subr.bf16.mxu1 %v4065_v5  ;;  %v368_v5 = vld [vmem:[%s4939_s20 + $0x3b0] sm:$0xff] }
 0x18f   : > { %4004 = vmatpush1.bf16.msra.mxu0 %v4003_v11  ;;  %v4087_v11 = vpack.c.bf16 %v366_v1, %v334_v0  ;;  %v4105_v0 = vpack.c.bf16 %v687_v59, %v655_v58  ;;  %v654_v1 = vld [vmem:[%s4939_s20 + $0xca0] sm:$0xff]  ;;  %v880_v59 = vld [vmem:[%s4939_s20 + $0x13b0] sm:$0xff] }
 0x190   : > { %4068 = vmatpush1.bf16.msra.mxu1 %v4067_v12  ;;  %4006 = vmatprep.subr.bf16.mxu0 %v4005_v13  ;;  %v4151_v12 = vpack.c.bf16 %v368_v5, %v336_v3  ;;  %v4089_v13 = vpack.c.bf16 %v431_v7, %v399_v6  ;;  %v686_v3 = vld [vmem:[%s4939_s20 + $0xda0] sm:$0xff]  ;;  %v688_v7 = vld [vmem:[%s4939_s20 + $0xdb0] sm:$0xff] }
 0x191   : > { %4070 = vmatprep.subr.bf16.mxu1 %v4069_v18  ;;  %v4153_v18 = vpack.c.bf16 %v433_v10, %v401_v9  ;;  %v719_v9 = vld [vmem:[%s4939_s20 + $0xea8] sm:$0xff] }
 0x192   : > { %v751_v10 = vld [vmem:[%s4939_s20 + $0xfa8] sm:$0xff] }
 0x193   : > { %4008 = vmatpush1.bf16.msra.mxu0 %v4007_v25  ;;  %v4091_v25 = vpack.c.bf16 %v430_v15, %v398_v14  ;;  %v753_v14 = vld [vmem:[%s4939_s20 + $0xfb8] sm:$0xff] }
 0x194   : > { %4072 = vmatpush1.bf16.msra.mxu1 %v4071_v26  ;;  %4010 = vmatprep.subr.bf16.mxu0 %v4009_v27  ;;  %v4155_v26 = vpack.c.bf16 %v432_v20, %v400_v17  ;;  %v4093_v27 = vpack.c.bf16 %v495_v22, %v463_v21  ;;  %v718_v20 = vld [vmem:[%s4939_s20 + $0xea0] sm:$0xff] }
 0x195   : > { %4074 = vmatprep.subr.bf16.mxu1 %v4073_v31  ;;  %v4157_v31 = vpack.c.bf16 %v497_v24, %v465_v23  ;;  %v4109_v23 = vpack.c.bf16 %v751_v10, %v719_v9  ;;  %v750_v24 = vld [vmem:[%s4939_s20 + $0xfa0] sm:$0xff]  ;;  %v944_v9 = vld [vmem:[%s4939_s20 + $0x15b0] sm:$0xff]  ;;  %v975_v10 = vld [vmem:[%s4939_s20 + $0x16a8] sm:$0xff] }
 0x196   : > { %v4111_v36 = vpack.c.bf16 %v750_v24, %v718_v20  ;;  %v1006_v20 = vld [vmem:[%s4939_s20 + $0x17a0] sm:$0xff]  ;;  %v1039_v24 = vld [vmem:[%s4939_s20 + $0x18a8] sm:$0xff] }
 0x197   : > { %4012 = vmatpush1.bf16.msra.mxu0 %v4011_v38  ;;  %v4095_v38 = vpack.c.bf16 %v494_v29, %v462_v28  ;;  %v783_v29 = vld [vmem:[%s4939_s20 + $0x10a8] sm:$0xff] }
 0x198   : > { %4076 = vmatpush1.bf16.msra.mxu1 %v4075_v39  ;;  %4014 = vmatprep.subr.bf16.mxu0 %v4013_v40  ;;  %v526_v39 = vld [vmem:[%s4939_s20 + $0x8a0] sm:$0xff]  ;;  %v4159_v40 = vpack.c.bf16 %v496_v32, %v464_v30  ;;  %v815_v30 = vld [vmem:[%s4939_s20 + $0x11a8] sm:$0xff]  ;;  %v785_v32 = vld [vmem:[%s4939_s20 + $0x10b8] sm:$0xff] }
 0x199   : > { %4078 = vmatprep.subr.bf16.mxu1 %v4077_v44  ;;  %v2961_v44 = vld [vmem:[%s5462_s22 + $0x8] sm:$0xff] }
 0x19a   : > { %2969 = vperm.xlu0 %4560, %v2961_v44   ;;  %v784_v44 = vld [vmem:[%s4939_s20 + $0x10b0] sm:$0xff] }
 0x19b   : > { %4016 = vmatpush1.bf16.msra.mxu0 %v4015_v50  ;;  %v625_v50 = vld [vmem:[%s4939_s20 + $0xbb8] sm:$0xff] }
 0x19c   : > { %4080 = vmatpush1.bf16.msra.mxu1 %v4079_v51  ;;  %4082 = vmatprep.subr.bf16.mxu0 %v4081_v52  ;;  %v4099_v51 = vpack.c.bf16 %v558_v42, %v526_v39  ;;  %v4163_v52 = vpack.c.bf16 %v560_v46, %v528_v43  ;;  %v4165_v37 = vpack.c.bf16 %v625_v50, %v593_v49  ;;  %v782_v42 = vld [vmem:[%s4939_s20 + $0x10a0] sm:$0xff]  ;;  %v879_v49 = vld [vmem:[%s4939_s20 + $0x13a8] sm:$0xff] }
 0x19d   : > { %4146 = vmatprep.subr.bf16.mxu1 %v4145_v56  ;;  %v592_v56 = vld [vmem:[%s4939_s20 + $0xab0] sm:$0xff]  ;;  %v814_v43 = vld [vmem:[%s4939_s20 + $0x11a0] sm:$0xff]  ;;  %v4177_v46 = vpack.c.bf16 %v817_v33, %v785_v32 }
 0x19e   : > { %1918 = vmatmul.mubr.f32.vlgmr.msra.gmra.mrb[8].mxu0 %v5665_v8  ;;  %v1070_v32 = vld [vmem:[%s4939_s20 + $0x19a0] sm:$0xff]  ;;  %v1040_v33 = vld [vmem:[%s4939_s20 + $0x18b0] sm:$0xff] }
 0x19f   : > { %1989 = vmatmul.mubr.f32.vlgmr.msra.gmra.mrb[8].mxu1 %v5665_v8  ;;  %4084 = vmatpush1.bf16.msra.mxu0 %v4083_v61  ;;  %v689_v61 = vld [vmem:[%s4939_s20 + $0xdb8] sm:$0xff] }
 0x1a0   : > { %4148 = vmatpush1.bf16.msra.mxu1 %v4147_v62  ;;  %4086 = vmatprep.subr.bf16.mxu0 %v4085_v63  ;;  %v4103_v62 = vpack.c.bf16 %v622_v55, %v590_v54  ;;  %v4167_v63 = vpack.c.bf16 %v624_v57, %v592_v56  ;;  %v4169_v6 = vpack.c.bf16 %v689_v61, %v657_v60  ;;  %v846_v56 = vld [vmem:[%s4939_s20 + $0x12a0] sm:$0xff]  ;;  %v848_v57 = vld [vmem:[%s4939_s20 + $0x12b0] sm:$0xff]  ;;  %v911_v60 = vld [vmem:[%s4939_s20 + $0x14a8] sm:$0xff] }
 0x1a1   : > { %4150 = vmatprep.subr.bf16.mxu1 %v4149_v4  ;;  %2059 = vmatprep.mubr.f32.mxu0 %v5049_v19  ;;  %v656_v4 = vld [vmem:[%s4939_s20 + $0xcb0] sm:$0xff]  ;;  %v4179_v54 = vpack.c.bf16 %v816_v47, %v784_v44  ;;  %v4117_v55 = vpack.c.bf16 %v879_v49, %v847_v48  ;;  %v943_v61 = vld [vmem:[%s4939_s20 + $0x15a8] sm:$0xff]  ;;  %v1102_v44 = vld [vmem:[%s4939_s20 + $0x1aa0] sm:$0xff] }
 0x1a2   : > { %2130 = vmatprep.mubr.f32.mxu1 %v5049_v19  ;;  %v4171_v22 = vpack.c.bf16 %v688_v7, %v656_v4  ;;  %v910_v4 = vld [vmem:[%s4939_s20 + $0x14a0] sm:$0xff]  ;;  %v1136_v48 = vld [vmem:[%s4939_s20 + $0x1bb0] sm:$0xff]  ;;  %v1167_v49 = vld [vmem:[%s4939_s20 + $0x1ca8] sm:$0xff] }
 0x1a3   : > { %4088 = vmatpush1.bf16.msra.mxu0 %v4087_v11 }
 0x1a4   : > { %4152 = vmatpush1.bf16.msra.mxu1 %v4151_v12  ;;  %4090 = vmatprep.subr.bf16.mxu0 %v4089_v13  ;;  %v721_v13 = vld [vmem:[%s4939_s20 + $0xeb8] sm:$0xff] }
 0x1a5   : > { %4154 = vmatprep.subr.bf16.mxu1 %v4153_v18  ;;  %v4107_v18 = vpack.c.bf16 %v686_v3, %v654_v1  ;;  %v4173_v28 = vpack.c.bf16 %v753_v14, %v721_v13  ;;  %v4183_v1 = vpack.c.bf16 %v880_v59, %v848_v57  ;;  %v4121_v3 = vpack.c.bf16 %v943_v61, %v911_v60  ;;  %v1009_v13 = vld [vmem:[%s4939_s20 + $0x17b8] sm:$0xff]  ;;  %v1168_v57 = vld [vmem:[%s4939_s20 + $0x1cb0] sm:$0xff]  ;;  %v1231_v60 = vld [vmem:[%s4939_s20 + $0x1ea8] sm:$0xff] }
 0x1a6   : > { %v1200_v59 = vld [vmem:[%s4939_s20 + $0x1db0] sm:$0xff]  ;;  %v1263_v61 = vld [vmem:[%s4939_s20 + $0x1fa8] sm:$0xff] }
 0x1a7   : > { %4092 = vmatpush1.bf16.msra.mxu0 %v4091_v25  ;;  %v720_v25 = vld [vmem:[%s4939_s20 + $0xeb0] sm:$0xff] }
 0x1a8   : > { %4156 = vmatpush1.bf16.msra.mxu1 %v4155_v26  ;;  %4094 = vmatprep.subr.bf16.mxu0 %v4093_v27  ;;  %v752_v26 = vld [vmem:[%s4939_s20 + $0xfb0] sm:$0xff] }
 0x1a9   : > { %4158 = vmatprep.subr.bf16.mxu1 %v4157_v31 }
 0x1ab   : > { %4096 = vmatpush1.bf16.msra.mxu0 %v4095_v38  ;;  %v4175_v38 = vpack.c.bf16 %v752_v26, %v720_v25  ;;  %v1071_v25 = vld [vmem:[%s4939_s20 + $0x19a8] sm:$0xff]  ;;  %v1041_v26 = vld [vmem:[%s4939_s20 + $0x18b8] sm:$0xff] }
 0x1ac   : > { %4160 = vmatpush1.bf16.msra.mxu1 %v4159_v40  ;;  %4098 = vmatprep.subr.bf16.mxu0 %v4097_v41  ;;  %v4113_v41 = vpack.c.bf16 %v815_v30, %v783_v29  ;;  %v4129_v30 = vpack.c.bf16 %v1071_v25, %v1039_v24  ;;  %v339_v24 = vld [vmem:[%s4939_s20 + $0x2c8] sm:$0xff] }
 0x1ad   : > { %4162 = vmatprep.subr.bf16.mxu1 %v4161_v16  ;;  %v371_v25 = vld [vmem:[%s4939_s20 + $0x3c8] sm:$0xff] }
 0x1af   : > { %4100 = vmatpush1.bf16.msra.mxu0 %v4099_v51  ;;  %v849_v51 = vld [vmem:[%s4939_s20 + $0x12b8] sm:$0xff] }
 0x1b0   : > { %4164 = vmatpush1.bf16.msra.mxu1 %v4163_v52  ;;  %4102 = vmatprep.subr.bf16.mxu0 %v4101_v53  ;;  %v881_v52 = vld [vmem:[%s4939_s20 + $0x13b8] sm:$0xff]  ;;  %v4115_v53 = vpack.c.bf16 %v814_v43, %v782_v42 }
 0x1b1   : > { %v1493_v5 = vpop.f32.mrb[2].mxu0  ;;  %4166 = vmatprep.subr.bf16.mxu1 %v4165_v37  ;;  %v878_v37 = vld [vmem:[%s4939_s20 + $0x13a0] sm:$0xff]  ;;  %v4181_v58 = vpack.c.bf16 %v881_v52, %v849_v51  ;;  %v1169_v51 = vld [vmem:[%s4939_s20 + $0x1cb8] sm:$0xff] }
 0x1b2   : > { %v1564_v11 = vpop.f32.mrb[2].mxu1  ;;  %v1495_v12 = vpop.f32.mrb[3].mxu0  ;;  %v1201_v52 = vld [vmem:[%s4939_s20 + $0x1db8] sm:$0xff] }
 0x1b3   : > { %v2492_v15 = vcombine.low %v1493_v5, %v1495_v12  ;;  %v1566_v17 = vpop.f32.mrb[3].mxu1  ;;  %4104 = vmatpush1.bf16.msra.mxu0 %v4103_v62  ;;  %v913_v62 = vld [vmem:[%s4939_s20 + $0x14b8] sm:$0xff]  ;;  %v942_v5 = vld [vmem:[%s4939_s20 + $0x15a0] sm:$0xff] }
 0x1b4   : > { %v2525_v21 = vcombine.low %v1564_v11, %v1566_v17  ;;  %4168 = vmatpush1.bf16.msra.mxu1 %v4167_v63  ;;  %4106 = vmatprep.subr.bf16.mxu0 %v4105_v0  ;;  %v945_v63 = vld [vmem:[%s4939_s20 + $0x15b8] sm:$0xff]  ;;  %v4119_v0 = vpack.c.bf16 %v878_v37, %v846_v56  ;;  %v1007_v11 = vld [vmem:[%s4939_s20 + $0x17a8] sm:$0xff]  ;;  %v4123_v14 = vpack.c.bf16 %v942_v5, %v910_v4  ;;  %v1166_v56 = vld [vmem:[%s4939_s20 + $0x1ca0] sm:$0xff] }
 0x1b5   : > { %v2499_v27 = vrot.slane %v2492_v15, %v5554_v45  ;;  %4170 = vmatprep.subr.bf16.mxu1 %v4169_v6  ;;  %v912_v6 = vld [vmem:[%s4939_s20 + $0x14b0] sm:$0xff]  ;;  %v4185_v7 = vpack.c.bf16 %v945_v63, %v913_v62  ;;  %v977_v12 = vld [vmem:[%s4939_s20 + $0x16b8] sm:$0xff]  ;;  %v4125_v17 = vpack.c.bf16 %v1007_v11, %v975_v10  ;;  %v1198_v37 = vld [vmem:[%s4939_s20 + $0x1da0] sm:$0xff] }
 0x1b6   : > { %v2532_v31 = vrot.slane %v2525_v21, %v5554_v45  ;;  %v4187_v15 = vpack.c.bf16 %v944_v9, %v912_v6  ;;  %v976_v21 = vld [vmem:[%s4939_s20 + $0x16b0] sm:$0xff]  ;;  %v1233_v62 = vld [vmem:[%s4939_s20 + $0x1eb8] sm:$0xff]  ;;  %v1230_v4 = vld [vmem:[%s4939_s20 + $0x1ea0] sm:$0xff] }
 0x1b7   : > { %v2500_v34 = vcombine.high %v2499_v27, %v2499_v27  ;;  %v2507_v35 = vrot.slane %v2499_v27, %v5554_v45  ;;  %4108 = vmatpush1.bf16.msra.mxu0 %v4107_v18  ;;  %v974_v18 = vld [vmem:[%s4939_s20 + $0x16a0] sm:$0xff]  ;;  %v1073_v27 = vld [vmem:[%s4939_s20 + $0x19b8] sm:$0xff]  ;;  %v1232_v6 = vld [vmem:[%s4939_s20 + $0x1eb0] sm:$0xff] }
 0x1b8   : > { %v2533_v39 = vcombine.high %v2532_v31, %v2532_v31  ;;  %v2540_v40 = vrot.slane %v2532_v31, %v5554_v45  ;;  %4172 = vmatpush1.bf16.msra.mxu1 %v4171_v22  ;;  %4110 = vmatprep.subr.bf16.mxu0 %v4109_v23  ;;  %v4189_v22 = vpack.c.bf16 %v1009_v13, %v977_v12  ;;  %v1008_v23 = vld [vmem:[%s4939_s20 + $0x17b0] sm:$0xff]  ;;  %v1038_v31 = vld [vmem:[%s4939_s20 + $0x18a0] sm:$0xff]  ;;  %v1265_v63 = vld [vmem:[%s4939_s20 + $0x1fb8] sm:$0xff] }
 0x1b9   : > { %v2514_v16 = vrot.slane %v2500_v34, %v5554_v45  ;;  %2518 = vst.msk [vmem:[#allocation2 + $0x2] ss:$8 sm:$0x3] %vm5568_vm0, %v2507_v35  ;;  %4174 = vmatprep.subr.bf16.mxu1 %v4173_v28  ;;  %v4127_v28 = vpack.c.bf16 %v1006_v20, %v974_v18  ;;  %v4191_v29 = vpack.c.bf16 %v1008_v23, %v976_v21  ;;  %v1072_v35 = vld [vmem:[%s4939_s20 + $0x19b0] sm:$0xff]  ;;  %v1262_v5 = vld [vmem:[%s4939_s20 + $0x1fa0] sm:$0xff]  ;;  %v275_v10 = vld [vmem:[%s4939_s20 + $0xc8] sm:$0xff] }
 0x1ba   : > { %v2547_v50 = vrot.slane %v2533_v39, %v5554_v45  ;;  %2551 = vst.msk [vmem:[#allocation2 + $0x3] ss:$8 sm:$0x3] %vm5568_vm0, %v2540_v40  ;;  %v4193_v34 = vpack.c.bf16 %v1073_v27, %v1041_v26  ;;  %v1105_v39 = vld [vmem:[%s4939_s20 + $0x1ab8] sm:$0xff]  ;;  %v4195_v42 = vpack.c.bf16 %v1072_v35, %v1040_v33  ;;  %v1264_v9 = vld [vmem:[%s4939_s20 + $0x1fb0] sm:$0xff]  ;;  %v307_v11 = vld [vmem:[%s4939_s20 + $0x1c8] sm:$0xff] }
 0x1bb   : > { %2521 = vst.msk [vmem:[#allocation2 + $0x22] ss:$8 sm:$0x3] %vm5568_vm0, %v2514_v16  ;;  %4112 = vmatpush1.bf16.msra.mxu0 %v4111_v36  ;;  %v1103_v36 = vld [vmem:[%s4939_s20 + $0x1aa8] sm:$0xff]  ;;  %v1137_v40 = vld [vmem:[%s4939_s20 + $0x1bb8] sm:$0xff]  ;;  %v1134_v16 = vld [vmem:[%s4939_s20 + $0x1ba0] sm:$0xff] }
 0x1bc   : > { %2554 = vst.msk [vmem:[#allocation2 + $0x23] ss:$8 sm:$0x3] %vm5568_vm0, %v2547_v50  ;;  %4176 = vmatpush1.bf16.msra.mxu1 %v4175_v38  ;;  %4114 = vmatprep.subr.bf16.mxu0 %v4113_v41  ;;  %v1135_v38 = vld [vmem:[%s4939_s20 + $0x1ba8] sm:$0xff]  ;;  %v4131_v41 = vpack.c.bf16 %v1070_v32, %v1038_v31  ;;  %v4197_v47 = vpack.c.bf16 %v1137_v40, %v1105_v39  ;;  %v277_v12 = vld [vmem:[%s4939_s20 + $0xd8] sm:$0xff]  ;;  %v274_v18 = vld [vmem:[%s4939_s20 + $0xc0] sm:$0xff] }
 0x1bd   : > { %4178 = vmatprep.subr.bf16.mxu1 %v4177_v46  ;;  %v4133_v43 = vpack.c.bf16 %v1135_v38, %v1103_v36  ;;  %v1104_v46 = vld [vmem:[%s4939_s20 + $0x1ab0] sm:$0xff]  ;;  %v1199_v50 = vld [vmem:[%s4939_s20 + $0x1da8] sm:$0xff]  ;;  %v309_v13 = vld [vmem:[%s4939_s20 + $0x1d8] sm:$0xff] }
 0x1be   : > { %v306_v20 = vld [vmem:[%s4939_s20 + $0x1c0] sm:$0xff]  ;;  %v276_v21 = vld [vmem:[%s4939_s20 + $0xd0] sm:$0xff]  ;;  %v341_v26 = vld [vmem:[%s4939_s20 + $0x2d8] sm:$0xff] }
 0x1bf   : > { %4116 = vmatpush1.bf16.msra.mxu0 %v4115_v53  ;;  %v4135_v53 = vpack.c.bf16 %v1134_v16, %v1102_v44  ;;  %v308_v23 = vld [vmem:[%s4939_s20 + $0x1d0] sm:$0xff]  ;;  %v373_v27 = vld [vmem:[%s4939_s20 + $0x3d8] sm:$0xff]  ;;  %v338_v31 = vld [vmem:[%s4939_s20 + $0x2c0] sm:$0xff] }
 0x1c0   : > { %4180 = vmatpush1.bf16.msra.mxu1 %v4179_v54  ;;  %4118 = vmatprep.subr.bf16.mxu0 %v4117_v55  ;;  %v4199_v54 = vpack.c.bf16 %v1136_v48, %v1104_v46  ;;  %v4137_v55 = vpack.c.bf16 %v1199_v50, %v1167_v49  ;;  %v370_v32 = vld [vmem:[%s4939_s20 + $0x3c0] sm:$0xff]  ;;  %v340_v33 = vld [vmem:[%s4939_s20 + $0x2d0] sm:$0xff]  ;;  %v403_v36 = vld [vmem:[%s4939_s20 + $0x4c8] sm:$0xff] }
 0x1c1   : > { %4182 = vmatprep.subr.bf16.mxu1 %v4181_v58  ;;  %v4201_v58 = vpack.c.bf16 %v1201_v52, %v1169_v51  ;;  %v372_v35 = vld [vmem:[%s4939_s20 + $0x3d0] sm:$0xff]  ;;  %v435_v38 = vld [vmem:[%s4939_s20 + $0x5c8] sm:$0xff]  ;;  %v405_v39 = vld [vmem:[%s4939_s20 + $0x4d8] sm:$0xff] }
 0x1c2   : > { %v437_v40 = vld [vmem:[%s4939_s20 + $0x5d8] sm:$0xff]  ;;  %v402_v44 = vld [vmem:[%s4939_s20 + $0x4c0] sm:$0xff]  ;;  %v404_v46 = vld [vmem:[%s4939_s20 + $0x4d0] sm:$0xff] }
 0x1c3   : > { %4120 = vmatpush1.bf16.msra.mxu0 %v4119_v0  ;;  %v4139_v0 = vpack.c.bf16 %v1198_v37, %v1166_v56  ;;  %v434_v16 = vld [vmem:[%s4939_s20 + $0x5c0] sm:$0xff]  ;;  %v436_v48 = vld [vmem:[%s4939_s20 + $0x5d0] sm:$0xff]  ;;  %v467_v49 = vld [vmem:[%s4939_s20 + $0x6c8] sm:$0xff] }
 0x1c4   : > { %4184 = vmatpush1.bf16.msra.mxu1 %v4183_v1  ;;  %4122 = vmatprep.subr.bf16.mxu0 %v4121_v3  ;;  %v4203_v1 = vpack.c.bf16 %v1200_v59, %v1168_v57  ;;  %v4141_v3 = vpack.c.bf16 %v1263_v61, %v1231_v60  ;;  %v499_v50 = vld [vmem:[%s4939_s20 + $0x7c8] sm:$0xff]  ;;  %v501_v51 = vld [vmem:[%s4939_s20 + $0x7d8] sm:$0xff]  ;;  %v4219_v52 = vpack.c.bf16 %v434_v16, %v402_v44  ;;  %v498_v56 = vld [vmem:[%s4939_s20 + $0x7c0] sm:$0xff] }
 0x1c5   : > { %4186 = vmatprep.subr.bf16.mxu1 %v4185_v7  ;;  %v4205_v7 = vpack.c.bf16 %v1265_v63, %v1233_v62  ;;  %v468_v37 = vld [vmem:[%s4939_s20 + $0x6d0] sm:$0xff]  ;;  %v531_v59 = vld [vmem:[%s4939_s20 + $0x8c8] sm:$0xff]  ;;  %v533_v61 = vld [vmem:[%s4939_s20 + $0x8d8] sm:$0xff] }
 0x1c6   : > { %v563_v60 = vld [vmem:[%s4939_s20 + $0x9c8] sm:$0xff]  ;;  %v565_v62 = vld [vmem:[%s4939_s20 + $0x9d8] sm:$0xff] }
 0x1c7   : > { %4124 = vmatpush1.bf16.msra.mxu0 %v4123_v14  ;;  %v4143_v14 = vpack.c.bf16 %v1262_v5, %v1230_v4  ;;  %v562_v4 = vld [vmem:[%s4939_s20 + $0x9c0] sm:$0xff]  ;;  %v532_v5 = vld [vmem:[%s4939_s20 + $0x8d0] sm:$0xff] }
 0x1c8   : > { %4188 = vmatpush1.bf16.msra.mxu1 %v4187_v15  ;;  %4126 = vmatprep.subr.bf16.mxu0 %v4125_v17  ;;  %v4207_v15 = vpack.c.bf16 %v1264_v9, %v1232_v6  ;;  %v4209_v17 = vpack.c.bf16 %v307_v11, %v275_v10  ;;  %v4289_v6 = vpack.c.bf16 %v565_v62, %v533_v61  ;;  %v595_v9 = vld [vmem:[%s4939_s20 + $0xac8] sm:$0xff]  ;;  %v597_v11 = vld [vmem:[%s4939_s20 + $0xad8] sm:$0xff] }
 0x1c9   : > { %4190 = vmatprep.subr.bf16.mxu1 %v4189_v22  ;;  %v4273_v22 = vpack.c.bf16 %v309_v13, %v277_v12  ;;  %v627_v10 = vld [vmem:[%s4939_s20 + $0xbc8] sm:$0xff]  ;;  %v629_v12 = vld [vmem:[%s4939_s20 + $0xbd8] sm:$0xff] }
 0x1cb   : > { %4128 = vmatpush1.bf16.msra.mxu0 %v4127_v28  ;;  %v4211_v28 = vpack.c.bf16 %v306_v20, %v274_v18  ;;  %v626_v18 = vld [vmem:[%s4939_s20 + $0xbc0] sm:$0xff]  ;;  %v596_v20 = vld [vmem:[%s4939_s20 + $0xad0] sm:$0xff] }
 0x1cc   : > { %4192 = vmatpush1.bf16.msra.mxu1 %v4191_v29  ;;  %4130 = vmatprep.subr.bf16.mxu0 %v4129_v30  ;;  %v4275_v29 = vpack.c.bf16 %v308_v23, %v276_v21  ;;  %v4213_v30 = vpack.c.bf16 %v371_v25, %v339_v24  ;;  %v4293_v21 = vpack.c.bf16 %v629_v12, %v597_v11  ;;  %v659_v23 = vld [vmem:[%s4939_s20 + $0xcc8] sm:$0xff]  ;;  %v661_v25 = vld [vmem:[%s4939_s20 + $0xcd8] sm:$0xff] }
 0x1cd   : > { %4194 = vmatprep.subr.bf16.mxu1 %v4193_v34  ;;  %v4277_v34 = vpack.c.bf16 %v373_v27, %v341_v26  ;;  %v691_v24 = vld [vmem:[%s4939_s20 + $0xdc8] sm:$0xff]  ;;  %v693_v26 = vld [vmem:[%s4939_s20 + $0xdd8] sm:$0xff] }
 0x1ce   : > { %v853_v12 = vld [vmem:[%s4939_s20 + $0x12d8] sm:$0xff] }
 0x1cf   : > { %4132 = vmatpush1.bf16.msra.mxu0 %v4131_v41  ;;  %v4215_v41 = vpack.c.bf16 %v370_v32, %v338_v31  ;;  %v690_v31 = vld [vmem:[%s4939_s20 + $0xdc0] sm:$0xff]  ;;  %v660_v32 = vld [vmem:[%s4939_s20 + $0xcd0] sm:$0xff] }
 0x1d0   : > { %4196 = vmatpush1.bf16.msra.mxu1 %v4195_v42  ;;  %4134 = vmatprep.subr.bf16.mxu0 %v4133_v43  ;;  %v4279_v42 = vpack.c.bf16 %v372_v35, %v340_v33  ;;  %v4217_v43 = vpack.c.bf16 %v435_v38, %v403_v36  ;;  %v692_v35 = vld [vmem:[%s4939_s20 + $0xdd0] sm:$0xff]  ;;  %v723_v36 = vld [vmem:[%s4939_s20 + $0xec8] sm:$0xff] }
 0x1d1   : > { %4198 = vmatprep.subr.bf16.mxu1 %v4197_v47  ;;  %v4281_v47 = vpack.c.bf16 %v437_v40, %v405_v39  ;;  %v755_v38 = vld [vmem:[%s4939_s20 + $0xfc8] sm:$0xff] }
 0x1d3   : > { %4136 = vmatpush1.bf16.msra.mxu0 %v4135_v53  ;;  %v4283_v53 = vpack.c.bf16 %v436_v48, %v404_v46  ;;  %v722_v46 = vld [vmem:[%s4939_s20 + $0xec0] sm:$0xff]  ;;  %v4299_v48 = vpack.c.bf16 %v692_v35, %v660_v32  ;;  %v948_v35 = vld [vmem:[%s4939_s20 + $0x15d0] sm:$0xff] }
 0x1d4   : > { %4200 = vmatpush1.bf16.msra.mxu1 %v4199_v54  ;;  %4138 = vmatprep.subr.bf16.mxu0 %v4137_v55  ;;  %v4221_v54 = vpack.c.bf16 %v499_v50, %v467_v49  ;;  %v466_v55 = vld [vmem:[%s4939_s20 + $0x6c0] sm:$0xff]  ;;  %v4237_v49 = vpack.c.bf16 %v755_v38, %v723_v36  ;;  %v979_v36 = vld [vmem:[%s4939_s20 + $0x16c8] sm:$0xff] }
 0x1d5   : > { %4202 = vmatprep.subr.bf16.mxu1 %v4201_v58  ;;  %v500_v58 = vld [vmem:[%s4939_s20 + $0x7d0] sm:$0xff]  ;;  %v4223_v63 = vpack.c.bf16 %v498_v56, %v466_v55  ;;  %v754_v50 = vld [vmem:[%s4939_s20 + $0xfc0] sm:$0xff]  ;;  %v819_v55 = vld [vmem:[%s4939_s20 + $0x11c8] sm:$0xff] }
 0x1d6   : > { %v946_v32 = vld [vmem:[%s4939_s20 + $0x15c0] sm:$0xff]  ;;  %v1011_v38 = vld [vmem:[%s4939_s20 + $0x17c8] sm:$0xff] }
 0x1d7   : > { %4140 = vmatpush1.bf16.msra.mxu0 %v4139_v0  ;;  %v4287_v0 = vpack.c.bf16 %v500_v58, %v468_v37  ;;  %v789_v37 = vld [vmem:[%s4939_s20 + $0x10d8] sm:$0xff] }
 0x1d8   : > { %4204 = vmatpush1.bf16.msra.mxu1 %v4203_v1  ;;  %4142 = vmatprep.subr.bf16.mxu0 %v4141_v3  ;;  %v4225_v1 = vpack.c.bf16 %v563_v60, %v531_v59  ;;  %v530_v3 = vld [vmem:[%s4939_s20 + $0x8c0] sm:$0xff]  ;;  %v4239_v60 = vpack.c.bf16 %v754_v50, %v722_v46  ;;  %v980_v46 = vld [vmem:[%s4939_s20 + $0x16d0] sm:$0xff]  ;;  %v1075_v50 = vld [vmem:[%s4939_s20 + $0x19c8] sm:$0xff] }
 0x1d9   : > { %4206 = vmatprep.subr.bf16.mxu1 %v4205_v7  ;;  %v564_v7 = vld [vmem:[%s4939_s20 + $0x9d0] sm:$0xff]  ;;  %v4227_v13 = vpack.c.bf16 %v562_v4, %v530_v3  ;;  %v818_v3 = vld [vmem:[%s4939_s20 + $0x11c0] sm:$0xff] }
 0x1da   : > { %v788_v4 = vld [vmem:[%s4939_s20 + $0x10d0] sm:$0xff] }
 0x1db   : > { %4144 = vmatpush1.bf16.msra.mxu0 %v4143_v14  ;;  %v4291_v14 = vpack.c.bf16 %v564_v7, %v532_v5  ;;  %v820_v7 = vld [vmem:[%s4939_s20 + $0x11d0] sm:$0xff] }
 0x1dc   : > { %4208 = vmatpush1.bf16.msra.mxu1 %v4207_v15  ;;  %4210 = vmatprep.subr.bf16.mxu0 %v4209_v17  ;;  %v4229_v15 = vpack.c.bf16 %v627_v10, %v595_v9  ;;  %v594_v17 = vld [vmem:[%s4939_s20 + $0xac0] sm:$0xff]  ;;  %v851_v9 = vld [vmem:[%s4939_s20 + $0x12c8] sm:$0xff] }
 0x1dd   : > { %4274 = vmatprep.subr.bf16.mxu1 %v4273_v22  ;;  %v628_v22 = vld [vmem:[%s4939_s20 + $0xbd0] sm:$0xff]  ;;  %v4231_v27 = vpack.c.bf16 %v626_v18, %v594_v17  ;;  %v883_v10 = vld [vmem:[%s4939_s20 + $0x13c8] sm:$0xff]  ;;  %v850_v18 = vld [vmem:[%s4939_s20 + $0x12c0] sm:$0xff] }
 0x1de   : > { %2060 = vmatmul.mubr.f32.vlgmr.msra.gmra.mrb[10].mxu0 %v5665_v8  ;;  %v4245_v17 = vpack.c.bf16 %v883_v10, %v851_v9  ;;  %v1171_v9 = vld [vmem:[%s4939_s20 + $0x1cc8] sm:$0xff] }
 0x1df   : > { %2131 = vmatmul.mubr.f32.vlgmr.msra.gmra.mrb[10].mxu1 %v5665_v8  ;;  %4212 = vmatpush1.bf16.msra.mxu0 %v4211_v28  ;;  %v469_v8 = vld [vmem:[%s4939_s20 + $0x6d8] sm:$0xff]  ;;  %v4295_v28 = vpack.c.bf16 %v628_v22, %v596_v20  ;;  %v882_v20 = vld [vmem:[%s4939_s20 + $0x13c0] sm:$0xff]  ;;  %v1203_v10 = vld [vmem:[%s4939_s20 + $0x1dc8] sm:$0xff] }
 0x1e0   : > { %4276 = vmatpush1.bf16.msra.mxu1 %v4275_v29  ;;  %4214 = vmatprep.subr.bf16.mxu0 %v4213_v30  ;;  %v4285_v57 = vpack.c.bf16 %v501_v51, %v469_v8  ;;  %v4233_v29 = vpack.c.bf16 %v691_v24, %v659_v23  ;;  %v658_v30 = vld [vmem:[%s4939_s20 + $0xcc0] sm:$0xff]  ;;  %v724_v8 = vld [vmem:[%s4939_s20 + $0xed0] sm:$0xff]  ;;  %v915_v24 = vld [vmem:[%s4939_s20 + $0x14c8] sm:$0xff] }
 0x1e1   : > { %4278 = vmatprep.subr.bf16.mxu1 %v4277_v34  ;;  %2201 = vmatprep.mubr.f32.mxu0 %v5049_v19  ;;  %v4297_v34 = vpack.c.bf16 %v693_v26, %v661_v25  ;;  %v4235_v16 = vpack.c.bf16 %v690_v31, %v658_v30  ;;  %v756_v51 = vld [vmem:[%s4939_s20 + $0xfd0] sm:$0xff]  ;;  %v947_v25 = vld [vmem:[%s4939_s20 + $0x15c8] sm:$0xff]  ;;  %v917_v26 = vld [vmem:[%s4939_s20 + $0x14d8] sm:$0xff] }
 0x1e2   : > { %2272 = vmatprep.mubr.f32.mxu1 %v5049_v19  ;;  %v4303_v61 = vpack.c.bf16 %v756_v51, %v724_v8  ;;  %v884_v23 = vld [vmem:[%s4939_s20 + $0x13d0] sm:$0xff]  ;;  %v4249_v30 = vpack.c.bf16 %v947_v25, %v915_v24  ;;  %v914_v31 = vld [vmem:[%s4939_s20 + $0x14c0] sm:$0xff]  ;;  %v1045_v8 = vld [vmem:[%s4939_s20 + $0x18d8] sm:$0xff] }
 0x1e3   : > { %4216 = vmatpush1.bf16.msra.mxu0 %v4215_v41  ;;  %v725_v41 = vld [vmem:[%s4939_s20 + $0xed8] sm:$0xff]  ;;  %v1267_v24 = vld [vmem:[%s4939_s20 + $0x1fc8] sm:$0xff] }
 0x1e4   : > { %4280 = vmatpush1.bf16.msra.mxu1 %v4279_v42  ;;  %4218 = vmatprep.subr.bf16.mxu0 %v4217_v43  ;;  %v757_v42 = vld [vmem:[%s4939_s20 + $0xfd8] sm:$0xff] }
 0x1e5   : > { %4282 = vmatprep.subr.bf16.mxu1 %v4281_v47  ;;  %v1077_v51 = vld [vmem:[%s4939_s20 + $0x19d8] sm:$0xff] }
 0x1e6   : > { %v1237_v25 = vld [vmem:[%s4939_s20 + $0x1ed8] sm:$0xff] }
 0x1e7   : > { %4220 = vmatpush1.bf16.msra.mxu0 %v4219_v52 }
 0x1e8   : > { %4284 = vmatpush1.bf16.msra.mxu1 %v4283_v53  ;;  %4222 = vmatprep.subr.bf16.mxu0 %v4221_v54  ;;  %v4301_v53 = vpack.c.bf16 %v757_v42, %v725_v41  ;;  %v787_v54 = vld [vmem:[%s4939_s20 + $0x10c8] sm:$0xff]  ;;  %v4251_v41 = vpack.c.bf16 %v946_v32, %v914_v31  ;;  %v1266_v31 = vld [vmem:[%s4939_s20 + $0x1fc0] sm:$0xff]  ;;  %v1236_v32 = vld [vmem:[%s4939_s20 + $0x1ed0] sm:$0xff] }
 0x1e9   : > { %4286 = vmatprep.subr.bf16.mxu1 %v4285_v57  ;;  %v821_v57 = vld [vmem:[%s4939_s20 + $0x11d8] sm:$0xff] }
 0x1eb   : > { %4224 = vmatpush1.bf16.msra.mxu0 %v4223_v63 }
 0x1ec   : > { %4288 = vmatpush1.bf16.msra.mxu1 %v4287_v0  ;;  %4226 = vmatprep.subr.bf16.mxu0 %v4225_v1  ;;  %v4241_v0 = vpack.c.bf16 %v819_v55, %v787_v54  ;;  %v786_v1 = vld [vmem:[%s4939_s20 + $0x10c0] sm:$0xff] }
 0x1ed   : > { %4290 = vmatprep.subr.bf16.mxu1 %v4289_v6  ;;  %v4305_v6 = vpack.c.bf16 %v821_v57, %v789_v37  ;;  %v1042_v55 = vld [vmem:[%s4939_s20 + $0x18c0] sm:$0xff]  ;;  %v1044_v37 = vld [vmem:[%s4939_s20 + $0x18d0] sm:$0xff]  ;;  %v4321_v57 = vpack.c.bf16 %v1077_v51, %v1045_v8  ;;  %v377_v8 = vld [vmem:[%s4939_s20 + $0x3f8] sm:$0xff] }
 0x1ef   : > { %4228 = vmatpush1.bf16.msra.mxu0 %v4227_v13  ;;  %v885_v13 = vld [vmem:[%s4939_s20 + $0x13d8] sm:$0xff] }
 0x1f0   : > { %4292 = vmatpush1.bf16.msra.mxu1 %v4291_v14  ;;  %4230 = vmatprep.subr.bf16.mxu0 %v4229_v15  ;;  %v4243_v14 = vpack.c.bf16 %v818_v3, %v786_v1  ;;  %v4307_v15 = vpack.c.bf16 %v820_v7, %v788_v4  ;;  %v4309_v22 = vpack.c.bf16 %v885_v13, %v853_v12  ;;  %v1106_v3 = vld [vmem:[%s4939_s20 + $0x1ac0] sm:$0xff]  ;;  %v1140_v7 = vld [vmem:[%s4939_s20 + $0x1bd0] sm:$0xff]  ;;  %v1205_v12 = vld [vmem:[%s4939_s20 + $0x1dd8] sm:$0xff] }
 0x1f1   : > { %v1635_v33 = vpop.f32.mrb[4].mxu0  ;;  %4294 = vmatprep.subr.bf16.mxu1 %v4293_v21  ;;  %v852_v21 = vld [vmem:[%s4939_s20 + $0x12d0] sm:$0xff]  ;;  %v1138_v4 = vld [vmem:[%s4939_s20 + $0x1bc0] sm:$0xff] }
 0x1f2   : > { %v1706_v39 = vpop.f32.mrb[4].mxu1  ;;  %v1637_v40 = vpop.f32.mrb[5].mxu0  ;;  %v4263_v13 = vpack.c.bf16 %v1138_v4, %v1106_v3  ;;  %v406_v3 = vld [vmem:[%s4939_s20 + $0x4e0] sm:$0xff] }
 0x1f3   : > { %v2558_v43 = vcombine.low %v1635_v33, %v1637_v40  ;;  %v1708_v44 = vpop.f32.mrb[5].mxu1  ;;  %4232 = vmatpush1.bf16.msra.mxu0 %v4231_v27  ;;  %v949_v27 = vld [vmem:[%s4939_s20 + $0x15d8] sm:$0xff]  ;;  %v916_v33 = vld [vmem:[%s4939_s20 + $0x14d0] sm:$0xff]  ;;  %v438_v4 = vld [vmem:[%s4939_s20 + $0x5e0] sm:$0xff] }
 0x1f4   : > { %v2591_v47 = vcombine.low %v1706_v39, %v1708_v44  ;;  %4296 = vmatpush1.bf16.msra.mxu1 %v4295_v28  ;;  %4234 = vmatprep.subr.bf16.mxu0 %v4233_v29  ;;  %v4247_v28 = vpack.c.bf16 %v882_v20, %v850_v18  ;;  %v4311_v29 = vpack.c.bf16 %v884_v23, %v852_v21  ;;  %v981_v39 = vld [vmem:[%s4939_s20 + $0x16d8] sm:$0xff]  ;;  %v978_v44 = vld [vmem:[%s4939_s20 + $0x16c0] sm:$0xff]  ;;  %v1172_v20 = vld [vmem:[%s4939_s20 + $0x1cd0] sm:$0xff] }
 0x1f5   : > { %v2565_v52 = vrot.slane %v2558_v43, %v5554_v45  ;;  %4298 = vmatprep.subr.bf16.mxu1 %v4297_v34  ;;  %v4313_v34 = vpack.c.bf16 %v949_v27, %v917_v26  ;;  %v1013_v40 = vld [vmem:[%s4939_s20 + $0x17d8] sm:$0xff]  ;;  %v4315_v42 = vpack.c.bf16 %v948_v35, %v916_v33  ;;  %v4253_v43 = vpack.c.bf16 %v1011_v38, %v979_v36  ;;  %v1202_v18 = vld [vmem:[%s4939_s20 + $0x1dc0] sm:$0xff]  ;;  %v1235_v23 = vld [vmem:[%s4939_s20 + $0x1ec8] sm:$0xff] }
 0x1f6   : > { %v2598_v56 = vrot.slane %v2591_v47, %v5554_v45  ;;  %v4317_v47 = vpack.c.bf16 %v1013_v40, %v981_v39  ;;  %v1269_v26 = vld [vmem:[%s4939_s20 + $0x1fd8] sm:$0xff]  ;;  %v279_v35 = vld [vmem:[%s4939_s20 + $0xe8] sm:$0xff] }
 0x1f7   : > { %v2566_v58 = vcombine.high %v2565_v52, %v2565_v52  ;;  %v2573_v59 = vrot.slane %v2565_v52, %v5554_v45  ;;  %4236 = vmatpush1.bf16.msra.mxu0 %v4235_v16  ;;  %v1010_v16 = vld [vmem:[%s4939_s20 + $0x17c0] sm:$0xff]  ;;  %v4333_v33 = vpack.c.bf16 %v1269_v26, %v1237_v25  ;;  %v311_v36 = vld [vmem:[%s4939_s20 + $0x1e8] sm:$0xff]  ;;  %v281_v38 = vld [vmem:[%s4939_s20 + $0xf8] sm:$0xff] }
 0x1f8   : > { %v2599_v62 = vcombine.high %v2598_v56, %v2598_v56  ;;  %v2606_v63 = vrot.slane %v2598_v56, %v5554_v45  ;;  %4300 = vmatpush1.bf16.msra.mxu1 %v4299_v48  ;;  %4238 = vmatprep.subr.bf16.mxu0 %v4237_v49  ;;  %v1012_v48 = vld [vmem:[%s4939_s20 + $0x17d0] sm:$0xff]  ;;  %v1043_v49 = vld [vmem:[%s4939_s20 + $0x18c8] sm:$0xff]  ;;  %v4255_v52 = vpack.c.bf16 %v1010_v16, %v978_v44  ;;  %v1074_v56 = vld [vmem:[%s4939_s20 + $0x19c0] sm:$0xff] }
 0x1f9   : > { %v2580_v5 = vrot.slane %v2566_v58, %v5554_v45  ;;  %2584 = vst.msk [vmem:[#allocation2 + $0x4] ss:$8 sm:$0x3] %vm5568_vm0, %v2573_v59  ;;  %4302 = vmatprep.subr.bf16.mxu1 %v4301_v53  ;;  %v4319_v53 = vpack.c.bf16 %v1012_v48, %v980_v46  ;;  %v4257_v54 = vpack.c.bf16 %v1075_v50, %v1043_v49  ;;  %v1076_v58 = vld [vmem:[%s4939_s20 + $0x19d0] sm:$0xff]  ;;  %v1107_v59 = vld [vmem:[%s4939_s20 + $0x1ac8] sm:$0xff]  ;;  %v313_v39 = vld [vmem:[%s4939_s20 + $0x1f8] sm:$0xff] }
 0x1fa   : > { %v2613_v11 = vrot.slane %v2599_v62, %v5554_v45  ;;  %2617 = vst.msk [vmem:[#allocation2 + $0x5] ss:$8 sm:$0x3] %vm5568_vm0, %v2606_v63  ;;  %v1141_v62 = vld [vmem:[%s4939_s20 + $0x1bd8] sm:$0xff]  ;;  %v4259_v63 = vpack.c.bf16 %v1074_v56, %v1042_v55  ;;  %v310_v44 = vld [vmem:[%s4939_s20 + $0x1e0] sm:$0xff]  ;;  %v280_v16 = vld [vmem:[%s4939_s20 + $0xf0] sm:$0xff]  ;;  %v4401_v46 = vpack.c.bf16 %v313_v39, %v281_v38 }
 0x1fb   : > { %2587 = vst.msk [vmem:[#allocation2 + $0x24] ss:$8 sm:$0x3] %vm5568_vm0, %v2580_v5  ;;  %4240 = vmatpush1.bf16.msra.mxu0 %v4239_v60  ;;  %v1139_v60 = vld [vmem:[%s4939_s20 + $0x1bc8] sm:$0xff]  ;;  %v1108_v5 = vld [vmem:[%s4939_s20 + $0x1ad0] sm:$0xff]  ;;  %v345_v50 = vld [vmem:[%s4939_s20 + $0x2f8] sm:$0xff] }
 0x1fc   : > { %2620 = vst.msk [vmem:[#allocation2 + $0x25] ss:$8 sm:$0x3] %vm5568_vm0, %v2613_v11  ;;  %4304 = vmatpush1.bf16.msra.mxu1 %v4303_v61  ;;  %4242 = vmatprep.subr.bf16.mxu0 %v4241_v0  ;;  %v1109_v61 = vld [vmem:[%s4939_s20 + $0x1ad8] sm:$0xff]  ;;  %v4323_v0 = vpack.c.bf16 %v1076_v58, %v1044_v37  ;;  %v4261_v1 = vpack.c.bf16 %v1139_v60, %v1107_v59  ;;  %v343_v48 = vld [vmem:[%s4939_s20 + $0x2e8] sm:$0xff]  ;;  %v374_v55 = vld [vmem:[%s4939_s20 + $0x3e0] sm:$0xff] }
 0x1fd   : > { %4306 = vmatprep.subr.bf16.mxu1 %v4305_v6  ;;  %v4325_v6 = vpack.c.bf16 %v1141_v62, %v1109_v61  ;;  %v1173_v11 = vld [vmem:[%s4939_s20 + $0x1cd8] sm:$0xff]  ;;  %v375_v49 = vld [vmem:[%s4939_s20 + $0x3e8] sm:$0xff]  ;;  %v344_v56 = vld [vmem:[%s4939_s20 + $0x2f0] sm:$0xff]  ;;  %v4405_v37 = vpack.c.bf16 %v377_v8, %v345_v50 }
 0x1fe   : > { %v4329_v21 = vpack.c.bf16 %v1205_v12, %v1173_v11  ;;  %v407_v58 = vld [vmem:[%s4939_s20 + $0x4e8] sm:$0xff]  ;;  %v5960_v60 = vld.sshfl [vmem:[#allocation3] sm:$0x33 pattern:$0x76325410] }
 0x1ff   : > { %4244 = vmatpush1.bf16.msra.mxu0 %v4243_v14  ;;  %v4327_v14 = vpack.c.bf16 %v1140_v7, %v1108_v5  ;;  %v439_v59 = vld [vmem:[%s4939_s20 + $0x5e8] sm:$0xff]  ;;  %v409_v61 = vld [vmem:[%s4939_s20 + $0x4f8] sm:$0xff]  ;;  %v408_v5 = vld [vmem:[%s4939_s20 + $0x4f0] sm:$0xff] }
 0x200   : > { %4308 = vmatpush1.bf16.msra.mxu1 %v4307_v15  ;;  %4246 = vmatprep.subr.bf16.mxu0 %v4245_v17  ;;  %v4265_v15 = vpack.c.bf16 %v1203_v10, %v1171_v9  ;;  %v1170_v17 = vld [vmem:[%s4939_s20 + $0x1cc0] sm:$0xff]  ;;  %v441_v62 = vld [vmem:[%s4939_s20 + $0x5f8] sm:$0xff]  ;;  %v440_v7 = vld [vmem:[%s4939_s20 + $0x5f0] sm:$0xff] }
 0x201   : > { %4310 = vmatprep.subr.bf16.mxu1 %v4309_v22  ;;  %v1204_v22 = vld [vmem:[%s4939_s20 + $0x1dd0] sm:$0xff]  ;;  %v4267_v27 = vpack.c.bf16 %v1202_v18, %v1170_v17  ;;  %v471_v9 = vld [vmem:[%s4939_s20 + $0x6e8] sm:$0xff]  ;;  %v473_v11 = vld [vmem:[%s4939_s20 + $0x6f8] sm:$0xff] }
 0x202   : > { %v503_v10 = vld [vmem:[%s4939_s20 + $0x7e8] sm:$0xff]  ;;  %v505_v12 = vld [vmem:[%s4939_s20 + $0x7f8] sm:$0xff]  ;;  %v470_v17 = vld [vmem:[%s4939_s20 + $0x6e0] sm:$0xff] }
 0x203   : > { %4248 = vmatpush1.bf16.msra.mxu0 %v4247_v28  ;;  %v4331_v28 = vpack.c.bf16 %v1204_v22, %v1172_v20  ;;  %v502_v18 = vld [vmem:[%s4939_s20 + $0x7e0] sm:$0xff]  ;;  %v472_v20 = vld [vmem:[%s4939_s20 + $0x6f0] sm:$0xff]  ;;  %v569_v25 = vld [vmem:[%s4939_s20 + $0x9f8] sm:$0xff] }
 0x204   : > { %4312 = vmatpush1.bf16.msra.mxu1 %v4311_v29  ;;  %4250 = vmatprep.subr.bf16.mxu0 %v4249_v30  ;;  %v4269_v29 = vpack.c.bf16 %v1267_v24, %v1235_v23  ;;  %v1234_v30 = vld [vmem:[%s4939_s20 + $0x1ec0] sm:$0xff]  ;;  %v504_v22 = vld [vmem:[%s4939_s20 + $0x7f0] sm:$0xff]  ;;  %v535_v23 = vld [vmem:[%s4939_s20 + $0x8e8] sm:$0xff]  ;;  %v4351_v26 = vpack.c.bf16 %v502_v18, %v470_v17 }
 0x205   : > { %4314 = vmatprep.subr.bf16.mxu1 %v4313_v34  ;;  %v1268_v34 = vld [vmem:[%s4939_s20 + $0x1fd0] sm:$0xff]  ;;  %v4271_v40 = vpack.c.bf16 %v1266_v31, %v1234_v30  ;;  %v537_v24 = vld [vmem:[%s4939_s20 + $0x8f8] sm:$0xff]  ;;  %v566_v30 = vld [vmem:[%s4939_s20 + $0x9e0] sm:$0xff] }
 0x206   : > { %v536_v31 = vld [vmem:[%s4939_s20 + $0x8f0] sm:$0xff]  ;;  %v633_v38 = vld [vmem:[%s4939_s20 + $0xbf8] sm:$0xff]  ;;  %v823_v17 = vld [vmem:[%s4939_s20 + $0x11e8] sm:$0xff] }
 0x207   : > { %4252 = vmatpush1.bf16.msra.mxu0 %v4251_v41  ;;  %v4335_v41 = vpack.c.bf16 %v1268_v34, %v1236_v32  ;;  %v4417_v32 = vpack.c.bf16 %v569_v25, %v537_v24  ;;  %v599_v34 = vld [vmem:[%s4939_s20 + $0xae8] sm:$0xff]  ;;  %v697_v50 = vld [vmem:[%s4939_s20 + $0xdf8] sm:$0xff] }
 0x208   : > { %4316 = vmatpush1.bf16.msra.mxu1 %v4315_v42  ;;  %4254 = vmatprep.subr.bf16.mxu0 %v4253_v43  ;;  %v4337_v42 = vpack.c.bf16 %v311_v36, %v279_v35  ;;  %v278_v43 = vld [vmem:[%s4939_s20 + $0xe0] sm:$0xff]  ;;  %v631_v35 = vld [vmem:[%s4939_s20 + $0xbe8] sm:$0xff]  ;;  %v601_v36 = vld [vmem:[%s4939_s20 + $0xaf8] sm:$0xff] }
 0x209   : > { %4318 = vmatprep.subr.bf16.mxu1 %v4317_v47  ;;  %v312_v47 = vld [vmem:[%s4939_s20 + $0x1f0] sm:$0xff]  ;;  %v4339_v51 = vpack.c.bf16 %v310_v44, %v278_v43  ;;  %v630_v43 = vld [vmem:[%s4939_s20 + $0xbe0] sm:$0xff] }
 0x20a   : > { %v600_v44 = vld [vmem:[%s4939_s20 + $0xaf0] sm:$0xff] }
 0x20b   : > { %4256 = vmatpush1.bf16.msra.mxu0 %v4255_v52  ;;  %v4403_v52 = vpack.c.bf16 %v312_v47, %v280_v16  ;;  %v4421_v16 = vpack.c.bf16 %v633_v38, %v601_v36  ;;  %v663_v47 = vld [vmem:[%s4939_s20 + $0xce8] sm:$0xff]  ;;  %v857_v38 = vld [vmem:[%s4939_s20 + $0x12f8] sm:$0xff] }
 0x20c   : > { %4320 = vmatpush1.bf16.msra.mxu1 %v4319_v53  ;;  %4258 = vmatprep.subr.bf16.mxu0 %v4257_v54  ;;  %v4341_v53 = vpack.c.bf16 %v375_v49, %v343_v48  ;;  %v342_v54 = vld [vmem:[%s4939_s20 + $0x2e0] sm:$0xff]  ;;  %v695_v48 = vld [vmem:[%s4939_s20 + $0xde8] sm:$0xff]  ;;  %v665_v49 = vld [vmem:[%s4939_s20 + $0xcf8] sm:$0xff] }
 0x20d   : > { %4322 = vmatprep.subr.bf16.mxu1 %v4321_v57  ;;  %v376_v57 = vld [vmem:[%s4939_s20 + $0x3f0] sm:$0xff] }
 0x20f   : > { %4260 = vmatpush1.bf16.msra.mxu0 %v4259_v63  ;;  %v4343_v63 = vpack.c.bf16 %v374_v55, %v342_v54  ;;  %v694_v54 = vld [vmem:[%s4939_s20 + $0xde0] sm:$0xff]  ;;  %v664_v55 = vld [vmem:[%s4939_s20 + $0xcf0] sm:$0xff] }
 0x210   : > { %4324 = vmatpush1.bf16.msra.mxu1 %v4323_v0  ;;  %4262 = vmatprep.subr.bf16.mxu0 %v4261_v1  ;;  %v4407_v0 = vpack.c.bf16 %v376_v57, %v344_v56  ;;  %v4345_v1 = vpack.c.bf16 %v439_v59, %v407_v58  ;;  %v696_v57 = vld [vmem:[%s4939_s20 + $0xdf0] sm:$0xff]  ;;  %v727_v58 = vld [vmem:[%s4939_s20 + $0xee8] sm:$0xff] }
 0x211   : > { %4326 = vmatprep.subr.bf16.mxu1 %v4325_v6  ;;  %v4409_v6 = vpack.c.bf16 %v441_v62, %v409_v61  ;;  %v759_v59 = vld [vmem:[%s4939_s20 + $0xfe8] sm:$0xff] }
 0x213   : > { %4264 = vmatpush1.bf16.msra.mxu0 %v4263_v13  ;;  %v4347_v13 = vpack.c.bf16 %v438_v4, %v406_v3 }
 0x214   : > { %4328 = vmatpush1.bf16.msra.mxu1 %v4327_v14  ;;  %4266 = vmatprep.subr.bf16.mxu0 %v4265_v15  ;;  %v4411_v14 = vpack.c.bf16 %v440_v7, %v408_v5  ;;  %v4349_v15 = vpack.c.bf16 %v503_v10, %v471_v9  ;;  %v726_v5 = vld [vmem:[%s4939_s20 + $0xee0] sm:$0xff]  ;;  %v4427_v7 = vpack.c.bf16 %v696_v57, %v664_v55  ;;  %v952_v57 = vld [vmem:[%s4939_s20 + $0x15f0] sm:$0xff] }
 0x215   : > { %4330 = vmatprep.subr.bf16.mxu1 %v4329_v21  ;;  %v4413_v21 = vpack.c.bf16 %v505_v12, %v473_v11  ;;  %v4365_v9 = vpack.c.bf16 %v759_v59, %v727_v58  ;;  %v758_v10 = vld [vmem:[%s4939_s20 + $0xfe0] sm:$0xff]  ;;  %v728_v11 = vld [vmem:[%s4939_s20 + $0xef0] sm:$0xff] }
 0x216   : > { %v760_v12 = vld [vmem:[%s4939_s20 + $0xff0] sm:$0xff] }
 0x217   : > { %4268 = vmatpush1.bf16.msra.mxu0 %v4267_v27  ;;  %v4415_v27 = vpack.c.bf16 %v504_v22, %v472_v20  ;;  %v793_v20 = vld [vmem:[%s4939_s20 + $0x10f8] sm:$0xff]  ;;  %v4431_v24 = vpack.c.bf16 %v760_v12, %v728_v11 }
 0x218   : > { %4332 = vmatpush1.bf16.msra.mxu1 %v4331_v28  ;;  %4270 = vmatprep.subr.bf16.mxu0 %v4269_v29  ;;  %v534_v29 = vld [vmem:[%s4939_s20 + $0x8e0] sm:$0xff] }
 0x219   : > { %4334 = vmatprep.subr.bf16.mxu1 %v4333_v33  ;;  %v568_v33 = vld [vmem:[%s4939_s20 + $0x9f0] sm:$0xff]  ;;  %v4355_v39 = vpack.c.bf16 %v566_v30, %v534_v29  ;;  %v822_v29 = vld [vmem:[%s4939_s20 + $0x11e0] sm:$0xff] }
 0x21a   : > { %v792_v30 = vld [vmem:[%s4939_s20 + $0x10f0] sm:$0xff] }
 0x21b   : > { %4272 = vmatpush1.bf16.msra.mxu0 %v4271_v40  ;;  %v4419_v40 = vpack.c.bf16 %v568_v33, %v536_v31  ;;  %v824_v33 = vld [vmem:[%s4939_s20 + $0x11f0] sm:$0xff] }
 0x21c   : > { %4336 = vmatpush1.bf16.msra.mxu1 %v4335_v41  ;;  %4338 = vmatprep.subr.bf16.mxu0 %v4337_v42  ;;  %v4357_v41 = vpack.c.bf16 %v631_v35, %v599_v34  ;;  %v598_v42 = vld [vmem:[%s4939_s20 + $0xae0] sm:$0xff]  ;;  %v855_v34 = vld [vmem:[%s4939_s20 + $0x12e8] sm:$0xff] }
 0x21d   : > { %4402 = vmatprep.subr.bf16.mxu1 %v4401_v46  ;;  %v632_v46 = vld [vmem:[%s4939_s20 + $0xbf0] sm:$0xff]  ;;  %v4359_v8 = vpack.c.bf16 %v630_v43, %v598_v42  ;;  %v887_v35 = vld [vmem:[%s4939_s20 + $0x13e8] sm:$0xff]  ;;  %v854_v43 = vld [vmem:[%s4939_s20 + $0x12e0] sm:$0xff] }
 0x21e   : > { %2202 = vmatmul.mubr.f32.vlgmr.msra.gmra.mrb[12].mxu0 %v5960_v60  ;;  %v4373_v42 = vpack.c.bf16 %v887_v35, %v855_v34  ;;  %v1143_v34 = vld [vmem:[%s4939_s20 + $0x1be8] sm:$0xff]  ;;  %v1113_v35 = vld [vmem:[%s4939_s20 + $0x1af8] sm:$0xff] }
 0x21f   : > { %2273 = vmatmul.mubr.f32.vlgmr.msra.gmra.mrb[12].mxu1 %v5960_v60  ;;  %4340 = vmatpush1.bf16.msra.mxu0 %v4339_v51  ;;  %v4423_v51 = vpack.c.bf16 %v632_v46, %v600_v44  ;;  %v886_v44 = vld [vmem:[%s4939_s20 + $0x13e0] sm:$0xff] }
 0x220   : > { %4404 = vmatpush1.bf16.msra.mxu1 %v4403_v52  ;;  %4342 = vmatprep.subr.bf16.mxu0 %v4341_v53  ;;  %v4361_v52 = vpack.c.bf16 %v695_v48, %v663_v47  ;;  %v662_v53 = vld [vmem:[%s4939_s20 + $0xce0] sm:$0xff]  ;;  %v888_v47 = vld [vmem:[%s4939_s20 + $0x13f0] sm:$0xff]  ;;  %v919_v48 = vld [vmem:[%s4939_s20 + $0x14e8] sm:$0xff] }
 0x221   : > { %4406 = vmatprep.subr.bf16.mxu1 %v4405_v37  ;;  %2343 = vmatprep.mubr.f32.mxu0 %v5049_v19  ;;  %v4425_v37 = vpack.c.bf16 %v697_v50, %v665_v49  ;;  %v4363_v4 = vpack.c.bf16 %v694_v54, %v662_v53  ;;  %v951_v49 = vld [vmem:[%s4939_s20 + $0x15e8] sm:$0xff]  ;;  %v921_v50 = vld [vmem:[%s4939_s20 + $0x14f8] sm:$0xff]  ;;  %v918_v53 = vld [vmem:[%s4939_s20 + $0x14e0] sm:$0xff] }
 0x222   : > { %2414 = vmatprep.mubr.f32.mxu1 %v5049_v19  ;;  %v567_v19 = vld [vmem:[%s4939_s20 + $0x9e8] sm:$0xff]  ;;  %v4377_v55 = vpack.c.bf16 %v951_v49, %v919_v48  ;;  %v1177_v48 = vld [vmem:[%s4939_s20 + $0x1cf8] sm:$0xff] }
 0x223   : > { %4344 = vmatpush1.bf16.msra.mxu0 %v4343_v63  ;;  %v4353_v28 = vpack.c.bf16 %v567_v19, %v535_v23  ;;  %v729_v63 = vld [vmem:[%s4939_s20 + $0xef8] sm:$0xff]  ;;  %v4367_v19 = vpack.c.bf16 %v758_v10, %v726_v5 }
 0x224   : > { %4408 = vmatpush1.bf16.msra.mxu1 %v4407_v0  ;;  %4346 = vmatprep.subr.bf16.mxu0 %v4345_v1  ;;  %v761_v0 = vld [vmem:[%s4939_s20 + $0xff8] sm:$0xff] }
 0x225   : > { %4410 = vmatprep.subr.bf16.mxu1 %v4409_v6  ;;  %v1209_v49 = vld [vmem:[%s4939_s20 + $0x1df8] sm:$0xff] }
 0x227   : > { %4348 = vmatpush1.bf16.msra.mxu0 %v4347_v13 }
 0x228   : > { %4412 = vmatpush1.bf16.msra.mxu1 %v4411_v14  ;;  %4350 = vmatprep.subr.bf16.mxu0 %v4349_v15  ;;  %v4429_v14 = vpack.c.bf16 %v761_v0, %v729_v63  ;;  %v791_v15 = vld [vmem:[%s4939_s20 + $0x10e8] sm:$0xff] }
 0x229   : > { %4414 = vmatprep.subr.bf16.mxu1 %v4413_v21  ;;  %v825_v21 = vld [vmem:[%s4939_s20 + $0x11f8] sm:$0xff] }
 0x22b   : > { %4352 = vmatpush1.bf16.msra.mxu0 %v4351_v26 }
 0x22c   : > { %4416 = vmatpush1.bf16.msra.mxu1 %v4415_v27  ;;  %4354 = vmatprep.subr.bf16.mxu0 %v4353_v28  ;;  %v4369_v27 = vpack.c.bf16 %v823_v17, %v791_v15  ;;  %v790_v28 = vld [vmem:[%s4939_s20 + $0x10e0] sm:$0xff]  ;;  %v984_v15 = vld [vmem:[%s4939_s20 + $0x16f0] sm:$0xff] }
 0x22d   : > { %4418 = vmatprep.subr.bf16.mxu1 %v4417_v32  ;;  %v4433_v32 = vpack.c.bf16 %v825_v21, %v793_v20  ;;  %v1016_v20 = vld [vmem:[%s4939_s20 + $0x17f0] sm:$0xff]  ;;  %v1047_v21 = vld [vmem:[%s4939_s20 + $0x18e8] sm:$0xff] }
 0x22f   : > { %4356 = vmatpush1.bf16.msra.mxu0 %v4355_v39  ;;  %v889_v39 = vld [vmem:[%s4939_s20 + $0x13f8] sm:$0xff] }
 0x230   : > { %4420 = vmatpush1.bf16.msra.mxu1 %v4419_v40  ;;  %4358 = vmatprep.subr.bf16.mxu0 %v4357_v41  ;;  %v4371_v40 = vpack.c.bf16 %v822_v29, %v790_v28  ;;  %v4435_v41 = vpack.c.bf16 %v824_v33, %v792_v30  ;;  %v4437_v46 = vpack.c.bf16 %v889_v39, %v857_v38  ;;  %v1046_v28 = vld [vmem:[%s4939_s20 + $0x18e0] sm:$0xff]  ;;  %v1048_v30 = vld [vmem:[%s4939_s20 + $0x18f0] sm:$0xff]  ;;  %v1111_v33 = vld [vmem:[%s4939_s20 + $0x1ae8] sm:$0xff] }
 0x231   : > { %v1777_v56 = vpop.f32.mrb[6].mxu0  ;;  %4422 = vmatprep.subr.bf16.mxu1 %v4421_v16  ;;  %v856_v16 = vld [vmem:[%s4939_s20 + $0x12f0] sm:$0xff]  ;;  %v1078_v29 = vld [vmem:[%s4939_s20 + $0x19e0] sm:$0xff] }
 0x232   : > { %v1848_v61 = vpop.f32.mrb[6].mxu1  ;;  %v1779_v62 = vpop.f32.mrb[7].mxu0  ;;  %v4439_v54 = vpack.c.bf16 %v888_v47, %v856_v16  ;;  %v4387_v38 = vpack.c.bf16 %v1078_v29, %v1046_v28  ;;  %v1144_v16 = vld [vmem:[%s4939_s20 + $0x1bf0] sm:$0xff]  ;;  %v1207_v47 = vld [vmem:[%s4939_s20 + $0x1de8] sm:$0xff] }
 0x233   : > { %v2624_v1 = vcombine.low %v1777_v56, %v1779_v62  ;;  %v1850_v3 = vpop.f32.mrb[7].mxu1  ;;  %4360 = vmatpush1.bf16.msra.mxu0 %v4359_v8  ;;  %v953_v8 = vld [vmem:[%s4939_s20 + $0x15f8] sm:$0xff]  ;;  %v950_v56 = vld [vmem:[%s4939_s20 + $0x15e0] sm:$0xff]  ;;  %v983_v62 = vld [vmem:[%s4939_s20 + $0x16e8] sm:$0xff] }
 0x234   : > { %v2657_v6 = vcombine.low %v1848_v61, %v1850_v3  ;;  %4424 = vmatpush1.bf16.msra.mxu1 %v4423_v51  ;;  %4362 = vmatprep.subr.bf16.mxu0 %v4361_v52  ;;  %v2965_v51 = vpop.permute.xlu0 %2964  ;;  %v4375_v52 = vpack.c.bf16 %v886_v44, %v854_v43  ;;  %v4441_v61 = vpack.c.bf16 %v953_v8, %v921_v50  ;;  %v985_v3 = vld [vmem:[%s4939_s20 + $0x16f8] sm:$0xff]  ;;  %v1112_v43 = vld [vmem:[%s4939_s20 + $0x1af0] sm:$0xff] }
 0x235   : > { %v2631_v13 = vrot.slane %v2624_v1, %v5554_v45  ;;  %4426 = vmatprep.subr.bf16.mxu1 %v4425_v37  ;;  %v920_v37 = vld [vmem:[%s4939_s20 + $0x14f0] sm:$0xff]  ;;  %v1015_v1 = vld [vmem:[%s4939_s20 + $0x17e8] sm:$0xff]  ;;  %v4379_v5 = vpack.c.bf16 %v950_v56, %v918_v53  ;;  %v4455_v8 = vpack.c.bf16 %v1144_v16, %v1112_v43  ;;  %v1206_v53 = vld [vmem:[%s4939_s20 + $0x1de0] sm:$0xff] }
 0x236   : > { %v2664_v18 = vrot.slane %v2657_v6, %v5554_v45  ;;  %v4443_v6 = vpack.c.bf16 %v952_v57, %v920_v37  ;;  %v4381_v17 = vpack.c.bf16 %v1015_v1, %v983_v62  ;;  %v1208_v56 = vld [vmem:[%s4939_s20 + $0x1df0] sm:$0xff]  ;;  %v1239_v37 = vld [vmem:[%s4939_s20 + $0x1ee8] sm:$0xff] }
 0x237   : > { %v2632_v22 = vcombine.high %v2631_v13, %v2631_v13  ;;  %v2639_v23 = vrot.slane %v2631_v13, %v5554_v45  ;;  %4364 = vmatpush1.bf16.msra.mxu0 %v4363_v4  ;;  %v1017_v4 = vld [vmem:[%s4939_s20 + $0x17f8] sm:$0xff]  ;;  %v982_v13 = vld [vmem:[%s4939_s20 + $0x16e0] sm:$0xff]  ;;  %v1271_v57 = vld [vmem:[%s4939_s20 + $0x1fe8] sm:$0xff] }
 0x238   : > { %v2665_v25 = vcombine.high %v2664_v18, %v2664_v18  ;;  %v2672_v26 = vrot.slane %v2664_v18, %v5554_v45  ;;  %4428 = vmatpush1.bf16.msra.mxu1 %v4427_v7  ;;  %4366 = vmatprep.subr.bf16.mxu0 %v4365_v9  ;;  %v4445_v18 = vpack.c.bf16 %v1017_v4, %v985_v3  ;;  %v1238_v3 = vld [vmem:[%s4939_s20 + $0x1ee0] sm:$0xff] }
 0x239   : > { %v2646_v31 = vrot.slane %v2632_v22, %v5554_v45  ;;  %2650 = vst.msk [vmem:[#allocation2 + $0x6] ss:$8 sm:$0x3] %vm5568_vm0, %v2639_v23  ;;  %4430 = vmatprep.subr.bf16.mxu1 %v4429_v14  ;;  %v1014_v14 = vld [vmem:[%s4939_s20 + $0x17e0] sm:$0xff]  ;;  %v1079_v22 = vld [vmem:[%s4939_s20 + $0x19e8] sm:$0xff]  ;;  %v4397_v1 = vpack.c.bf16 %v1271_v57, %v1239_v37 }
 0x23a   : > { %v2679_v36 = vrot.slane %v2665_v25, %v5554_v45  ;;  %2683 = vst.msk [vmem:[#allocation2 + $0x7] ss:$8 sm:$0x3] %vm5568_vm0, %v2672_v26  ;;  %v4383_v25 = vpack.c.bf16 %v1014_v14, %v982_v13  ;;  %v4447_v26 = vpack.c.bf16 %v1016_v20, %v984_v15  ;;  %v1270_v4 = vld [vmem:[%s4939_s20 + $0x1fe0] sm:$0xff] }
 0x23b   : > { %2653 = vst.msk [vmem:[#allocation2 + $0x26] ss:$8 sm:$0x3] %vm5568_vm0, %v2646_v31  ;;  %4368 = vmatpush1.bf16.msra.mxu0 %v4367_v19  ;;  %v1049_v19 = vld [vmem:[%s4939_s20 + $0x18f8] sm:$0xff]  ;;  %v6133_v43 = vld [vmem:[%s5462_s22 + $0x8] sm:$0xff] }
 0x23c   : > { %2686 = vst.msk [vmem:[#allocation2 + $0x27] ss:$8 sm:$0x3] %vm5568_vm0, %v2679_v36  ;;  %4432 = vmatpush1.bf16.msra.mxu1 %v4431_v24  ;;  %4370 = vmatprep.subr.bf16.mxu0 %v4369_v27  ;;  %v1081_v24 = vld [vmem:[%s4939_s20 + $0x19f8] sm:$0xff]  ;;  %v4385_v27 = vpack.c.bf16 %v1079_v22, %v1047_v21 }
 0x23d   : > { %4434 = vmatprep.subr.bf16.mxu1 %v4433_v32  ;;  %v4449_v31 = vpack.c.bf16 %v1081_v24, %v1049_v19  ;;  %v1080_v32 = vld [vmem:[%s4939_s20 + $0x19f0] sm:$0xff]  ;;  %v1145_v36 = vld [vmem:[%s4939_s20 + $0x1bf8] sm:$0xff] }
 0x23e   : > { %v4451_v39 = vpack.c.bf16 %v1080_v32, %v1048_v30  ;;  %v4453_v44 = vpack.c.bf16 %v1145_v36, %v1113_v35 }
 0x23f   : > { %4372 = vmatpush1.bf16.msra.mxu0 %v4371_v40  ;;  %v4389_v40 = vpack.c.bf16 %v1143_v34, %v1111_v33 }
 0x240   : > { %4436 = vmatpush1.bf16.msra.mxu1 %v4435_v41  ;;  %4374 = vmatprep.subr.bf16.mxu0 %v4373_v42  ;;  %v1110_v41 = vld [vmem:[%s4939_s20 + $0x1ae0] sm:$0xff] }
 0x241   : > { %4438 = vmatprep.subr.bf16.mxu1 %v4437_v46  ;;  %v2952_v58 = vld [vmem:[#allocation2] sm:$0xff]  ;;  %v2953_v59 = vld [vmem:[#allocation2 + $0x8] sm:$0xff] }
 0x242   : > { %v6051_v63 = vadd.f32 %v2965_v51, %v2952_v58  ;;  %v6053_v0 = vadd.f32 %v2965_v51, %v2953_v59  ;;  %v1142_v42 = vld [vmem:[%s4939_s20 + $0x1be0] sm:$0xff]  ;;  %v1175_v46 = vld [vmem:[%s4939_s20 + $0x1ce8] sm:$0xff]  ;;  %v1241_v58 = vld [vmem:[%s4939_s20 + $0x1ef8] sm:$0xff] }
 0x243   : > { %4376 = vmatpush1.bf16.msra.mxu0 %v4375_v52  ;;  %v2956_v7 = vld [vmem:[#allocation2 + $0x20] sm:$0xff]  ;;  %v2957_v9 = vld [vmem:[#allocation2 + $0x28] sm:$0xff]  ;;  %v4391_v50 = vpack.c.bf16 %v1142_v42, %v1110_v41  ;;  %v4746_v42 = vmov 1  }
 0x244   : > { %4440 = vmatpush1.bf16.msra.mxu1 %v4439_v54  ;;  %v2980_v10 = vadd.f32 %v6053_v0, %v6051_v63  ;;  %4378 = vmatprep.subr.bf16.mxu0 %v4377_v55  ;;  %v6060_v11 = vadd.f32 %v2965_v51, %v2956_v7  ;;  %v6062_v12 = vadd.f32 %v2965_v51, %v2957_v9  ;;  %v1174_v52 = vld [vmem:[%s4939_s20 + $0x1ce0] sm:$0xff]  ;;  %v1176_v54 = vld [vmem:[%s4939_s20 + $0x1cf0] sm:$0xff]  ;;  %v1273_v59 = vld [vmem:[%s4939_s20 + $0x1ff8] sm:$0xff] }
 0x245   : > { %4442 = vmatprep.subr.bf16.mxu1 %v4441_v61  ;;  %v4393_v51 = vpack.c.bf16 %v1207_v47, %v1175_v46  ;;  %v4457_v55 = vpack.c.bf16 %v1209_v49, %v1177_v48  ;;  %v4395_v61 = vpack.c.bf16 %v1206_v53, %v1174_v52  ;;  %v4459_v62 = vpack.c.bf16 %v1208_v56, %v1176_v54  ;;  %v1272_v7 = vld [vmem:[%s4939_s20 + $0x1ff0] sm:$0xff] }
 0x246   : > { %2981 = vadd.xlane.f32.xlu1 %v2980_v10  ;;  %v2986_v23 = vadd.f32 %v6062_v12, %v6060_v11  ;;  %v4399_v9 = vpack.c.bf16 %v1270_v4, %v1238_v3  ;;  %4562 = vset.pattern.permute.xlu0 %v4746_v42 }
 0x247   : > { %4380 = vmatpush1.bf16.msra.mxu0 %v4379_v5  ;;  %v4461_v5 = vpack.c.bf16 %v1273_v59, %v1241_v58  ;;  %4561 = vset.pattern.permute.xlu1 %v4746_v42 }
 0x248   : > { %4444 = vmatpush1.bf16.msra.mxu1 %v4443_v6  ;;  %2987 = vadd.xlane.f32.xlu0 %v2986_v23  ;;  %v1240_v6 = vld [vmem:[%s4939_s20 + $0x1ef0] sm:$0xff] }
 0x249   : > { %4382 = vmatprep.subr.bf16.mxu0 %v4381_v17  ;;  %4446 = vmatprep.subr.bf16.mxu1 %v4445_v18  ;;  %v4463_v10 = vpack.c.bf16 %v1272_v7, %v1240_v6 }
 0x24b   : > { %4384 = vmatpush1.bf16.msra.mxu0 %v4383_v25 }
 0x24c   : > { %4448 = vmatpush1.bf16.msra.mxu1 %v4447_v26  ;;  %4386 = vmatprep.subr.bf16.mxu0 %v4385_v27 }
 0x24d   : > { %4450 = vmatprep.subr.bf16.mxu1 %v4449_v31 }
 0x24f   : > { %4388 = vmatpush1.bf16.msra.mxu0 %v4387_v38 }
 0x250   : > { %4452 = vmatpush1.bf16.msra.mxu1 %v4451_v39  ;;  %4390 = vmatprep.subr.bf16.mxu0 %v4389_v40 }
 0x251   : > { %4454 = vmatprep.subr.bf16.mxu1 %v4453_v44 }
 0x253   : > { %4392 = vmatpush1.bf16.msra.mxu0 %v4391_v50 }
 0x254   : > { %4456 = vmatpush1.bf16.msra.mxu1 %v4455_v8  ;;  %4394 = vmatprep.subr.bf16.mxu0 %v4393_v51 }
 0x255   : > { %4458 = vmatprep.subr.bf16.mxu1 %v4457_v55 }
 0x257   : > { %4396 = vmatpush1.bf16.msra.mxu0 %v4395_v61 }
 0x258   : > { %4460 = vmatpush1.bf16.msra.mxu1 %v4459_v62  ;;  %4398 = vmatprep.subr.bf16.mxu0 %v4397_v1 }
 0x259   : > { %4462 = vmatprep.subr.bf16.mxu1 %v4461_v5 }
 0x25b   : > { %4400 = vmatpush1.bf16.msra.mxu0 %v4399_v9 }
 0x25c   : > { %4464 = vmatpush1.bf16.msra.mxu1 %v4463_v10  ;;  %v2970_v10 = vpop.permute.xlu0 %2969 }
 0x25e   : > { %2344 = vmatmul.mubr.f32.vlgmr.msra.gmra.mrb[14].mxu0 %v5960_v60  ;;  %3049 = vperm.xlu0 %4562, %v6133_v43  }
 0x25f   : > { %2415 = vmatmul.mubr.f32.vlgmr.msra.gmra.mrb[14].mxu1 %v5960_v60 }
 0x271   : > { %v1919_v13 = vpop.f32.mrb[8].mxu0 }
 0x272   : > { %v1990_v14 = vpop.f32.mrb[8].mxu1  ;;  %v1921_v15 = vpop.f32.mrb[9].mxu0 }
 0x273   : > { %v2690_v17 = vcombine.low %v1919_v13, %v1921_v15  ;;  %v1992_v18 = vpop.f32.mrb[9].mxu1 }
 0x274   : > { %v2723_v20 = vcombine.low %v1990_v14, %v1992_v18 }
 0x275   : > { %v2697_v21 = vrot.slane %v2690_v17, %v5554_v45 }
 0x276   : > { %v2730_v22 = vrot.slane %v2723_v20, %v5554_v45 }
 0x277   : > { %v2698_v23 = vcombine.high %v2697_v21, %v2697_v21  ;;  %v2705_v19 = vrot.slane %v2697_v21, %v5554_v45 }
 0x278   : > { %v2731_v24 = vcombine.high %v2730_v22, %v2730_v22  ;;  %v2738_v25 = vrot.slane %v2730_v22, %v5554_v45 }
 0x279   : > { %v2712_v26 = vrot.slane %v2698_v23, %v5554_v45  ;;  %2716 = vst.msk [vmem:[#allocation2 + $0x10] ss:$8 sm:$0x3] %vm5568_vm0, %v2705_v19 }
 0x27a   : > { %v2745_v60 = vrot.slane %v2731_v24, %v5554_v45  ;;  %2749 = vst.msk [vmem:[#allocation2 + $0x11] ss:$8 sm:$0x3] %vm5568_vm0, %v2738_v25 }
 0x27b   : > { %2719 = vst.msk [vmem:[#allocation2 + $0x30] ss:$8 sm:$0x3] %vm5568_vm0, %v2712_v26 }
 0x27c   : > { %2752 = vst.msk [vmem:[#allocation2 + $0x31] ss:$8 sm:$0x3] %vm5568_vm0, %v2745_v60 }
 0x2b1   : > { %v2061_v27 = vpop.f32.mrb[10].mxu0 }
 0x2b2   : > { %v2132_v28 = vpop.f32.mrb[10].mxu1  ;;  %v2063_v29 = vpop.f32.mrb[11].mxu0 }
 0x2b3   : > { %v2756_v30 = vcombine.low %v2061_v27, %v2063_v29  ;;  %v2134_v31 = vpop.f32.mrb[11].mxu1 }
 0x2b4   : > { %v2789_v32 = vcombine.low %v2132_v28, %v2134_v31 }
 0x2b5   : > { %v2763_v33 = vrot.slane %v2756_v30, %v5554_v45 }
 0x2b6   : > { %v2796_v34 = vrot.slane %v2789_v32, %v5554_v45 }
 0x2b7   : > { %v2764_v35 = vcombine.high %v2763_v33, %v2763_v33  ;;  %v2771_v36 = vrot.slane %v2763_v33, %v5554_v45 }
 0x2b8   : > { %v2797_v38 = vcombine.high %v2796_v34, %v2796_v34  ;;  %v2804_v39 = vrot.slane %v2796_v34, %v5554_v45 }
 0x2b9   : > { %v2778_v40 = vrot.slane %v2764_v35, %v5554_v45  ;;  %2782 = vst.msk [vmem:[#allocation2 + $0x12] ss:$8 sm:$0x3] %vm5568_vm0, %v2771_v36  ;;  %v4747_v35 = vmov 2  }
 0x2ba   : > { %v2811_v41 = vrot.slane %v2797_v38, %v5554_v45  ;;  %2815 = vst.msk [vmem:[#allocation2 + $0x13] ss:$8 sm:$0x3] %vm5568_vm0, %v2804_v39 }
 0x2bb   : > { %2785 = vst.msk [vmem:[#allocation2 + $0x32] ss:$8 sm:$0x3] %vm5568_vm0, %v2778_v40 }
 0x2bc   : > { %2818 = vst.msk [vmem:[#allocation2 + $0x33] ss:$8 sm:$0x3] %vm5568_vm0, %v2811_v41 }
 0x2d3   : > { %v2982_v14 = vpop.xlane.xlu1 %2981 }
 0x2d4   : > { %v2992_v15 = vmul.f32 0.00390625, %v2982_v14 }
 0x2d5   : > { %v2988_v17 = vpop.xlane.xlu0 %2987 }
 0x2d6   : > { %v2996_v23 = vsub.f32 %v6051_v63, %v2992_v15  ;;  %v2994_v19 = vmul.f32 0.00390625, %v2988_v17  ;;  %v2997_v25 = vsub.f32 %v6053_v0, %v2992_v15  ;;  %v6169_v0 = vld [vmem:[%s5462_s22] sm:$0xff] }
 0x2d8   : > { %v3000_v2 = vsub.f32 %v6060_v11, %v2994_v19  ;;  %v3001_v28 = vsub.f32 %v6062_v12, %v2994_v19  ;;  %v3004_v30 = vmul.f32 %v2996_v23, %v2996_v23  ;;  %v3005_v31 = vmul.f32 %v2997_v25, %v2997_v25 }
 0x2da   : > { %v3012_v32 = vadd.f32 %v3005_v31, %v3004_v30  ;;  %v3008_v63 = vmul.f32 %v3000_v2, %v3000_v2  ;;  %v3009_v33 = vmul.f32 %v3001_v28, %v3001_v28 }
 0x2dc   : > { %v3018_v34 = vadd.f32 %v3009_v33, %v3008_v63  ;;  %v4748_v63 = vmov 3  }
 0x2dd   : > { %4565 = vset.pattern.permute.xlu0 %v4748_v63 }
 0x2f1   : > { %v2203_v44 = vpop.f32.mrb[12].mxu0 }
 0x2f2   : > { %v2274_v16 = vpop.f32.mrb[12].mxu1  ;;  %v2205_v46 = vpop.f32.mrb[13].mxu0 }
 0x2f3   : > { %v2822_v47 = vcombine.low %v2203_v44, %v2205_v46  ;;  %v2276_v48 = vpop.f32.mrb[13].mxu1 }
 0x2f4   : > { %v2855_v49 = vcombine.low %v2274_v16, %v2276_v48 }
 0x2f5   : > { %v2829_v50 = vrot.slane %v2822_v47, %v5554_v45 }
 0x2f6   : > { %v2862_v8 = vrot.slane %v2855_v49, %v5554_v45 }
 0x2f7   : > { %v2830_v51 = vcombine.high %v2829_v50, %v2829_v50  ;;  %v2837_v52 = vrot.slane %v2829_v50, %v5554_v45 }
 0x2f8   : > { %v2863_v53 = vcombine.high %v2862_v8, %v2862_v8  ;;  %v2870_v54 = vrot.slane %v2862_v8, %v5554_v45 }
 0x2f9   : > { %v2844_v55 = vrot.slane %v2830_v51, %v5554_v45  ;;  %2848 = vst.msk [vmem:[#allocation2 + $0x14] ss:$8 sm:$0x3] %vm5568_vm0, %v2837_v52 }
 0x2fa   : > { %v2877_v56 = vrot.slane %v2863_v53, %v5554_v45  ;;  %2881 = vst.msk [vmem:[#allocation2 + $0x15] ss:$8 sm:$0x3] %vm5568_vm0, %v2870_v54 }
 0x2fb   : > { %2851 = vst.msk [vmem:[#allocation2 + $0x34] ss:$8 sm:$0x3] %vm5568_vm0, %v2844_v55 }
 0x2fc   : > { %2884 = vst.msk [vmem:[#allocation2 + $0x35] ss:$8 sm:$0x3] %vm5568_vm0, %v2877_v56 }
 0x331   : > { %v2345_v37 = vpop.f32.mrb[14].mxu0 }
 0x332   : > { %v2416_v57 = vpop.f32.mrb[14].mxu1  ;;  %v2347_v58 = vpop.f32.mrb[15].mxu0 }
 0x333   : > { %v2888_v59 = vcombine.low %v2345_v37, %v2347_v58  ;;  %v2418_v61 = vpop.f32.mrb[15].mxu1 }
 0x334   : > { %v2921_v62 = vcombine.low %v2416_v57, %v2418_v61 }
 0x335   : > { %v2895_v1 = vrot.slane %v2888_v59, %v5554_v45 }
 0x336   : > { %v2928_v3 = vrot.slane %v2921_v62, %v5554_v45 }
 0x337   : > { %v2896_v4 = vcombine.high %v2895_v1, %v2895_v1  ;;  %v2903_v5 = vrot.slane %v2895_v1, %v5554_v45 }
 0x338   : > { %v2929_v6 = vcombine.high %v2928_v3, %v2928_v3  ;;  %v2936_v7 = vrot.slane %v2928_v3, %v5554_v45 }
 0x339   : > { %v2910_v9 = vrot.slane %v2896_v4, %v5554_v45  ;;  %2914 = vst.msk [vmem:[#allocation2 + $0x16] ss:$8 sm:$0x3] %vm5568_vm0, %v2903_v5 }
 0x33a   : > { %v2943_v13 = vrot.slane %v2929_v6, %v5554_v45  ;;  %2947 = vst.msk [vmem:[#allocation2 + $0x17] ss:$8 sm:$0x3] %vm5568_vm0, %v2936_v7 }
 0x33b   : > { %2917 = vst.msk [vmem:[#allocation2 + $0x36] ss:$8 sm:$0x3] %vm5568_vm0, %v2910_v9 }
 0x33c   : > { %2950 = vst.msk [vmem:[#allocation2 + $0x37] ss:$8 sm:$0x3] %vm5568_vm0, %v2943_v13 }
 0x341   : > { %v2954_v18 = vld [vmem:[#allocation2 + $0x10] sm:$0xff]  ;;  %v2955_v20 = vld [vmem:[#allocation2 + $0x18] sm:$0xff] }
 0x342   : > { %v2974_v21 = vadd.f32 %v2970_v10, %v2954_v18  ;;  %v2975_v22 = vadd.f32 %v2970_v10, %v2955_v20 }
 0x343   : > { %v2958_v45 = vld [vmem:[#allocation2 + $0x30] sm:$0xff]  ;;  %v2959_v24 = vld [vmem:[#allocation2 + $0x38] sm:$0xff] }
 0x344   : > { %v2983_v26 = vadd.f32 %v2975_v22, %v2974_v21  ;;  %v2978_v60 = vadd.f32 %v2970_v10, %v2958_v45  ;;  %v2979_v27 = vadd.f32 %v2970_v10, %v2959_v24 }
 0x346   : > { %2984 = vadd.xlane.f32.xlu1 %v2983_v26  ;;  %v2989_v29 = vadd.f32 %v2979_v27, %v2978_v60 }
 0x34a   : > { %2990 = vadd.xlane.f32.xlu1 %v2989_v29 }
 0x34e   : > { %3013 = vadd.xlane.f32.xlu1 %v3012_v32 }
 0x352   : > { %3019 = vadd.xlane.f32.xlu1 %v3018_v34 }
 0x363   : > { %3045 = vperm.xlu1 %4561, %v6169_v0  }
 0x367   : > { %4563 = vset.pattern.permute.xlu1 %v4747_v35 }
 0x368   : > { %3061 = vperm.xlu1 %4563, %v6169_v0  }
 0x3d3   : > { %v2985_v11 = vpop.xlane.xlu1 %2984 }
 0x3d4   : > { %v2993_v12 = vmul.f32 0.00390625, %v2985_v11 }
 0x3d6   : > { %v6173_v36 = vsub.f32 %v2974_v21, %v2993_v12  ;;  %v6175_v38 = vsub.f32 %v2975_v22, %v2993_v12 }
 0x3d7   : > { %v2991_v39 = vpop.xlane.xlu1 %2990 }
 0x3d8   : > { %v2995_v40 = vmul.f32 0.00390625, %v2991_v39  ;;  %v3006_v41 = vmul.f32 %v6173_v36, %v6173_v36  ;;  %v3007_v42 = vmul.f32 %v6175_v38, %v6175_v38 }
 0x3da   : > { %v6181_v44 = vsub.f32 %v2978_v60, %v2995_v40  ;;  %v6183_v16 = vsub.f32 %v2979_v27, %v2995_v40  ;;  %v3015_v46 = vadd.f32 %v3007_v42, %v3006_v41  ;;  %v3050_v41 = vpop.permute.xlu0 %3049 }
 0x3db   : > { %v3014_v47 = vpop.xlane.xlu1 %3013 }
 0x3dc   : > { %v3024_v48 = vmul.f32 0.00390625, %v3014_v47  ;;  %3016 = vadd.xlane.f32.xlu1 %v3015_v46  ;;  %v3010_v49 = vmul.f32 %v6181_v44, %v6181_v44  ;;  %v3011_v50 = vmul.f32 %v6183_v16, %v6183_v16 }
 0x3de   : > { %v3028_v8 = vadd.f32 1e-05, %v3024_v48  ;;  %v3021_v51 = vadd.f32 %v3011_v50, %v3010_v49 }
 0x3df   : > { %v3020_v52 = vpop.xlane.xlu1 %3019 }
 0x3e0   : > { %4568 = vrsqrt.f32 %v3028_v8  ;;  %v3026_v53 = vmul.f32 0.00390625, %v3020_v52  ;;  %3022 = vadd.xlane.f32.xlu1 %v3021_v51 }
 0x3e2   : > { %v3030_v54 = vadd.f32 1e-05, %v3026_v53 }
 0x3e3   : > { %v3046_v56 = vpop.permute.xlu1 %3045 }
 0x3e4   : > { %4570 = vrsqrt.f32 %v3030_v54 }
 0x3e7   : > { %v3062_v3 = vpop.permute.xlu1 %3061 }
 0x3ea   : > { %v4569_v55 = vpop.eup %4568 }
 0x3eb   : > { %v3036_v37 = vmul.f32 %v4569_v55, %v2996_v23  ;;  %v3037_v58 = vmul.f32 %v4569_v55, %v2997_v25 }
 0x3ed   : > { %v3052_v61 = vmul.f32 %v3046_v56, %v3036_v37  ;;  %v3053_v1 = vmul.f32 %v3046_v56, %v3037_v58 }
 0x3ee   : > { %v4571_v57 = vpop.eup %4570 }
 0x3ef   : > { %v3040_v59 = vmul.f32 %v4571_v57, %v3000_v2  ;;  %v3041_v62 = vmul.f32 %v4571_v57, %v3001_v28  ;;  %v3068_v5 = vadd.f32 %v3062_v3, %v3052_v61  ;;  %v3069_v7 = vadd.f32 %v3062_v3, %v3053_v1 }
 0x3f1   : > { %3065 = vperm.xlu1 %4563, %v6133_v43   ;;  %v3056_v4 = vmul.f32 %v3046_v56, %v3040_v59  ;;  %v3057_v6 = vmul.f32 %v3046_v56, %v3041_v62  ;;  %v3084_v10 = vmul.f32 0.70710677, %v3068_v5  ;;  %v3085_v14 = vmul.f32 0.70710677, %v3069_v7 }
 0x3f2   : > { %v3076_v45 = vmul.f32 0.5, %v3068_v5  ;;  %v3077_v24 = vmul.f32 0.5, %v3069_v7 }
 0x3f3   : > { %v3072_v9 = vadd.f32 %v3062_v3, %v3056_v4  ;;  %v3073_v13 = vadd.f32 %v3062_v3, %v3057_v6  ;;  %4572 = verf.f32 %v3084_v10 }
 0x3f4   : > { %4574 = verf.f32 %v3085_v14 }
 0x3f5   : > { %v3088_v15 = vmul.f32 0.70710677, %v3072_v9  ;;  %v3089_v17 = vmul.f32 0.70710677, %v3073_v13  ;;  %v3080_v2 = vmul.f32 0.5, %v3072_v9  ;;  %v3081_v28 = vmul.f32 0.5, %v3073_v13  ;;  %4564 = vset.pattern.permute.xlu1 %v4748_v63 }
 0x3f7   : > { %4576 = verf.f32 %v3088_v15 }
 0x3f8   : > { %4578 = verf.f32 %v3089_v17 }
 0x3fd   : > { %v4573_v18 = vpop.eup %4572 }
 0x3fe   : > { %v4575_v20 = vpop.eup %4574  ;;  %v3100_v22 = vadd.f32 1.0, %v4573_v18 }
 0x3ff   : > { %v3101_v23 = vadd.f32 1.0, %v4575_v20 }
 0x400   : > { %v6190_v25 = vmul.f32 %v3100_v22, %v3076_v45 }
 0x401   : > { %v4577_v21 = vpop.eup %4576  ;;  %v6192_v26 = vmul.f32 %v3101_v23, %v3077_v24 }
 0x402   : > { %v4579_v19 = vpop.eup %4578  ;;  %v3104_v60 = vadd.f32 1.0, %v4577_v21 }
 0x403   : > { %v3105_v27 = vadd.f32 1.0, %v4579_v19  ;;  %v3116_v29 = vadd.f32 %v6192_v26, %v6190_v25 }
 0x404   : > { %v6196_v30 = vmul.f32 %v3104_v60, %v3080_v2 }
 0x405   : > { %v6198_v31 = vmul.f32 %v3105_v27, %v3081_v28 }
 0x407   : > { %v3122_v32 = vadd.f32 %v6198_v31, %v6196_v30 }
 0x415   : > { %3117 = vadd.xlane.f32.xlu1 %v3116_v29 }
 0x419   : > { %3123 = vadd.xlane.f32.xlu1 %v3122_v32 }
 0x469   : > { %v3017_v33 = vpop.xlane.xlu1 %3016 }
 0x46a   : > { %v3025_v34 = vmul.f32 0.00390625, %v3017_v33  ;;  %v4749_v33 = vmov 4  }
 0x46c   : > { %v3029_v35 = vadd.f32 1e-05, %v3025_v34 }
 0x46d   : > { %v3023_v11 = vpop.xlane.xlu1 %3022 }
 0x46e   : > { %4580 = vrsqrt.f32 %v3029_v35  ;;  %v3027_v12 = vmul.f32 0.00390625, %v3023_v11 }
 0x470   : > { %v3031_v39 = vadd.f32 1e-05, %v3027_v12 }
 0x471   : > { %v3066_v50 = vpop.permute.xlu1 %3065 }
 0x472   : > { %4582 = vrsqrt.f32 %v3031_v39 }
 0x478   : > { %v4581_v40 = vpop.eup %4580 }
 0x479   : > { %v3038_v42 = vmul.f32 %v4581_v40, %v6173_v36  ;;  %v3039_v46 = vmul.f32 %v4581_v40, %v6175_v38 }
 0x47b   : > { %v3054_v47 = vmul.f32 %v3050_v41, %v3038_v42  ;;  %v3055_v48 = vmul.f32 %v3050_v41, %v3039_v46 }
 0x47c   : > { %v4583_v49 = vpop.eup %4582 }
 0x47d   : > { %v3042_v8 = vmul.f32 %v4583_v49, %v6181_v44  ;;  %v3043_v51 = vmul.f32 %v4583_v49, %v6183_v16  ;;  %v3070_v52 = vadd.f32 %v3066_v50, %v3054_v47  ;;  %v3071_v53 = vadd.f32 %v3066_v50, %v3055_v48 }
 0x47f   : > { %v3058_v54 = vmul.f32 %v3050_v41, %v3042_v8  ;;  %v3059_v55 = vmul.f32 %v3050_v41, %v3043_v51  ;;  %v3086_v56 = vmul.f32 0.70710677, %v3070_v52  ;;  %v3087_v37 = vmul.f32 0.70710677, %v3071_v53 }
 0x480   : > { %v3078_v62 = vmul.f32 0.5, %v3070_v52  ;;  %v3079_v1 = vmul.f32 0.5, %v3071_v53 }
 0x481   : > { %v3074_v57 = vadd.f32 %v3066_v50, %v3058_v54  ;;  %v3075_v58 = vadd.f32 %v3066_v50, %v3059_v55  ;;  %4584 = verf.f32 %v3086_v56 }
 0x482   : > { %4586 = verf.f32 %v3087_v37 }
 0x483   : > { %v3090_v36 = vmul.f32 0.70710677, %v3074_v57  ;;  %v3091_v38 = vmul.f32 0.70710677, %v3075_v58  ;;  %v3082_v7 = vmul.f32 0.5, %v3074_v57  ;;  %v3083_v10 = vmul.f32 0.5, %v3075_v58 }
 0x485   : > { %4588 = verf.f32 %v3090_v36 }
 0x486   : > { %4590 = verf.f32 %v3091_v38 }
 0x48b   : > { %v4585_v59 = vpop.eup %4584 }
 0x48c   : > { %v4587_v61 = vpop.eup %4586  ;;  %v3102_v44 = vadd.f32 1.0, %v4585_v59 }
 0x48d   : > { %v3103_v16 = vadd.f32 1.0, %v4587_v61 }
 0x48e   : > { %v3110_v4 = vmul.f32 %v3102_v44, %v3078_v62 }
 0x48f   : > { %v4589_v3 = vpop.eup %4588  ;;  %v3111_v6 = vmul.f32 %v3103_v16, %v3079_v1 }
 0x490   : > { %v4591_v5 = vpop.eup %4590  ;;  %v3106_v9 = vadd.f32 1.0, %v4589_v3 }
 0x491   : > { %v3107_v13 = vadd.f32 1.0, %v4591_v5  ;;  %v3119_v14 = vadd.f32 %v3111_v6, %v3110_v4 }
 0x492   : > { %v3114_v15 = vmul.f32 %v3106_v9, %v3082_v7 }
 0x493   : > { %v3115_v17 = vmul.f32 %v3107_v13, %v3083_v10  ;;  %3120 = vadd.xlane.f32.xlu0 %v3119_v14 }
 0x495   : > { %v3125_v18 = vadd.f32 %v3115_v17, %v3114_v15 }
 0x497   : > { %3126 = vadd.xlane.f32.xlu1 %v3125_v18 }
 0x4a2   : > { %v3118_v20 = vpop.xlane.xlu1 %3117 }
 0x4a3   : > { %v3128_v21 = vmul.f32 0.00390625, %v3118_v20 }
 0x4a5   : > { %v3132_v22 = vsub.f32 %v6190_v25, %v3128_v21  ;;  %v3133_v23 = vsub.f32 %v6192_v26, %v3128_v21 }
 0x4a6   : > { %v3124_v19 = vpop.xlane.xlu1 %3123 }
 0x4a7   : > { %v3130_v45 = vmul.f32 0.00390625, %v3124_v19  ;;  %v3140_v24 = vmul.f32 %v3132_v22, %v3132_v22  ;;  %v3141_v60 = vmul.f32 %v3133_v23, %v3133_v23 }
 0x4a9   : > { %v3136_v27 = vsub.f32 %v6196_v30, %v3130_v45  ;;  %v3137_v2 = vsub.f32 %v6198_v31, %v3130_v45  ;;  %v3148_v28 = vadd.f32 %v3141_v60, %v3140_v24  ;;  %3185 = vperm.xlu0 %4565, %v6133_v43  }
 0x4ab   : > { %3149 = vadd.xlane.f32.xlu1 %v3148_v28  ;;  %v3144_v29 = vmul.f32 %v3136_v27, %v3136_v27  ;;  %v3145_v32 = vmul.f32 %v3137_v2, %v3137_v2 }
 0x4ad   : > { %v3154_v63 = vadd.f32 %v3145_v32, %v3144_v29  ;;  %4567 = vset.pattern.permute.xlu0 %v4749_v33 }
 0x4af   : > { %3155 = vadd.xlane.f32.xlu1 %v3154_v63 }
 0x4c0   : > { %3181 = vperm.xlu1 %4564, %v6169_v0  }
 0x4c4   : > { %4566 = vset.pattern.permute.xlu1 %v4749_v33 }
 0x4c5   : > { %3197 = vperm.xlu1 %4566, %v6169_v0  }
 0x520   : > { %v3121_v25 = vpop.xlane.xlu0 %3120 }
 0x521   : > { %v3129_v26 = vmul.f32 0.00390625, %v3121_v25 }
 0x523   : > { %v6213_v30 = vsub.f32 %v3110_v4, %v3129_v26  ;;  %v6215_v31 = vsub.f32 %v3111_v6, %v3129_v26 }
 0x524   : > { %v3127_v34 = vpop.xlane.xlu1 %3126 }
 0x525   : > { %v3131_v35 = vmul.f32 0.00390625, %v3127_v34  ;;  %v3142_v11 = vmul.f32 %v6213_v30, %v6213_v30  ;;  %v3143_v12 = vmul.f32 %v6215_v31, %v6215_v31 }
 0x527   : > { %v6221_v39 = vsub.f32 %v3114_v15, %v3131_v35  ;;  %v6223_v40 = vsub.f32 %v3115_v17, %v3131_v35  ;;  %v3151_v41 = vadd.f32 %v3143_v12, %v3142_v11 }
 0x528   : > { %v3186_v33 = vpop.permute.xlu0 %3185 }
 0x529   : > { %v3146_v0 = vmul.f32 %v6221_v39, %v6221_v39  ;;  %v3147_v42 = vmul.f32 %v6223_v40, %v6223_v40  ;;  %3152 = vadd.xlane.f32.xlu1 %v3151_v41 }
 0x52b   : > { %v3157_v46 = vadd.f32 %v3147_v42, %v3146_v0 }
 0x52d   : > { %3158 = vadd.xlane.f32.xlu1 %v3157_v46 }
 0x538   : > { %v3150_v47 = vpop.xlane.xlu1 %3149 }
 0x539   : > { %v3160_v48 = vmul.f32 0.00390625, %v3150_v47 }
 0x53b   : > { %v3164_v49 = vadd.f32 1e-05, %v3160_v48 }
 0x53c   : > { %v3156_v50 = vpop.xlane.xlu1 %3155 }
 0x53d   : > { %4592 = vrsqrt.f32 %v3164_v49  ;;  %v3162_v8 = vmul.f32 0.00390625, %v3156_v50 }
 0x53e   : > { %3201 = vperm.xlu1 %4566, %v6133_v43  }
 0x53f   : > { %v3166_v51 = vadd.f32 1e-05, %v3162_v8 }
 0x540   : > { %v3182_v52 = vpop.permute.xlu1 %3181 }
 0x541   : > { %4594 = vrsqrt.f32 %v3166_v51 }
 0x544   : > { %v3198_v56 = vpop.permute.xlu1 %3197 }
 0x547   : > { %v4593_v53 = vpop.eup %4592 }
 0x548   : > { %v3172_v54 = vmul.f32 %v4593_v53, %v3132_v22  ;;  %v3173_v55 = vmul.f32 %v4593_v53, %v3133_v23 }
 0x54a   : > { %v3188_v37 = vmul.f32 %v3182_v52, %v3172_v54  ;;  %v3189_v57 = vmul.f32 %v3182_v52, %v3173_v55 }
 0x54b   : > { %v4595_v58 = vpop.eup %4594 }
 0x54c   : > { %v3176_v36 = vmul.f32 %v4595_v58, %v3136_v27  ;;  %v3177_v38 = vmul.f32 %v4595_v58, %v3137_v2  ;;  %v3204_v59 = vadd.f32 %v3198_v56, %v3188_v37  ;;  %v3205_v61 = vadd.f32 %v3198_v56, %v3189_v57 }
 0x54e   : > { %v3192_v62 = vmul.f32 %v3182_v52, %v3176_v36  ;;  %v3193_v44 = vmul.f32 %v3182_v52, %v3177_v38  ;;  %v3220_v1 = vmul.f32 0.70710677, %v3204_v59  ;;  %v3221_v16 = vmul.f32 0.70710677, %v3205_v61 }
 0x54f   : > { %v3212_v7 = vmul.f32 0.5, %v3204_v59  ;;  %v3213_v14 = vmul.f32 0.5, %v3205_v61 }
 0x550   : > { %v3208_v3 = vadd.f32 %v3198_v56, %v3192_v62  ;;  %v3209_v43 = vadd.f32 %v3198_v56, %v3193_v44  ;;  %4596 = verf.f32 %v3220_v1 }
 0x551   : > { %4598 = verf.f32 %v3221_v16 }
 0x552   : > { %v3224_v4 = vmul.f32 0.70710677, %v3208_v3  ;;  %v3225_v5 = vmul.f32 0.70710677, %v3209_v43  ;;  %v3216_v20 = vmul.f32 0.5, %v3208_v3  ;;  %v3217_v22 = vmul.f32 0.5, %v3209_v43 }
 0x554   : > { %4600 = verf.f32 %v3224_v4 }
 0x555   : > { %4602 = verf.f32 %v3225_v5 }
 0x55a   : > { %v4597_v6 = vpop.eup %4596 }
 0x55b   : > { %v3236_v9 = vadd.f32 1.0, %v4597_v6  ;;  %v4599_v10 = vpop.eup %4598 }
 0x55c   : > { %v3237_v15 = vadd.f32 1.0, %v4599_v10 }
 0x55d   : > { %v3244_v17 = vmul.f32 %v3236_v9, %v3212_v7 }
 0x55e   : > { %v4601_v13 = vpop.eup %4600  ;;  %v3245_v19 = vmul.f32 %v3237_v15, %v3213_v14 }
 0x55f   : > { %v4603_v18 = vpop.eup %4602  ;;  %v3240_v21 = vadd.f32 1.0, %v4601_v13  ;;  %3252 = vst [vmem:[%s6231_s6] sm:$0xff] %v3244_v17 }
 0x560   : > { %v3241_v23 = vadd.f32 1.0, %v4603_v18  ;;  %3253 = vst [vmem:[%s6231_s6 + $0x8] sm:$0xff] %v3245_v19 }
 0x561   : > { %v3248_v45 = vmul.f32 %v3240_v21, %v3216_v20 }
 0x562   : > { %v3249_v24 = vmul.f32 %v3241_v23, %v3217_v22 }
 0x563   : > { %3256 = vst [vmem:[%s6231_s6 + $0x20] sm:$0xff] %v3248_v45 }
 0x564   : > { %3257 = vst [vmem:[%s6231_s6 + $0x28] sm:$0xff] %v3249_v24 }
 0x5b6   : > { %v3153_v60 = vpop.xlane.xlu1 %3152 }
 0x5b7   : > { %v3161_v27 = vmul.f32 0.00390625, %v3153_v60 }
 0x5b9   : > { %v3165_v2 = vadd.f32 1e-05, %v3161_v27 }
 0x5ba   : > { %v3159_v28 = vpop.xlane.xlu1 %3158 }
 0x5bb   : > { %4604 = vrsqrt.f32 %v3165_v2  ;;  %v3163_v29 = vmul.f32 0.00390625, %v3159_v28 }
 0x5bd   : > { %v3167_v32 = vadd.f32 1e-05, %v3163_v29 }
 0x5be   : > { %v3202_v12 = vpop.permute.xlu1 %3201 }
 0x5bf   : > { %4606 = vrsqrt.f32 %v3167_v32 }
 0x5c5   : > { %v4605_v63 = vpop.eup %4604 }
 0x5c6   : > { %v3174_v25 = vmul.f32 %v4605_v63, %v6213_v30  ;;  %v3175_v26 = vmul.f32 %v4605_v63, %v6215_v31 }
 0x5c8   : > { %v3190_v34 = vmul.f32 %v3186_v33, %v3174_v25  ;;  %v3191_v35 = vmul.f32 %v3186_v33, %v3175_v26 }
 0x5c9   : > { %v4607_v11 = vpop.eup %4606 }
 0x5ca   : > { %v3178_v41 = vmul.f32 %v4607_v11, %v6221_v39  ;;  %v3179_v0 = vmul.f32 %v4607_v11, %v6223_v40  ;;  %v3206_v42 = vadd.f32 %v3202_v12, %v3190_v34  ;;  %v3207_v46 = vadd.f32 %v3202_v12, %v3191_v35 }
 0x5cc   : > { %v3194_v47 = vmul.f32 %v3186_v33, %v3178_v41  ;;  %v3195_v48 = vmul.f32 %v3186_v33, %v3179_v0  ;;  %v3222_v49 = vmul.f32 0.70710677, %v3206_v42  ;;  %v3223_v50 = vmul.f32 0.70710677, %v3207_v46 }
 0x5cd   : > { %v3214_v53 = vmul.f32 0.5, %v3206_v42  ;;  %v3215_v55 = vmul.f32 0.5, %v3207_v46 }
 0x5ce   : > { %v3210_v8 = vadd.f32 %v3202_v12, %v3194_v47  ;;  %v3211_v51 = vadd.f32 %v3202_v12, %v3195_v48  ;;  %4608 = verf.f32 %v3222_v49 }
 0x5cf   : > { %4610 = verf.f32 %v3223_v50 }
 0x5d0   : > { %v3226_v30 = vmul.f32 0.70710677, %v3210_v8  ;;  %v3227_v52 = vmul.f32 0.70710677, %v3211_v51  ;;  %v3218_v58 = vmul.f32 0.5, %v3210_v8  ;;  %v3219_v38 = vmul.f32 0.5, %v3211_v51 }
 0x5d2   : > { %4612 = verf.f32 %v3226_v30 }
 0x5d3   : > { %4614 = verf.f32 %v3227_v52 }
 0x5d8   : > { %v4609_v31 = vpop.eup %4608 }
 0x5d9   : > { %v3238_v39 = vadd.f32 1.0, %v4609_v31  ;;  %v4611_v40 = vpop.eup %4610 }
 0x5da   : > { %v3239_v56 = vadd.f32 1.0, %v4611_v40 }
 0x5db   : > { %v3246_v37 = vmul.f32 %v3238_v39, %v3214_v53 }
 0x5dc   : > { %v4613_v54 = vpop.eup %4612  ;;  %v3247_v61 = vmul.f32 %v3239_v56, %v3215_v55 }
 0x5dd   : > { %v4615_v57 = vpop.eup %4614  ;;  %v3242_v36 = vadd.f32 1.0, %v4613_v54  ;;  %3254 = vst [vmem:[%s6231_s6 + $0x10] sm:$0xff] %v3246_v37 }
 0x5de   : > { %v3243_v59 = vadd.f32 1.0, %v4615_v57  ;;  %3255 = vst [vmem:[%s6231_s6 + $0x18] sm:$0xff] %v3247_v61 }
 0x5df   : > { %v3250_v62 = vmul.f32 %v3242_v36, %v3218_v58 }
 0x5e0   : > { %v3251_v44 = vmul.f32 %v3243_v59, %v3219_v38 }
 0x5e1   : > { %3258 = vst [vmem:[%s6231_s6 + $0x30] sm:$0xff] %v3250_v62 }
 0x5e2   : > { %3259 = vst [vmem:[%s6231_s6 + $0x38] sm:$0xff] %v3251_v44 }
 0x5e3   : > { %s3440_s19 = sshll.u32 %s4729_s15, 9  ;;  %s3294_s27 = sshll.u32 %s6231_s6, 4  ;;  %s3295_s27 = int_to_ptr.vmem [resolvable:$true] %s3294_s27 }
 0x5e4   : > { %s3277_s10 = scalar_lea.hbm %s6291_s3, %s3440_s19  ;;  %s4750_s30 = smov 512  }
 0x5e5   : > { %p6315_p10 = scmp.ne.s32.totalorder %s6301_s24, 0  ;;  %s4751_s8 = smov 1024  }
 0x5e6   : > { %s4752_s20 = smov 2   ;;  %s4753_s21 = smov 256  }
 0x5e7   : > { %4471 = sst [smem:[#allocation10]] (%p6315_p10), %s4750_s30  ;;  %s4754_s15 = smov 16  }
 0x5e8   : > { %4472 = sst [smem:[#allocation10 + $0x1]] (%p6315_p10), %s4751_s8  ;;  %s4755_s23 = smov [#allocation9]  }
 0x5e9   : > { %4473 = sst [smem:[#allocation10 + $0x2]] (%p6315_p10), %s4752_s20  ;;  %s4756_s26 = smov 0  }
 0x5ea   : > { %4474 = sst [smem:[#allocation10 + $0x3]] (%p6315_p10), %s4753_s21 }
 0x5eb   : > { %4475 = sst [smem:[#allocation10 + $0x4]] (%p6315_p10), %s4753_s21 }
 0x5ec   : > { %4476 = sst [smem:[#allocation10 + $0x5]] (%p6315_p10), %s4754_s15 }
 0x5ed   : > { %4477 = dma.general (%p6315_p10), %s3295_s27, 1024, %s3277_s10, %s3261_s11, %s4755_s23, [#allocation10], %s4756_s26, 0  }
 0x5ee PF: > { %s3322_s29 = sand.u32 1, %s4717_s12   ;;  %p6316_p11 = scmp.ne.s32.totalorder %s6302_s25, 0 }
 0x5ef   : > { %p6317_p1 = scmp.ge.s32.totalorder %s4737_s17, 2  ;;  %s3323_s18 = scalar_lea.sflag [#allocation5], %s3322_s29 }
 0x5f1   : > { %p4488_p0 = pnand %p6317_p1, %p6316_p11 }
 0x5f3   : > { %4712 = dma.done.wait (!%p4488_p0), %s3323_s18, 1024  }
 0x5f4   : > { %4714 = vsyncadd (!%p4488_p0), %s3323_s18, 4294966272  ;;  %s20_s17 = sadd.s32 1, %s4737_s17   ;;  %s6318_s12 = smov %s4721_s13 }
 0x5f5   : > { %p17_p9 = scmp.ge.s32.totalorder %s20_s17, 4   ;;  %s6319_s13 = smov %s4725_s14 }
 0x5f6   : > { %s6320_s14 = smov %s4896_s28  ;;  %s6321_s15 = smov %s4733_s16 }
 0x5f7   : > { %s6322_s16 = smov %s6324_s4  ;;  %19 = sbr.rel (!%p17_p9) target bundleno = 7 (0x7), region = 122 }
 0x5fe   :  { %3328 = vsyncpa [#allocation4], 1 }
 0x5ff   :  { %3330 = vsyncpa [#allocation4 + $0x1], 1 }
 0x600   :  { %3331 = vsyncpa [#allocation7], 1 }
 0x601   :  { %3333 = vsyncpa [#allocation7 + $0x1], 1 }
 0x602   :  { %3334 = vsyncpa [#allocation5], 1 }
 0x603   :  { %3336 = vsyncpa [#allocation5 + $0x1], 1 }

</bundles_post_ra>
